<compile_context>
chip_gen: v7x
topology: tpu7x:2x2x1
jax: 0.10.0
libtpu: 0.0.40
codegen_flags: <defaults>
</compile_context>

<pallas_src>
import functools

import jax
import jax.numpy as jnp
import numpy as np
from jax import lax
from jax.experimental import pallas as pl
from jax.experimental.pallas import tpu as pltpu


# --------------------------------------------------------------------------------------
# Weight layout plumbing (runs in the JAX wrapper, tiny arrays).
#
# Row-flat convention: an activation with logical shape (rows, cols, C) is stored as a 2-D
# array (rows, cols*C) with lane index = col*C + channel.
#
# Phase (sub-pixel) decomposition of ConvTranspose2d(k=4, stride=2, padding=1):
#   y[2q+a, 2r+b, co] = sum_{dr,dc in {0,1}, ci} xpad[q+a+dr, r+b+dc, ci]
#                                               * w_pt[ci, co, KH[a,dr], KH[b,dc]]
# with xpad = input zero-padded by 1.  No zero-dilated input is ever built.
# --------------------------------------------------------------------------------------
_KH = np.array([[3, 1], [2, 0]], dtype=np.int32)   # _KH[phase][d] -> kernel tap index


def _tconv_toeplitz(w_pt, Wi):
    """w_pt: (Cin, Cout, 4, 4) ConvTranspose2d weight (stride 2, padding 1).
    Returns M with shape (2[a], 2[dr], (Wi+2)*Cin, (2*Wi+2)*Cout) such that, with
    Xf = row-flat spatially-padded input (Hi+2, (Wi+2)*Cin):
        out_rows_phase_a = sum_dr Xf[a+dr : a+dr+Hi, :] @ M[a, dr]
    produces the *padded* row-flat output rows 2q+a (zero left/right pad columns included)."""
    Cin, Cout, K, _ = w_pt.shape
    assert K == 4
    # Kp[a, dr, b, dc, ci, co] = w_pt[ci, co, KH[a, dr], KH[b, dc]]
    Kp = w_pt[:, :, _KH[:, None, :, None], _KH[None, :, None, :]]   # (Cin, Cout, a, b, dr, dc)
    Kp = jnp.transpose(Kp, (2, 4, 3, 5, 0, 1))                      # (a, dr, b, dc, Cin, Cout)
    # Placement (constant): P[b, dc, r, j, m] = 1  iff  j == r+b+dc  and  m == 2r+b+1 (padded col)
    P = np.zeros((2, 2, Wi, Wi + 2, 2 * Wi + 2), np.float32)
    for b in range(2):
        for dc in range(2):
            for r in range(Wi):
                P[b, dc, r, r + b + dc, 2 * r + b + 1] = 1.0
    M = jnp.einsum('bdrjm,ADbdio->ADjimo', jnp.asarray(P), Kp)
    return M.reshape(2, 2, (Wi + 2) * Cin, (2 * Wi + 2) * Cout)


def _conv_toeplitz(w_pt, in_cols, out_cols):
    """Plain stride-1 Conv2d with a single output channel.  w_pt: (1, Cin, K, K).
    Returns M with shape (K[dr], in_cols*Cin, out_cols) such that
        out = sum_dr Xf[dr : dr+Hout, :] @ M[dr]
    where Xf is the row-flat input slab whose columns span `in_cols` logical columns."""
    _, Cin, K, K2 = w_pt.shape
    wa = w_pt[0]                                    # (Cin, K, K) = (ci, dr, dc)
    P = np.zeros((K2, in_cols, out_cols), np.float32)
    for dc in range(K2):
        for m in range(out_cols):
            P[dc, m + dc, m] = 1.0
    M = jnp.einsum('djm,iRd->Rjim', jnp.asarray(P), wa)   # (K, in_cols, Cin, out_cols)
    return M.reshape(K, in_cols * Cin, out_cols)


# --------------------------------------------------------------------------------------
# Fused Pallas kernel: whole CriticV2 forward for one batch element per grid step.
# --------------------------------------------------------------------------------------
def _make_critic_kernel(dims, Hf, Wf, Cf, ks, leaky, mxu_dtype):
    n_layers = len(dims)

    def kernel(*refs):
        x_ref = refs[0]
        wl_refs = refs[1:1 + n_layers]
        wadv_ref = refs[1 + n_layers]
        wpm_ref = refs[2 + n_layers]
        p_ref = refs[3 + n_layers]
        fpart_ref = refs[4 + n_layers]
        y_refs = refs[5 + n_layers:]

        # Zero the padded activation scratches (borders must be zero; interiors overwritten).
        for yr in y_refs:
            yr[...] = jnp.zeros_like(yr)

        # ---- backbone: phase-decomposed ConvTranspose2d(k4, s2, p1) + LeakyReLU(0.01) ----
        cur = x_ref[0]                                   # (Hi+2, (Wi+2)*Cin), row-flat, padded
        for l, (Hi, Wi, _Cin, Cout) in enumerate(dims):
            out_w = (2 * Wi + 2) * Cout                  # padded row-flat output row width
            for a in range(2):                           # output row phase: rows 2q+a
                acc = jnp.zeros((Hi, out_w), jnp.float32)
                for dr in range(2):
                    lhs = cur[a + dr:a + dr + Hi, :].astype(mxu_dtype)
                    acc = acc + jnp.dot(lhs, wl_refs[l][a, dr],
                                        preferred_element_type=jnp.float32)
                y = jnp.maximum(acc, leaky * acc)        # LeakyReLU on the f32 accumulator
                for q in range(Hi):                      # interleaved (even/odd) row writeback
                    y_refs[l][1 + 2 * q + a:2 + 2 * q + a, :] = y[q:q + 1, :]
            cur = y_refs[l][...]                         # padded input for the next stage

        # ---- adv: Conv2d(Cf, 1, 3, padding=1); only its global sum is needed for f ----
        acc = jnp.zeros((Hf, Wf), jnp.float32)
        for dr in range(3):
            lhs = cur[dr:dr + Hf, :].astype(mxu_dtype)
            acc = acc + jnp.dot(lhs, wadv_ref[dr], preferred_element_type=jnp.float32)
        fpart_ref[0] = jnp.sum(acc, axis=1, keepdims=True)       # per-sample row sums (Hf, 1)

        # ---- predict_match: Conv2d(Cf, 1, ks, padding=0) ----
        pout = Wf - ks + 1
        acc = jnp.zeros((pout, pout), jnp.float32)
        for dr in range(ks):
            lhs = cur[1 + dr:1 + dr + pout, Cf:Cf + Wf * Cf].astype(mxu_dtype)
            acc = acc + jnp.dot(lhs, wpm_ref[dr], preferred_element_type=jnp.float32)
        p_ref[0] = acc

    return kernel


def critic_v2_forward(params, img, cc, *, mxu_dtype=jnp.float32):
    """img, cc: NCHW float32 of identical shape (as in the PyTorch module)."""
    assert img.shape == cc.shape
    N, _, H, W = img.shape
    backbone = params["backbone"]
    n_layers = len(backbone)

    # Input layout plumbing: channel concat, NCHW->NHWC, pad 1, row-flatten to (rows, W*C).
    x = jnp.concatenate((img, cc), axis=1)
    x = jnp.transpose(x, (0, 2, 3, 1))
    C0 = x.shape[-1]
    x = jnp.pad(x, ((0, 0), (1, 1), (1, 1), (0, 0)))
    x = x.reshape(N, H + 2, (W + 2) * C0).astype(mxu_dtype)

    # Per-layer banded weight matrices.
    dims = []
    wls = []
    Hi, Wi, Cin = H, W, C0
    for w in backbone:
        Cout = w.shape[1]
        dims.append((Hi, Wi, Cin, Cout))
        wls.append(_tconv_toeplitz(w, Wi).astype(mxu_dtype))
        Hi, Wi, Cin = 2 * Hi, 2 * Wi, Cout
    Hf, Wf, Cf = Hi, Wi, Cin
    ks = params["predict_match"].shape[-1]
    pout = Wf - ks + 1
    wadv = _conv_toeplitz(params["adv"], Wf + 2, Wf).astype(mxu_dtype)
    wpm = _conv_toeplitz(params["predict_match"], Wf, pout).astype(mxu_dtype)

    kernel = _make_critic_kernel(dims, Hf, Wf, Cf, ks, 0.01, mxu_dtype)

    in_specs = [pl.BlockSpec((1, H + 2, (W + 2) * C0), lambda n: (n, 0, 0))]
    for wl in wls:
        in_specs.append(pl.BlockSpec(wl.shape, lambda n: (0, 0, 0, 0)))
    in_specs.append(pl.BlockSpec(wadv.shape, lambda n: (0, 0, 0)))
    in_specs.append(pl.BlockSpec(wpm.shape, lambda n: (0, 0, 0)))

    out_shape = [jax.ShapeDtypeStruct((N, pout, pout), jnp.float32),
                 jax.ShapeDtypeStruct((N, Hf, 1), jnp.float32)]
    out_specs = [pl.BlockSpec((1, pout, pout), lambda n: (n, 0, 0)),
                 pl.BlockSpec((1, Hf, 1), lambda n: (n, 0, 0))]

    scratch_shapes = [pltpu.VMEM((2 * d[0] + 2, (2 * d[1] + 2) * d[3]), jnp.float32)
                      for d in dims]

    p, fpart = pl.pallas_call(
        kernel,
        out_shape=out_shape,
        grid_spec=pltpu.PrefetchScalarGridSpec(
            num_scalar_prefetch=0,
            grid=(N,),
            in_specs=in_specs,
            out_specs=out_specs,
            scratch_shapes=scratch_shapes),
        compiler_params=pltpu.CompilerParams(
            dimension_semantics=("parallel",),
            vmem_limit_bytes=32 * 1024 * 1024),
    )(x, *wls, wadv, wpm)

    f = jnp.sum(fpart) / (N * Hf * Wf)                 # tiny scalar finish of mean(adv(x))
    return {"f": f, "p": jnp.squeeze(p)}               # .squeeze() to mirror torch semantics


# --------------------------------------------------------------------------------------
# Synthetic parameters (channel widths shrunk from 64 to `base_channels` for the demo).
# --------------------------------------------------------------------------------------
def init_critic_v2_params(key, img_size=8, base_channels=8, n_downsamples=2):
    params = {"backbone": []}
    in_ch, out_ch = 6, base_channels
    for _ in range(n_downsamples):
        key, sub = jax.random.split(key)
        # ConvTranspose2d weight layout: (Cin, Cout, K, K)
        params["backbone"].append(
            0.1 * jax.random.normal(sub, (in_ch, out_ch, 4, 4), jnp.float32))
        in_ch, out_ch = out_ch, out_ch * 2
    key, sub = jax.random.split(key)
    params["adv"] = 0.1 * jax.random.normal(sub, (1, in_ch, 3, 3), jnp.float32)
    ks = img_size // (2 ** n_downsamples)
    key, sub = jax.random.split(key)
    params["predict_match"] = 0.1 * jax.random.normal(sub, (1, in_ch, ks, ks), jnp.float32)
    return params


# --------------------------------------------------------------------------------------
# Pure-JAX reference (validation only).
# --------------------------------------------------------------------------------------
def critic_v2_reference(params, img, cc):
    x = jnp.concatenate((img, cc), axis=1)
    x = jnp.transpose(x, (0, 2, 3, 1))
    dn = ("NHWC", "HWIO", "NHWC")
    for w in params["backbone"]:
        K = w.shape[2]
        w_hwio = jnp.transpose(w[:, :, ::-1, ::-1], (2, 3, 0, 1))
        x = lax.conv_general_dilated(x, w_hwio, (1, 1),
                                     [(K - 2, K - 2), (K - 2, K - 2)],
                                     lhs_dilation=(2, 2), dimension_numbers=dn)
        x = jnp.where(x >= 0, x, 0.01 * x)
    adv = lax.conv_general_dilated(x, jnp.transpose(params["adv"], (2, 3, 1, 0)),
                                   (1, 1), [(1, 1), (1, 1)], dimension_numbers=dn)
    f = jnp.mean(adv)
    p = lax.conv_general_dilated(x, jnp.transpose(params["predict_match"], (2, 3, 1, 0)),
                                 (1, 1), [(0, 0), (0, 0)], dimension_numbers=dn)
    p = jnp.squeeze(jnp.transpose(p, (0, 3, 1, 2)))
    return {"f": f, "p": p}


# --------------------------------------------------------------------------------------
if __name__ == "__main__":
    IMG_SIZE, N_DOWN, BASE_CH, BATCH = 8, 2, 8, 2

    key = jax.random.PRNGKey(0)
    kp, ki, kc = jax.random.split(key, 3)
    params = init_critic_v2_params(kp, img_size=IMG_SIZE,
                                   base_channels=BASE_CH, n_downsamples=N_DOWN)
    img = jax.random.normal(ki, (BATCH, 3, IMG_SIZE, IMG_SIZE), jnp.float32)
    cc = jax.random.normal(kc, (BATCH, 3, IMG_SIZE, IMG_SIZE), jnp.float32)

    ref = critic_v2_reference(params, img, cc)

    # f32 path: exact PyTorch semantics.
    fwd = jax.jit(functools.partial(critic_v2_forward, mxu_dtype=jnp.float32))
    out = fwd(params, img, cc)
    jax.block_until_ready(out["p"])
    jax.block_until_ready(out["f"])
    assert out["p"].shape == ref["p"].shape, (out["p"].shape, ref["p"].shape)
    assert jnp.allclose(out["f"], ref["f"], atol=1e-3, rtol=1e-3)
    assert jnp.allclose(out["p"], ref["p"], atol=1e-3, rtol=1e-3)

    # bf16 MXU-operand path (f32 accumulation + f32 epilogue): loose sanity check only.
    fwd_bf16 = jax.jit(functools.partial(critic_v2_forward, mxu_dtype=jnp.bfloat16))
    out16 = fwd_bf16(params, img, cc)
    jax.block_until_ready(out16["p"])
    assert float(jnp.max(jnp.abs(out16["p"] - ref["p"]))) < 5e-2
    assert float(jnp.abs(out16["f"] - ref["f"])) < 5e-2

    print("KERNEL_OK")
</pallas_src>

<mosaic_0001>
module attributes {stable_mosaic.version = 11 : i64} {
  func.func @kernel(%arg0: i32, %arg1: memref<1x10x60xf32, #tpu.memory_space<vmem>>, %arg2: memref<2x2x60x144xf32, #tpu.memory_space<vmem>>, %arg3: memref<2x2x144x544xf32, #tpu.memory_space<vmem>>, %arg4: memref<3x544x32xf32, #tpu.memory_space<vmem>>, %arg5: memref<2x512x31xf32, #tpu.memory_space<vmem>>, %arg6: memref<1x31x31xf32, #tpu.memory_space<vmem>>, %arg7: memref<1x32x1xf32, #tpu.memory_space<vmem>>, %arg8: memref<18x144xf32, #tpu.memory_space<vmem>>, %arg9: memref<34x544xf32, #tpu.memory_space<vmem>>) attributes {dimension_semantics = [#tpu.dimension_semantics<parallel>], iteration_bounds = array<i64: 2>, scalar_prefetch = 0 : i64, scratch_operands = 2 : i64, tpu.core_type = #tpu.core_type<tc>, window_params = [{transform_indices = @transform_0, window_bounds = array<i64: 1, 10, 60>}, {pipeline_mode = #tpu.pipeline_mode<synchronous>, transform_indices = @transform_1, window_bounds = array<i64: 2, 2, 60, 144>}, {pipeline_mode = #tpu.pipeline_mode<synchronous>, transform_indices = @transform_2, window_bounds = array<i64: 2, 2, 144, 544>}, {pipeline_mode = #tpu.pipeline_mode<synchronous>, transform_indices = @transform_3, window_bounds = array<i64: 3, 544, 32>}, {pipeline_mode = #tpu.pipeline_mode<synchronous>, transform_indices = @transform_4, window_bounds = array<i64: 2, 512, 31>}, {transform_indices = @transform_5, window_bounds = array<i64: 1, 31, 31>}, {transform_indices = @transform_6, window_bounds = array<i64: 1, 32, 1>}]} {
    %cst = arith.constant 0.000000e+00 : f32
    %0 = vector.broadcast %cst : f32 to vector<18x144xf32>
    %c0 = arith.constant 0 : index
    %c0_0 = arith.constant 0 : index
    %1 = vector.load %arg8[%c0, %c0_0] : memref<18x144xf32, #tpu.memory_space<vmem>>, vector<18x144xf32>
    tpu.vector_store %arg8[%c0, %c0_0], %0 {strides = array<i32>} : memref<18x144xf32, #tpu.memory_space<vmem>>, vector<18x144xf32>,
    %cst_1 = arith.constant 0.000000e+00 : f32
    %2 = vector.broadcast %cst_1 : f32 to vector<34x544xf32>
    %c0_2 = arith.constant 0 : index
    %c0_3 = arith.constant 0 : index
    %3 = vector.load %arg9[%c0_2, %c0_3] : memref<34x544xf32, #tpu.memory_space<vmem>>, vector<34x544xf32>
    tpu.vector_store %arg9[%c0_2, %c0_3], %2 {strides = array<i32>} : memref<34x544xf32, #tpu.memory_space<vmem>>, vector<34x544xf32>,
    %c0_4 = arith.constant 0 : index
    %c0_5 = arith.constant 0 : index
    %c0_6 = arith.constant 0 : index
    %4 = vector.load %arg1[%c0_4, %c0_5, %c0_6] : memref<1x10x60xf32, #tpu.memory_space<vmem>>, vector<1x10x60xf32>
    %5 = vector.shape_cast %4 : vector<1x10x60xf32> to vector<10x60xf32>
    %cst_7 = arith.constant 0.000000e+00 : f32
    %6 = vector.broadcast %cst_7 : f32 to vector<8x144xf32>
    %7 = vector.extract_strided_slice %5 {offsets = [0, 0], sizes = [8, 60], strides = [1, 1]} : vector<10x60xf32> to vector<8x60xf32>
    %c0_8 = arith.constant 0 : index
    %c0_9 = arith.constant 0 : index
    %c0_10 = arith.constant 0 : index
    %c0_11 = arith.constant 0 : index
    %8 = vector.load %arg2[%c0_8, %c0_9, %c0_10, %c0_11] : memref<2x2x60x144xf32, #tpu.memory_space<vmem>>, vector<1x1x60x144xf32>
    %9 = vector.shape_cast %8 : vector<1x1x60x144xf32> to vector<60x144xf32>
    %cst_12 = arith.constant dense<0.000000e+00> : vector<8x144xf32>
    %10 = tpu.matmul %7, %9, %cst_12 {dimension_numbers = #tpu.dot_dimension_numbers<[1], [0], [0], [1], [0, 0, 1, 1], [], []>} : vector<8x60xf32>, vector<60x144xf32>, vector<8x144xf32> -> vector<8x144xf32>
    %11 = arith.addf %6, %10 : vector<8x144xf32>
    %12 = vector.extract_strided_slice %5 {offsets = [1, 0], sizes = [8, 60], strides = [1, 1]} : vector<10x60xf32> to vector<8x60xf32>
    %c0_13 = arith.constant 0 : index
    %c1 = arith.constant 1 : index
    %c0_14 = arith.constant 0 : index
    %c0_15 = arith.constant 0 : index
    %13 = vector.load %arg2[%c0_13, %c1, %c0_14, %c0_15] : memref<2x2x60x144xf32, #tpu.memory_space<vmem>>, vector<1x1x60x144xf32>
    %14 = vector.shape_cast %13 : vector<1x1x60x144xf32> to vector<60x144xf32>
    %cst_16 = arith.constant dense<0.000000e+00> : vector<8x144xf32>
    %15 = tpu.matmul %12, %14, %cst_16 {dimension_numbers = #tpu.dot_dimension_numbers<[1], [0], [0], [1], [0, 0, 1, 1], [], []>} : vector<8x60xf32>, vector<60x144xf32>, vector<8x144xf32> -> vector<8x144xf32>
    %16 = arith.addf %11, %15 : vector<8x144xf32>
    %cst_17 = arith.constant 0.00999999977 : f32
    %17 = vector.broadcast %cst_17 : f32 to vector<8x144xf32>
    %18 = arith.mulf %17, %16 : vector<8x144xf32>
    %19 = arith.maximumf %16, %18 : vector<8x144xf32>
    %20 = vector.extract_strided_slice %19 {offsets = [0, 0], sizes = [1, 144], strides = [1, 1]} : vector<8x144xf32> to vector<1x144xf32>
    %c1_18 = arith.constant 1 : index
    %c0_19 = arith.constant 0 : index
    %21 = vector.load %arg8[%c1_18, %c0_19] : memref<18x144xf32, #tpu.memory_space<vmem>>, vector<1x144xf32>
    tpu.vector_store %arg8[%c1_18, %c0_19], %20 {strides = array<i32>} : memref<18x144xf32, #tpu.memory_space<vmem>>, vector<1x144xf32>,
    %22 = vector.extract_strided_slice %19 {offsets = [1, 0], sizes = [1, 144], strides = [1, 1]} : vector<8x144xf32> to vector<1x144xf32>
    %c3 = arith.constant 3 : index
    %c0_20 = arith.constant 0 : index
    %23 = vector.load %arg8[%c3, %c0_20] : memref<18x144xf32, #tpu.memory_space<vmem>>, vector<1x144xf32>
    tpu.vector_store %arg8[%c3, %c0_20], %22 {strides = array<i32>} : memref<18x144xf32, #tpu.memory_space<vmem>>, vector<1x144xf32>,
    %24 = vector.extract_strided_slice %19 {offsets = [2, 0], sizes = [1, 144], strides = [1, 1]} : vector<8x144xf32> to vector<1x144xf32>
    %c5 = arith.constant 5 : index
    %c0_21 = arith.constant 0 : index
    %25 = vector.load %arg8[%c5, %c0_21] : memref<18x144xf32, #tpu.memory_space<vmem>>, vector<1x144xf32>
    tpu.vector_store %arg8[%c5, %c0_21], %24 {strides = array<i32>} : memref<18x144xf32, #tpu.memory_space<vmem>>, vector<1x144xf32>,
    %26 = vector.extract_strided_slice %19 {offsets = [3, 0], sizes = [1, 144], strides = [1, 1]} : vector<8x144xf32> to vector<1x144xf32>
    %c7 = arith.constant 7 : index
    %c0_22 = arith.constant 0 : index
    %27 = vector.load %arg8[%c7, %c0_22] : memref<18x144xf32, #tpu.memory_space<vmem>>, vector<1x144xf32>
    tpu.vector_store %arg8[%c7, %c0_22], %26 {strides = array<i32>} : memref<18x144xf32, #tpu.memory_space<vmem>>, vector<1x144xf32>,
    %28 = vector.extract_strided_slice %19 {offsets = [4, 0], sizes = [1, 144], strides = [1, 1]} : vector<8x144xf32> to vector<1x144xf32>
    %c9 = arith.constant 9 : index
    %c0_23 = arith.constant 0 : index
    %29 = vector.load %arg8[%c9, %c0_23] : memref<18x144xf32, #tpu.memory_space<vmem>>, vector<1x144xf32>
    tpu.vector_store %arg8[%c9, %c0_23], %28 {strides = array<i32>} : memref<18x144xf32, #tpu.memory_space<vmem>>, vector<1x144xf32>,
    %30 = vector.extract_strided_slice %19 {offsets = [5, 0], sizes = [1, 144], strides = [1, 1]} : vector<8x144xf32> to vector<1x144xf32>
    %c11 = arith.constant 11 : index
    %c0_24 = arith.constant 0 : index
    %31 = vector.load %arg8[%c11, %c0_24] : memref<18x144xf32, #tpu.memory_space<vmem>>, vector<1x144xf32>
    tpu.vector_store %arg8[%c11, %c0_24], %30 {strides = array<i32>} : memref<18x144xf32, #tpu.memory_space<vmem>>, vector<1x144xf32>,
    %32 = vector.extract_strided_slice %19 {offsets = [6, 0], sizes = [1, 144], strides = [1, 1]} : vector<8x144xf32> to vector<1x144xf32>
    %c13 = arith.constant 13 : index
    %c0_25 = arith.constant 0 : index
    %33 = vector.load %arg8[%c13, %c0_25] : memref<18x144xf32, #tpu.memory_space<vmem>>, vector<1x144xf32>
    tpu.vector_store %arg8[%c13, %c0_25], %32 {strides = array<i32>} : memref<18x144xf32, #tpu.memory_space<vmem>>, vector<1x144xf32>,
    %34 = vector.extract_strided_slice %19 {offsets = [7, 0], sizes = [1, 144], strides = [1, 1]} : vector<8x144xf32> to vector<1x144xf32>
    %c15 = arith.constant 15 : index
    %c0_26 = arith.constant 0 : index
    %35 = vector.load %arg8[%c15, %c0_26] : memref<18x144xf32, #tpu.memory_space<vmem>>, vector<1x144xf32>
    tpu.vector_store %arg8[%c15, %c0_26], %34 {strides = array<i32>} : memref<18x144xf32, #tpu.memory_space<vmem>>, vector<1x144xf32>,
    %cst_27 = arith.constant 0.000000e+00 : f32
    %36 = vector.broadcast %cst_27 : f32 to vector<8x144xf32>
    %37 = vector.extract_strided_slice %5 {offsets = [1, 0], sizes = [8, 60], strides = [1, 1]} : vector<10x60xf32> to vector<8x60xf32>
    %c1_28 = arith.constant 1 : index
    %c0_29 = arith.constant 0 : index
    %c0_30 = arith.constant 0 : index
    %c0_31 = arith.constant 0 : index
    %38 = vector.load %arg2[%c1_28, %c0_29, %c0_30, %c0_31] : memref<2x2x60x144xf32, #tpu.memory_space<vmem>>, vector<1x1x60x144xf32>
    %39 = vector.shape_cast %38 : vector<1x1x60x144xf32> to vector<60x144xf32>
    %cst_32 = arith.constant dense<0.000000e+00> : vector<8x144xf32>
    %40 = tpu.matmul %37, %39, %cst_32 {dimension_numbers = #tpu.dot_dimension_numbers<[1], [0], [0], [1], [0, 0, 1, 1], [], []>} : vector<8x60xf32>, vector<60x144xf32>, vector<8x144xf32> -> vector<8x144xf32>
    %41 = arith.addf %36, %40 : vector<8x144xf32>
    %42 = vector.extract_strided_slice %5 {offsets = [2, 0], sizes = [8, 60], strides = [1, 1]} : vector<10x60xf32> to vector<8x60xf32>
    %c1_33 = arith.constant 1 : index
    %c1_34 = arith.constant 1 : index
    %c0_35 = arith.constant 0 : index
    %c0_36 = arith.constant 0 : index
    %43 = vector.load %arg2[%c1_33, %c1_34, %c0_35, %c0_36] : memref<2x2x60x144xf32, #tpu.memory_space<vmem>>, vector<1x1x60x144xf32>
    %44 = vector.shape_cast %43 : vector<1x1x60x144xf32> to vector<60x144xf32>
    %cst_37 = arith.constant dense<0.000000e+00> : vector<8x144xf32>
    %45 = tpu.matmul %42, %44, %cst_37 {dimension_numbers = #tpu.dot_dimension_numbers<[1], [0], [0], [1], [0, 0, 1, 1], [], []>} : vector<8x60xf32>, vector<60x144xf32>, vector<8x144xf32> -> vector<8x144xf32>
    %46 = arith.addf %41, %45 : vector<8x144xf32>
    %cst_38 = arith.constant 0.00999999977 : f32
    %47 = vector.broadcast %cst_38 : f32 to vector<8x144xf32>
    %48 = arith.mulf %47, %46 : vector<8x144xf32>
    %49 = arith.maximumf %46, %48 : vector<8x144xf32>
    %50 = vector.extract_strided_slice %49 {offsets = [0, 0], sizes = [1, 144], strides = [1, 1]} : vector<8x144xf32> to vector<1x144xf32>
    %c2 = arith.constant 2 : index
    %c0_39 = arith.constant 0 : index
    %51 = vector.load %arg8[%c2, %c0_39] : memref<18x144xf32, #tpu.memory_space<vmem>>, vector<1x144xf32>
    tpu.vector_store %arg8[%c2, %c0_39], %50 {strides = array<i32>} : memref<18x144xf32, #tpu.memory_space<vmem>>, vector<1x144xf32>,
    %52 = vector.extract_strided_slice %49 {offsets = [1, 0], sizes = [1, 144], strides = [1, 1]} : vector<8x144xf32> to vector<1x144xf32>
    %c4 = arith.constant 4 : index
    %c0_40 = arith.constant 0 : index
    %53 = vector.load %arg8[%c4, %c0_40] : memref<18x144xf32, #tpu.memory_space<vmem>>, vector<1x144xf32>
    tpu.vector_store %arg8[%c4, %c0_40], %52 {strides = array<i32>} : memref<18x144xf32, #tpu.memory_space<vmem>>, vector<1x144xf32>,
    %54 = vector.extract_strided_slice %49 {offsets = [2, 0], sizes = [1, 144], strides = [1, 1]} : vector<8x144xf32> to vector<1x144xf32>
    %c6 = arith.constant 6 : index
    %c0_41 = arith.constant 0 : index
    %55 = vector.load %arg8[%c6, %c0_41] : memref<18x144xf32, #tpu.memory_space<vmem>>, vector<1x144xf32>
    tpu.vector_store %arg8[%c6, %c0_41], %54 {strides = array<i32>} : memref<18x144xf32, #tpu.memory_space<vmem>>, vector<1x144xf32>,
    %56 = vector.extract_strided_slice %49 {offsets = [3, 0], sizes = [1, 144], strides = [1, 1]} : vector<8x144xf32> to vector<1x144xf32>
    %c8 = arith.constant 8 : index
    %c0_42 = arith.constant 0 : index
    %57 = vector.load %arg8[%c8, %c0_42] : memref<18x144xf32, #tpu.memory_space<vmem>>, vector<1x144xf32>
    tpu.vector_store %arg8[%c8, %c0_42], %56 {strides = array<i32>} : memref<18x144xf32, #tpu.memory_space<vmem>>, vector<1x144xf32>,
    %58 = vector.extract_strided_slice %49 {offsets = [4, 0], sizes = [1, 144], strides = [1, 1]} : vector<8x144xf32> to vector<1x144xf32>
    %c10 = arith.constant 10 : index
    %c0_43 = arith.constant 0 : index
    %59 = vector.load %arg8[%c10, %c0_43] : memref<18x144xf32, #tpu.memory_space<vmem>>, vector<1x144xf32>
    tpu.vector_store %arg8[%c10, %c0_43], %58 {strides = array<i32>} : memref<18x144xf32, #tpu.memory_space<vmem>>, vector<1x144xf32>,
    %60 = vector.extract_strided_slice %49 {offsets = [5, 0], sizes = [1, 144], strides = [1, 1]} : vector<8x144xf32> to vector<1x144xf32>
    %c12 = arith.constant 12 : index
    %c0_44 = arith.constant 0 : index
    %61 = vector.load %arg8[%c12, %c0_44] : memref<18x144xf32, #tpu.memory_space<vmem>>, vector<1x144xf32>
    tpu.vector_store %arg8[%c12, %c0_44], %60 {strides = array<i32>} : memref<18x144xf32, #tpu.memory_space<vmem>>, vector<1x144xf32>,
    %62 = vector.extract_strided_slice %49 {offsets = [6, 0], sizes = [1, 144], strides = [1, 1]} : vector<8x144xf32> to vector<1x144xf32>
    %c14 = arith.constant 14 : index
    %c0_45 = arith.constant 0 : index
    %63 = vector.load %arg8[%c14, %c0_45] : memref<18x144xf32, #tpu.memory_space<vmem>>, vector<1x144xf32>
    tpu.vector_store %arg8[%c14, %c0_45], %62 {strides = array<i32>} : memref<18x144xf32, #tpu.memory_space<vmem>>, vector<1x144xf32>,
    %64 = vector.extract_strided_slice %49 {offsets = [7, 0], sizes = [1, 144], strides = [1, 1]} : vector<8x144xf32> to vector<1x144xf32>
    %c16 = arith.constant 16 : index
    %c0_46 = arith.constant 0 : index
    %65 = vector.load %arg8[%c16, %c0_46] : memref<18x144xf32, #tpu.memory_space<vmem>>, vector<1x144xf32>
    tpu.vector_store %arg8[%c16, %c0_46], %64 {strides = array<i32>} : memref<18x144xf32, #tpu.memory_space<vmem>>, vector<1x144xf32>,
    %c0_47 = arith.constant 0 : index
    %c0_48 = arith.constant 0 : index
    %66 = vector.load %arg8[%c0_47, %c0_48] : memref<18x144xf32, #tpu.memory_space<vmem>>, vector<18x144xf32>
    %cst_49 = arith.constant 0.000000e+00 : f32
    %67 = vector.broadcast %cst_49 : f32 to vector<16x544xf32>
    %68 = vector.extract_strided_slice %66 {offsets = [0, 0], sizes = [16, 144], strides = [1, 1]} : vector<18x144xf32> to vector<16x144xf32>
    %c0_50 = arith.constant 0 : index
    %c0_51 = arith.constant 0 : index
    %c0_52 = arith.constant 0 : index
    %c0_53 = arith.constant 0 : index
    %69 = vector.load %arg3[%c0_50, %c0_51, %c0_52, %c0_53] : memref<2x2x144x544xf32, #tpu.memory_space<vmem>>, vector<1x1x144x544xf32>
    %70 = vector.shape_cast %69 : vector<1x1x144x544xf32> to vector<144x544xf32>
    %cst_54 = arith.constant dense<0.000000e+00> : vector<16x544xf32>
    %71 = tpu.matmul %68, %70, %cst_54 {dimension_numbers = #tpu.dot_dimension_numbers<[1], [0], [0], [1], [0, 0, 1, 1], [], []>} : vector<16x144xf32>, vector<144x544xf32>, vector<16x544xf32> -> vector<16x544xf32>
    %72 = arith.addf %67, %71 : vector<16x544xf32>
    %73 = vector.extract_strided_slice %66 {offsets = [1, 0], sizes = [16, 144], strides = [1, 1]} : vector<18x144xf32> to vector<16x144xf32>
    %c0_55 = arith.constant 0 : index
    %c1_56 = arith.constant 1 : index
    %c0_57 = arith.constant 0 : index
    %c0_58 = arith.constant 0 : index
    %74 = vector.load %arg3[%c0_55, %c1_56, %c0_57, %c0_58] : memref<2x2x144x544xf32, #tpu.memory_space<vmem>>, vector<1x1x144x544xf32>
    %75 = vector.shape_cast %74 : vector<1x1x144x544xf32> to vector<144x544xf32>
    %cst_59 = arith.constant dense<0.000000e+00> : vector<16x544xf32>
    %76 = tpu.matmul %73, %75, %cst_59 {dimension_numbers = #tpu.dot_dimension_numbers<[1], [0], [0], [1], [0, 0, 1, 1], [], []>} : vector<16x144xf32>, vector<144x544xf32>, vector<16x544xf32> -> vector<16x544xf32>
    %77 = arith.addf %72, %76 : vector<16x544xf32>
    %cst_60 = arith.constant 0.00999999977 : f32
    %78 = vector.broadcast %cst_60 : f32 to vector<16x544xf32>
    %79 = arith.mulf %78, %77 : vector<16x544xf32>
    %80 = arith.maximumf %77, %79 : vector<16x544xf32>
    %81 = vector.extract_strided_slice %80 {offsets = [0, 0], sizes = [1, 544], strides = [1, 1]} : vector<16x544xf32> to vector<1x544xf32>
    %c1_61 = arith.constant 1 : index
    %c0_62 = arith.constant 0 : index
    %82 = vector.load %arg9[%c1_61, %c0_62] : memref<34x544xf32, #tpu.memory_space<vmem>>, vector<1x544xf32>
    tpu.vector_store %arg9[%c1_61, %c0_62], %81 {strides = array<i32>} : memref<34x544xf32, #tpu.memory_space<vmem>>, vector<1x544xf32>,
    %83 = vector.extract_strided_slice %80 {offsets = [1, 0], sizes = [1, 544], strides = [1, 1]} : vector<16x544xf32> to vector<1x544xf32>
    %c3_63 = arith.constant 3 : index
    %c0_64 = arith.constant 0 : index
    %84 = vector.load %arg9[%c3_63, %c0_64] : memref<34x544xf32, #tpu.memory_space<vmem>>, vector<1x544xf32>
    tpu.vector_store %arg9[%c3_63, %c0_64], %83 {strides = array<i32>} : memref<34x544xf32, #tpu.memory_space<vmem>>, vector<1x544xf32>,
    %85 = vector.extract_strided_slice %80 {offsets = [2, 0], sizes = [1, 544], strides = [1, 1]} : vector<16x544xf32> to vector<1x544xf32>
    %c5_65 = arith.constant 5 : index
    %c0_66 = arith.constant 0 : index
    %86 = vector.load %arg9[%c5_65, %c0_66] : memref<34x544xf32, #tpu.memory_space<vmem>>, vector<1x544xf32>
    tpu.vector_store %arg9[%c5_65, %c0_66], %85 {strides = array<i32>} : memref<34x544xf32, #tpu.memory_space<vmem>>, vector<1x544xf32>,
    %87 = vector.extract_strided_slice %80 {offsets = [3, 0], sizes = [1, 544], strides = [1, 1]} : vector<16x544xf32> to vector<1x544xf32>
    %c7_67 = arith.constant 7 : index
    %c0_68 = arith.constant 0 : index
    %88 = vector.load %arg9[%c7_67, %c0_68] : memref<34x544xf32, #tpu.memory_space<vmem>>, vector<1x544xf32>
    tpu.vector_store %arg9[%c7_67, %c0_68], %87 {strides = array<i32>} : memref<34x544xf32, #tpu.memory_space<vmem>>, vector<1x544xf32>,
    %89 = vector.extract_strided_slice %80 {offsets = [4, 0], sizes = [1, 544], strides = [1, 1]} : vector<16x544xf32> to vector<1x544xf32>
    %c9_69 = arith.constant 9 : index
    %c0_70 = arith.constant 0 : index
    %90 = vector.load %arg9[%c9_69, %c0_70] : memref<34x544xf32, #tpu.memory_space<vmem>>, vector<1x544xf32>
    tpu.vector_store %arg9[%c9_69, %c0_70], %89 {strides = array<i32>} : memref<34x544xf32, #tpu.memory_space<vmem>>, vector<1x544xf32>,
    %91 = vector.extract_strided_slice %80 {offsets = [5, 0], sizes = [1, 544], strides = [1, 1]} : vector<16x544xf32> to vector<1x544xf32>
    %c11_71 = arith.constant 11 : index
    %c0_72 = arith.constant 0 : index
    %92 = vector.load %arg9[%c11_71, %c0_72] : memref<34x544xf32, #tpu.memory_space<vmem>>, vector<1x544xf32>
    tpu.vector_store %arg9[%c11_71, %c0_72], %91 {strides = array<i32>} : memref<34x544xf32, #tpu.memory_space<vmem>>, vector<1x544xf32>,
    %93 = vector.extract_strided_slice %80 {offsets = [6, 0], sizes = [1, 544], strides = [1, 1]} : vector<16x544xf32> to vector<1x544xf32>
    %c13_73 = arith.constant 13 : index
    %c0_74 = arith.constant 0 : index
    %94 = vector.load %arg9[%c13_73, %c0_74] : memref<34x544xf32, #tpu.memory_space<vmem>>, vector<1x544xf32>
    tpu.vector_store %arg9[%c13_73, %c0_74], %93 {strides = array<i32>} : memref<34x544xf32, #tpu.memory_space<vmem>>, vector<1x544xf32>,
    %95 = vector.extract_strided_slice %80 {offsets = [7, 0], sizes = [1, 544], strides = [1, 1]} : vector<16x544xf32> to vector<1x544xf32>
    %c15_75 = arith.constant 15 : index
    %c0_76 = arith.constant 0 : index
    %96 = vector.load %arg9[%c15_75, %c0_76] : memref<34x544xf32, #tpu.memory_space<vmem>>, vector<1x544xf32>
    tpu.vector_store %arg9[%c15_75, %c0_76], %95 {strides = array<i32>} : memref<34x544xf32, #tpu.memory_space<vmem>>, vector<1x544xf32>,
    %97 = vector.extract_strided_slice %80 {offsets = [8, 0], sizes = [1, 544], strides = [1, 1]} : vector<16x544xf32> to vector<1x544xf32>
    %c17 = arith.constant 17 : index
    %c0_77 = arith.constant 0 : index
    %98 = vector.load %arg9[%c17, %c0_77] : memref<34x544xf32, #tpu.memory_space<vmem>>, vector<1x544xf32>
    tpu.vector_store %arg9[%c17, %c0_77], %97 {strides = array<i32>} : memref<34x544xf32, #tpu.memory_space<vmem>>, vector<1x544xf32>,
    %99 = vector.extract_strided_slice %80 {offsets = [9, 0], sizes = [1, 544], strides = [1, 1]} : vector<16x544xf32> to vector<1x544xf32>
    %c19 = arith.constant 19 : index
    %c0_78 = arith.constant 0 : index
    %100 = vector.load %arg9[%c19, %c0_78] : memref<34x544xf32, #tpu.memory_space<vmem>>, vector<1x544xf32>
    tpu.vector_store %arg9[%c19, %c0_78], %99 {strides = array<i32>} : memref<34x544xf32, #tpu.memory_space<vmem>>, vector<1x544xf32>,
    %101 = vector.extract_strided_slice %80 {offsets = [10, 0], sizes = [1, 544], strides = [1, 1]} : vector<16x544xf32> to vector<1x544xf32>
    %c21 = arith.constant 21 : index
    %c0_79 = arith.constant 0 : index
    %102 = vector.load %arg9[%c21, %c0_79] : memref<34x544xf32, #tpu.memory_space<vmem>>, vector<1x544xf32>
    tpu.vector_store %arg9[%c21, %c0_79], %101 {strides = array<i32>} : memref<34x544xf32, #tpu.memory_space<vmem>>, vector<1x544xf32>,
    %103 = vector.extract_strided_slice %80 {offsets = [11, 0], sizes = [1, 544], strides = [1, 1]} : vector<16x544xf32> to vector<1x544xf32>
    %c23 = arith.constant 23 : index
    %c0_80 = arith.constant 0 : index
    %104 = vector.load %arg9[%c23, %c0_80] : memref<34x544xf32, #tpu.memory_space<vmem>>, vector<1x544xf32>
    tpu.vector_store %arg9[%c23, %c0_80], %103 {strides = array<i32>} : memref<34x544xf32, #tpu.memory_space<vmem>>, vector<1x544xf32>,
    %105 = vector.extract_strided_slice %80 {offsets = [12, 0], sizes = [1, 544], strides = [1, 1]} : vector<16x544xf32> to vector<1x544xf32>
    %c25 = arith.constant 25 : index
    %c0_81 = arith.constant 0 : index
    %106 = vector.load %arg9[%c25, %c0_81] : memref<34x544xf32, #tpu.memory_space<vmem>>, vector<1x544xf32>
    tpu.vector_store %arg9[%c25, %c0_81], %105 {strides = array<i32>} : memref<34x544xf32, #tpu.memory_space<vmem>>, vector<1x544xf32>,
    %107 = vector.extract_strided_slice %80 {offsets = [13, 0], sizes = [1, 544], strides = [1, 1]} : vector<16x544xf32> to vector<1x544xf32>
    %c27 = arith.constant 27 : index
    %c0_82 = arith.constant 0 : index
    %108 = vector.load %arg9[%c27, %c0_82] : memref<34x544xf32, #tpu.memory_space<vmem>>, vector<1x544xf32>
    tpu.vector_store %arg9[%c27, %c0_82], %107 {strides = array<i32>} : memref<34x544xf32, #tpu.memory_space<vmem>>, vector<1x544xf32>,
    %109 = vector.extract_strided_slice %80 {offsets = [14, 0], sizes = [1, 544], strides = [1, 1]} : vector<16x544xf32> to vector<1x544xf32>
    %c29 = arith.constant 29 : index
    %c0_83 = arith.constant 0 : index
    %110 = vector.load %arg9[%c29, %c0_83] : memref<34x544xf32, #tpu.memory_space<vmem>>, vector<1x544xf32>
    tpu.vector_store %arg9[%c29, %c0_83], %109 {strides = array<i32>} : memref<34x544xf32, #tpu.memory_space<vmem>>, vector<1x544xf32>,
    %111 = vector.extract_strided_slice %80 {offsets = [15, 0], sizes = [1, 544], strides = [1, 1]} : vector<16x544xf32> to vector<1x544xf32>
    %c31 = arith.constant 31 : index
    %c0_84 = arith.constant 0 : index
    %112 = vector.load %arg9[%c31, %c0_84] : memref<34x544xf32, #tpu.memory_space<vmem>>, vector<1x544xf32>
    tpu.vector_store %arg9[%c31, %c0_84], %111 {strides = array<i32>} : memref<34x544xf32, #tpu.memory_space<vmem>>, vector<1x544xf32>,
    %cst_85 = arith.constant 0.000000e+00 : f32
    %113 = vector.broadcast %cst_85 : f32 to vector<16x544xf32>
    %114 = vector.extract_strided_slice %66 {offsets = [1, 0], sizes = [16, 144], strides = [1, 1]} : vector<18x144xf32> to vector<16x144xf32>
    %c1_86 = arith.constant 1 : index
    %c0_87 = arith.constant 0 : index
    %c0_88 = arith.constant 0 : index
    %c0_89 = arith.constant 0 : index
    %115 = vector.load %arg3[%c1_86, %c0_87, %c0_88, %c0_89] : memref<2x2x144x544xf32, #tpu.memory_space<vmem>>, vector<1x1x144x544xf32>
    %116 = vector.shape_cast %115 : vector<1x1x144x544xf32> to vector<144x544xf32>
    %cst_90 = arith.constant dense<0.000000e+00> : vector<16x544xf32>
    %117 = tpu.matmul %114, %116, %cst_90 {dimension_numbers = #tpu.dot_dimension_numbers<[1], [0], [0], [1], [0, 0, 1, 1], [], []>} : vector<16x144xf32>, vector<144x544xf32>, vector<16x544xf32> -> vector<16x544xf32>
    %118 = arith.addf %113, %117 : vector<16x544xf32>
    %119 = vector.extract_strided_slice %66 {offsets = [2, 0], sizes = [16, 144], strides = [1, 1]} : vector<18x144xf32> to vector<16x144xf32>
    %c1_91 = arith.constant 1 : index
    %c1_92 = arith.constant 1 : index
    %c0_93 = arith.constant 0 : index
    %c0_94 = arith.constant 0 : index
    %120 = vector.load %arg3[%c1_91, %c1_92, %c0_93, %c0_94] : memref<2x2x144x544xf32, #tpu.memory_space<vmem>>, vector<1x1x144x544xf32>
    %121 = vector.shape_cast %120 : vector<1x1x144x544xf32> to vector<144x544xf32>
    %cst_95 = arith.constant dense<0.000000e+00> : vector<16x544xf32>
    %122 = tpu.matmul %119, %121, %cst_95 {dimension_numbers = #tpu.dot_dimension_numbers<[1], [0], [0], [1], [0, 0, 1, 1], [], []>} : vector<16x144xf32>, vector<144x544xf32>, vector<16x544xf32> -> vector<16x544xf32>
    %123 = arith.addf %118, %122 : vector<16x544xf32>
    %cst_96 = arith.constant 0.00999999977 : f32
    %124 = vector.broadcast %cst_96 : f32 to vector<16x544xf32>
    %125 = arith.mulf %124, %123 : vector<16x544xf32>
    %126 = arith.maximumf %123, %125 : vector<16x544xf32>
    %127 = vector.extract_strided_slice %126 {offsets = [0, 0], sizes = [1, 544], strides = [1, 1]} : vector<16x544xf32> to vector<1x544xf32>
    %c2_97 = arith.constant 2 : index
    %c0_98 = arith.constant 0 : index
    %128 = vector.load %arg9[%c2_97, %c0_98] : memref<34x544xf32, #tpu.memory_space<vmem>>, vector<1x544xf32>
    tpu.vector_store %arg9[%c2_97, %c0_98], %127 {strides = array<i32>} : memref<34x544xf32, #tpu.memory_space<vmem>>, vector<1x544xf32>,
    %129 = vector.extract_strided_slice %126 {offsets = [1, 0], sizes = [1, 544], strides = [1, 1]} : vector<16x544xf32> to vector<1x544xf32>
    %c4_99 = arith.constant 4 : index
    %c0_100 = arith.constant 0 : index
    %130 = vector.load %arg9[%c4_99, %c0_100] : memref<34x544xf32, #tpu.memory_space<vmem>>, vector<1x544xf32>
    tpu.vector_store %arg9[%c4_99, %c0_100], %129 {strides = array<i32>} : memref<34x544xf32, #tpu.memory_space<vmem>>, vector<1x544xf32>,
    %131 = vector.extract_strided_slice %126 {offsets = [2, 0], sizes = [1, 544], strides = [1, 1]} : vector<16x544xf32> to vector<1x544xf32>
    %c6_101 = arith.constant 6 : index
    %c0_102 = arith.constant 0 : index
    %132 = vector.load %arg9[%c6_101, %c0_102] : memref<34x544xf32, #tpu.memory_space<vmem>>, vector<1x544xf32>
    tpu.vector_store %arg9[%c6_101, %c0_102], %131 {strides = array<i32>} : memref<34x544xf32, #tpu.memory_space<vmem>>, vector<1x544xf32>,
    %133 = vector.extract_strided_slice %126 {offsets = [3, 0], sizes = [1, 544], strides = [1, 1]} : vector<16x544xf32> to vector<1x544xf32>
    %c8_103 = arith.constant 8 : index
    %c0_104 = arith.constant 0 : index
    %134 = vector.load %arg9[%c8_103, %c0_104] : memref<34x544xf32, #tpu.memory_space<vmem>>, vector<1x544xf32>
    tpu.vector_store %arg9[%c8_103, %c0_104], %133 {strides = array<i32>} : memref<34x544xf32, #tpu.memory_space<vmem>>, vector<1x544xf32>,
    %135 = vector.extract_strided_slice %126 {offsets = [4, 0], sizes = [1, 544], strides = [1, 1]} : vector<16x544xf32> to vector<1x544xf32>
    %c10_105 = arith.constant 10 : index
    %c0_106 = arith.constant 0 : index
    %136 = vector.load %arg9[%c10_105, %c0_106] : memref<34x544xf32, #tpu.memory_space<vmem>>, vector<1x544xf32>
    tpu.vector_store %arg9[%c10_105, %c0_106], %135 {strides = array<i32>} : memref<34x544xf32, #tpu.memory_space<vmem>>, vector<1x544xf32>,
    %137 = vector.extract_strided_slice %126 {offsets = [5, 0], sizes = [1, 544], strides = [1, 1]} : vector<16x544xf32> to vector<1x544xf32>
    %c12_107 = arith.constant 12 : index
    %c0_108 = arith.constant 0 : index
    %138 = vector.load %arg9[%c12_107, %c0_108] : memref<34x544xf32, #tpu.memory_space<vmem>>, vector<1x544xf32>
    tpu.vector_store %arg9[%c12_107, %c0_108], %137 {strides = array<i32>} : memref<34x544xf32, #tpu.memory_space<vmem>>, vector<1x544xf32>,
    %139 = vector.extract_strided_slice %126 {offsets = [6, 0], sizes = [1, 544], strides = [1, 1]} : vector<16x544xf32> to vector<1x544xf32>
    %c14_109 = arith.constant 14 : index
    %c0_110 = arith.constant 0 : index
    %140 = vector.load %arg9[%c14_109, %c0_110] : memref<34x544xf32, #tpu.memory_space<vmem>>, vector<1x544xf32>
    tpu.vector_store %arg9[%c14_109, %c0_110], %139 {strides = array<i32>} : memref<34x544xf32, #tpu.memory_space<vmem>>, vector<1x544xf32>,
    %141 = vector.extract_strided_slice %126 {offsets = [7, 0], sizes = [1, 544], strides = [1, 1]} : vector<16x544xf32> to vector<1x544xf32>
    %c16_111 = arith.constant 16 : index
    %c0_112 = arith.constant 0 : index
    %142 = vector.load %arg9[%c16_111, %c0_112] : memref<34x544xf32, #tpu.memory_space<vmem>>, vector<1x544xf32>
    tpu.vector_store %arg9[%c16_111, %c0_112], %141 {strides = array<i32>} : memref<34x544xf32, #tpu.memory_space<vmem>>, vector<1x544xf32>,
    %143 = vector.extract_strided_slice %126 {offsets = [8, 0], sizes = [1, 544], strides = [1, 1]} : vector<16x544xf32> to vector<1x544xf32>
    %c18 = arith.constant 18 : index
    %c0_113 = arith.constant 0 : index
    %144 = vector.load %arg9[%c18, %c0_113] : memref<34x544xf32, #tpu.memory_space<vmem>>, vector<1x544xf32>
    tpu.vector_store %arg9[%c18, %c0_113], %143 {strides = array<i32>} : memref<34x544xf32, #tpu.memory_space<vmem>>, vector<1x544xf32>,
    %145 = vector.extract_strided_slice %126 {offsets = [9, 0], sizes = [1, 544], strides = [1, 1]} : vector<16x544xf32> to vector<1x544xf32>
    %c20 = arith.constant 20 : index
    %c0_114 = arith.constant 0 : index
    %146 = vector.load %arg9[%c20, %c0_114] : memref<34x544xf32, #tpu.memory_space<vmem>>, vector<1x544xf32>
    tpu.vector_store %arg9[%c20, %c0_114], %145 {strides = array<i32>} : memref<34x544xf32, #tpu.memory_space<vmem>>, vector<1x544xf32>,
    %147 = vector.extract_strided_slice %126 {offsets = [10, 0], sizes = [1, 544], strides = [1, 1]} : vector<16x544xf32> to vector<1x544xf32>
    %c22 = arith.constant 22 : index
    %c0_115 = arith.constant 0 : index
    %148 = vector.load %arg9[%c22, %c0_115] : memref<34x544xf32, #tpu.memory_space<vmem>>, vector<1x544xf32>
    tpu.vector_store %arg9[%c22, %c0_115], %147 {strides = array<i32>} : memref<34x544xf32, #tpu.memory_space<vmem>>, vector<1x544xf32>,
    %149 = vector.extract_strided_slice %126 {offsets = [11, 0], sizes = [1, 544], strides = [1, 1]} : vector<16x544xf32> to vector<1x544xf32>
    %c24 = arith.constant 24 : index
    %c0_116 = arith.constant 0 : index
    %150 = vector.load %arg9[%c24, %c0_116] : memref<34x544xf32, #tpu.memory_space<vmem>>, vector<1x544xf32>
    tpu.vector_store %arg9[%c24, %c0_116], %149 {strides = array<i32>} : memref<34x544xf32, #tpu.memory_space<vmem>>, vector<1x544xf32>,
    %151 = vector.extract_strided_slice %126 {offsets = [12, 0], sizes = [1, 544], strides = [1, 1]} : vector<16x544xf32> to vector<1x544xf32>
    %c26 = arith.constant 26 : index
    %c0_117 = arith.constant 0 : index
    %152 = vector.load %arg9[%c26, %c0_117] : memref<34x544xf32, #tpu.memory_space<vmem>>, vector<1x544xf32>
    tpu.vector_store %arg9[%c26, %c0_117], %151 {strides = array<i32>} : memref<34x544xf32, #tpu.memory_space<vmem>>, vector<1x544xf32>,
    %153 = vector.extract_strided_slice %126 {offsets = [13, 0], sizes = [1, 544], strides = [1, 1]} : vector<16x544xf32> to vector<1x544xf32>
    %c28 = arith.constant 28 : index
    %c0_118 = arith.constant 0 : index
    %154 = vector.load %arg9[%c28, %c0_118] : memref<34x544xf32, #tpu.memory_space<vmem>>, vector<1x544xf32>
    tpu.vector_store %arg9[%c28, %c0_118], %153 {strides = array<i32>} : memref<34x544xf32, #tpu.memory_space<vmem>>, vector<1x544xf32>,
    %155 = vector.extract_strided_slice %126 {offsets = [14, 0], sizes = [1, 544], strides = [1, 1]} : vector<16x544xf32> to vector<1x544xf32>
    %c30 = arith.constant 30 : index
    %c0_119 = arith.constant 0 : index
    %156 = vector.load %arg9[%c30, %c0_119] : memref<34x544xf32, #tpu.memory_space<vmem>>, vector<1x544xf32>
    tpu.vector_store %arg9[%c30, %c0_119], %155 {strides = array<i32>} : memref<34x544xf32, #tpu.memory_space<vmem>>, vector<1x544xf32>,
    %157 = vector.extract_strided_slice %126 {offsets = [15, 0], sizes = [1, 544], strides = [1, 1]} : vector<16x544xf32> to vector<1x544xf32>
    %c32 = arith.constant 32 : index
    %c0_120 = arith.constant 0 : index
    %158 = vector.load %arg9[%c32, %c0_120] : memref<34x544xf32, #tpu.memory_space<vmem>>, vector<1x544xf32>
    tpu.vector_store %arg9[%c32, %c0_120], %157 {strides = array<i32>} : memref<34x544xf32, #tpu.memory_space<vmem>>, vector<1x544xf32>,
    %c0_121 = arith.constant 0 : index
    %c0_122 = arith.constant 0 : index
    %159 = vector.load %arg9[%c0_121, %c0_122] : memref<34x544xf32, #tpu.memory_space<vmem>>, vector<34x544xf32>
    %cst_123 = arith.constant 0.000000e+00 : f32
    %160 = vector.broadcast %cst_123 : f32 to vector<32x32xf32>
    %161 = vector.extract_strided_slice %159 {offsets = [0, 0], sizes = [32, 544], strides = [1, 1]} : vector<34x544xf32> to vector<32x544xf32>
    %c0_124 = arith.constant 0 : index
    %c0_125 = arith.constant 0 : index
    %c0_126 = arith.constant 0 : index
    %162 = vector.load %arg4[%c0_124, %c0_125, %c0_126] : memref<3x544x32xf32, #tpu.memory_space<vmem>>, vector<1x544x32xf32>
    %163 = vector.shape_cast %162 : vector<1x544x32xf32> to vector<544x32xf32>
    %cst_127 = arith.constant dense<0.000000e+00> : vector<32x32xf32>
    %164 = tpu.matmul %161, %163, %cst_127 {dimension_numbers = #tpu.dot_dimension_numbers<[1], [0], [0], [1], [0, 0, 1, 1], [], []>} : vector<32x544xf32>, vector<544x32xf32>, vector<32x32xf32> -> vector<32x32xf32>
    %165 = arith.addf %160, %164 : vector<32x32xf32>
    %166 = vector.extract_strided_slice %159 {offsets = [1, 0], sizes = [32, 544], strides = [1, 1]} : vector<34x544xf32> to vector<32x544xf32>
    %c1_128 = arith.constant 1 : index
    %c0_129 = arith.constant 0 : index
    %c0_130 = arith.constant 0 : index
    %167 = vector.load %arg4[%c1_128, %c0_129, %c0_130] : memref<3x544x32xf32, #tpu.memory_space<vmem>>, vector<1x544x32xf32>
    %168 = vector.shape_cast %167 : vector<1x544x32xf32> to vector<544x32xf32>
    %cst_131 = arith.constant dense<0.000000e+00> : vector<32x32xf32>
    %169 = tpu.matmul %166, %168, %cst_131 {dimension_numbers = #tpu.dot_dimension_numbers<[1], [0], [0], [1], [0, 0, 1, 1], [], []>} : vector<32x544xf32>, vector<544x32xf32>, vector<32x32xf32> -> vector<32x32xf32>
    %170 = arith.addf %165, %169 : vector<32x32xf32>
    %171 = vector.extract_strided_slice %159 {offsets = [2, 0], sizes = [32, 544], strides = [1, 1]} : vector<34x544xf32> to vector<32x544xf32>
    %c2_132 = arith.constant 2 : index
    %c0_133 = arith.constant 0 : index
    %c0_134 = arith.constant 0 : index
    %172 = vector.load %arg4[%c2_132, %c0_133, %c0_134] : memref<3x544x32xf32, #tpu.memory_space<vmem>>, vector<1x544x32xf32>
    %173 = vector.shape_cast %172 : vector<1x544x32xf32> to vector<544x32xf32>
    %cst_135 = arith.constant dense<0.000000e+00> : vector<32x32xf32>
    %174 = tpu.matmul %171, %173, %cst_135 {dimension_numbers = #tpu.dot_dimension_numbers<[1], [0], [0], [1], [0, 0, 1, 1], [], []>} : vector<32x544xf32>, vector<544x32xf32>, vector<32x32xf32> -> vector<32x32xf32>
    %175 = arith.addf %170, %174 : vector<32x32xf32>
    %cst_136 = arith.constant dense<0.000000e+00> : vector<32xf32>
    %176 = vector.multi_reduction <add>, %175, %cst_136 [1] : vector<32x32xf32> to vector<32xf32>
    %177 = vector.shape_cast %176 : vector<32xf32> to vector<32x1xf32>
    %c0_137 = arith.constant 0 : index
    %c0_138 = arith.constant 0 : index
    %c0_139 = arith.constant 0 : index
    %178 = vector.load %arg7[%c0_137, %c0_138, %c0_139] : memref<1x32x1xf32, #tpu.memory_space<vmem>>, vector<1x32x1xf32>
    %179 = vector.shape_cast %178 : vector<1x32x1xf32> to vector<32x1xf32>
    %180 = vector.shape_cast %177 : vector<32x1xf32> to vector<1x32x1xf32>
    tpu.vector_store %arg7[%c0_137, %c0_138, %c0_139], %180 {strides = array<i32>} : memref<1x32x1xf32, #tpu.memory_space<vmem>>, vector<1x32x1xf32>,
    %cst_140 = arith.constant 0.000000e+00 : f32
    %181 = vector.broadcast %cst_140 : f32 to vector<31x31xf32>
    %182 = vector.extract_strided_slice %159 {offsets = [1, 16], sizes = [31, 512], strides = [1, 1]} : vector<34x544xf32> to vector<31x512xf32>
    %c0_141 = arith.constant 0 : index
    %c0_142 = arith.constant 0 : index
    %c0_143 = arith.constant 0 : index
    %183 = vector.load %arg5[%c0_141, %c0_142, %c0_143] : memref<2x512x31xf32, #tpu.memory_space<vmem>>, vector<1x512x31xf32>
    %184 = vector.shape_cast %183 : vector<1x512x31xf32> to vector<512x31xf32>
    %cst_144 = arith.constant dense<0.000000e+00> : vector<31x31xf32>
    %185 = tpu.matmul %182, %184, %cst_144 {dimension_numbers = #tpu.dot_dimension_numbers<[1], [0], [0], [1], [0, 0, 1, 1], [], []>} : vector<31x512xf32>, vector<512x31xf32>, vector<31x31xf32> -> vector<31x31xf32>
    %186 = arith.addf %181, %185 : vector<31x31xf32>
    %187 = vector.extract_strided_slice %159 {offsets = [2, 16], sizes = [31, 512], strides = [1, 1]} : vector<34x544xf32> to vector<31x512xf32>
    %c1_145 = arith.constant 1 : index
    %c0_146 = arith.constant 0 : index
    %c0_147 = arith.constant 0 : index
    %188 = vector.load %arg5[%c1_145, %c0_146, %c0_147] : memref<2x512x31xf32, #tpu.memory_space<vmem>>, vector<1x512x31xf32>
    %189 = vector.shape_cast %188 : vector<1x512x31xf32> to vector<512x31xf32>
    %cst_148 = arith.constant dense<0.000000e+00> : vector<31x31xf32>
    %190 = tpu.matmul %187, %189, %cst_148 {dimension_numbers = #tpu.dot_dimension_numbers<[1], [0], [0], [1], [0, 0, 1, 1], [], []>} : vector<31x512xf32>, vector<512x31xf32>, vector<31x31xf32> -> vector<31x31xf32>
    %191 = arith.addf %186, %190 : vector<31x31xf32>
    %c0_149 = arith.constant 0 : index
    %c0_150 = arith.constant 0 : index
    %c0_151 = arith.constant 0 : index
    %192 = vector.load %arg6[%c0_149, %c0_150, %c0_151] : memref<1x31x31xf32, #tpu.memory_space<vmem>>, vector<1x31x31xf32>
    %193 = vector.shape_cast %192 : vector<1x31x31xf32> to vector<31x31xf32>
    %194 = vector.shape_cast %191 : vector<31x31xf32> to vector<1x31x31xf32>
    tpu.vector_store %arg6[%c0_149, %c0_150, %c0_151], %194 {strides = array<i32>} : memref<1x31x31xf32, #tpu.memory_space<vmem>>, vector<1x31x31xf32>,
    return
  }
  func.func @transform_0(%arg0: i32) -> (i32, i32, i32) {
    %c0_i32 = arith.constant 0 : i32
    %c0_i32_0 = arith.constant 0 : i32
    %c0_i32_1 = arith.constant 0 : i32
    return %arg0, %c0_i32, %c0_i32_0 : i32, i32, i32
  }
  func.func @transform_1(%arg0: i32) -> (i32, i32, i32, i32) {
    %c0_i32 = arith.constant 0 : i32
    %c0_i32_0 = arith.constant 0 : i32
    %c0_i32_1 = arith.constant 0 : i32
    %c0_i32_2 = arith.constant 0 : i32
    %c0_i32_3 = arith.constant 0 : i32
    return %c0_i32, %c0_i32_0, %c0_i32_1, %c0_i32_2 : i32, i32, i32, i32
  }
  func.func @transform_2(%arg0: i32) -> (i32, i32, i32, i32) {
    %c0_i32 = arith.constant 0 : i32
    %c0_i32_0 = arith.constant 0 : i32
    %c0_i32_1 = arith.constant 0 : i32
    %c0_i32_2 = arith.constant 0 : i32
    %c0_i32_3 = arith.constant 0 : i32
    return %c0_i32, %c0_i32_0, %c0_i32_1, %c0_i32_2 : i32, i32, i32, i32
  }
  func.func @transform_3(%arg0: i32) -> (i32, i32, i32) {
    %c0_i32 = arith.constant 0 : i32
    %c0_i32_0 = arith.constant 0 : i32
    %c0_i32_1 = arith.constant 0 : i32
    %c0_i32_2 = arith.constant 0 : i32
    return %c0_i32, %c0_i32_0, %c0_i32_1 : i32, i32, i32
  }
  func.func @transform_4(%arg0: i32) -> (i32, i32, i32) {
    %c0_i32 = arith.constant 0 : i32
    %c0_i32_0 = arith.constant 0 : i32
    %c0_i32_1 = arith.constant 0 : i32
    %c0_i32_2 = arith.constant 0 : i32
    return %c0_i32, %c0_i32_0, %c0_i32_1 : i32, i32, i32
  }
  func.func @transform_5(%arg0: i32) -> (i32, i32, i32) {
    %c0_i32 = arith.constant 0 : i32
    %c0_i32_0 = arith.constant 0 : i32
    %c0_i32_1 = arith.constant 0 : i32
    return %arg0, %c0_i32, %c0_i32_0 : i32, i32, i32
  }
  func.func @transform_6(%arg0: i32) -> (i32, i32, i32) {
    %c0_i32 = arith.constant 0 : i32
    %c0_i32_0 = arith.constant 0 : i32
    %c0_i32_1 = arith.constant 0 : i32
    return %arg0, %c0_i32, %c0_i32_0 : i32, i32, i32
  }
}

</mosaic_0001>

<bundles_post_ra>
// kernel: critic_v2_forward.1
= control target key start
LH: loop header
LB: loop body
LE: loop exit
PB: predicated region body
PF: predicated region fallthrough
CT: control target
= control target key end

     0   :  { %s6865_s21 = smov 0   ;;  %s10345_s0 = inlined_call_operand.vmem [shape: f32[2,10,60], index: 0, kind: input, shape index: {}]   ;;  %s10346_s1 = inlined_call_operand.vmem [shape: f32[2,2,60,144], index: 1, kind: input, shape index: {}]   ;;  %s10347_s2 = inlined_call_operand.vmem [shape: f32[2,2,144,544], index: 2, kind: input, shape index: {}]   ;;  %s10348_s3 = inlined_call_operand.vmem [shape: f32[3,544,32], index: 3, kind: input, shape index: {}]   ;;  %s10349_s4 = inlined_call_operand.vmem [shape: f32[2,512,31], index: 4, kind: input, shape index: {}]   ;;  %s10350_s5 = inlined_call_operand.vmem [shape: f32[2,31,31], index: 5, kind: output, shape index: {0}]   ;;  %s10351_s6 = inlined_call_operand.vmem [shape: f32[2,32,1], index: 6, kind: output, shape index: {1}]  }
   0x1 LB: > { %s4756_s22 = sadd.s32 4294967295, %s6823_s21   ;;  %p4760_p0 = scmp.ge.s32.totalorder %s6823_s21, 1  ;;  %s6823_s21 = sphi %s6865_s21, %s17_s21  }
   0x2   : > { %p215_p1 = scmp.lt.s32.totalorder %s6823_s21, 3 }
   0x4   : > { %p216_p2 = pnand %p4760_p0, %p215_p1 }
   0x6   : > { %219 = sbr.rel (%p216_p2) target bundleno = 1205 (0x4b5), region = 40 }
   0xd   : > { %v4768_v0 = vld [vmem:[%s10346_s1 + $0x88] sm:$0xff]  ;;  %v4770_v1 = vld [vmem:[%s10346_s1 + $0x98] sm:$0xff]  ;;  %v4767_v5 = vld [vmem:[%s10346_s1 + $0x80] sm:$0xff]  ;;  %v6825_v7 = vmov 0.0   ;;  %p250_p3 = scmp.lt.s32.totalorder %s4756_s22, 1  ;;  %vm344_vm0 = vcmask 1043456  }
   0xe   : > { %v4806_v2 = vld [vmem:[%s10346_s1 + $0x188] sm:$0xff]  ;;  %v5844_v3 = vpack.c.bf16 %v4770_v1, %v4768_v0  ;;  %v4808_v4 = vld [vmem:[%s10346_s1 + $0x198] sm:$0xff]  ;;  %v4769_v6 = vld [vmem:[%s10346_s1 + $0x90] sm:$0xff]  ;;  %415 = vmatprep.mubr.f32.mxu0 %v6825_v7  ;;  %265 = vst [vmem:[#allocation2] sm:$0xff] %v6825_v7  ;;  %703 = vmatprep.mubr.f32.mxu1 %v6825_v7  ;;  %vm6826_vm1 = vmmov 1   ;;  %vm337_vm3 = vcmask 1046528  }
   0xf   : > { %268 = vst [vmem:[#allocation2 + $0x10] sm:$0xff] %v6825_v7  ;;  %270 = vst [vmem:[#allocation2 + $0x20] sm:$0x3] %v6825_v7  ;;  %v5880_v8 = vpack.c.bf16 %v4808_v4, %v4806_v2  ;;  %v5846_v9 = vpack.c.bf16 %v4769_v6, %v4767_v5  ;;  %v4805_v10 = vld [vmem:[%s10346_s1 + $0x180] sm:$0xff]  ;;  %v4807_v11 = vld [vmem:[%s10346_s1 + $0x190] sm:$0xff]  ;;  %s10434_s22 = smov (!%p250_p3, %s4756_s22), 1 }
  0x10   : > { %273 = vst [vmem:[#allocation3] sm:$0xff] %v6825_v7  ;;  %274 = vst [vmem:[#allocation3 + $0x8] sm:$0xff] %v6825_v7  ;;  %v4772_v12 = vld [vmem:[%s10346_s1 + $0xa8] sm:$0xff]  ;;  %5845 = vmatprep.subr.bf16.mxu0 %v5844_v3  ;;  %v5882_v13 = vpack.c.bf16 %v4807_v11, %v4805_v10  ;;  %v4774_v14 = vld [vmem:[%s10346_s1 + $0xb8] sm:$0xff]  ;;  %s5335_s19 = sshll.u32 %s10434_s22, 4  ;;  %vm627_vm4 = vcmask 1045504  }
  0x11   : > { %275 = vst [vmem:[#allocation3 + $0x10] sm:$0xff] %v6825_v7  ;;  %276 = vst [vmem:[#allocation3 + $0x18] sm:$0xff] %v6825_v7  ;;  %v4810_v15 = vld [vmem:[%s10346_s1 + $0x1a8] sm:$0xff]  ;;  %v4812_v16 = vld [vmem:[%s10346_s1 + $0x1b8] sm:$0xff]  ;;  %5881 = vmatprep.subr.bf16.mxu1 %v5880_v8  ;;  %5847 = vmatpush1.bf16.msra.mxu0 %v5846_v9  ;;  %v5848_v17 = vpack.c.bf16 %v4774_v14, %v4772_v12  ;;  %s254_s16 = scalar_lea.vmem %s10345_s0, %s5335_s19  ;;  %vm341_vm5 = vcmask 490496   ;;  %vm266_vm6 = vcmask 130048  }
  0x12   : > { %279 = vst [vmem:[#allocation3 + $0x28] sm:$0xff] %v6825_v7  ;;  %280 = vst [vmem:[#allocation3 + $0x30] sm:$0xff] %v6825_v7  ;;  %v5884_v18 = vpack.c.bf16 %v4812_v16, %v4810_v15  ;;  %v4771_v19 = vld [vmem:[%s10346_s1 + $0xa0] sm:$0xff]  ;;  %v4773_v20 = vld [vmem:[%s10346_s1 + $0xb0] sm:$0xff]  ;;  %5883 = vmatpush1.bf16.msra.mxu1 %v5882_v13  ;;  %vm271_vm7 = vcmask 123904   ;;  %vm277_vm9 = vcmask 261120  }
  0x13   : > { %281 = vst [vmem:[#allocation3 + $0x38] sm:$0xff] %v6825_v7  ;;  %282 = vst [vmem:[#allocation3 + $0x40] sm:$0xff] %v6825_v7  ;;  %v4809_v21 = vld [vmem:[%s10346_s1 + $0x1a0] sm:$0xff]  ;;  %v5850_v22 = vpack.c.bf16 %v4773_v20, %v4771_v19  ;;  %v4811_v23 = vld [vmem:[%s10346_s1 + $0x1b0] sm:$0xff]  ;;  %5849 = vmatprep.subr.bf16.mxu0 %v5848_v17  ;;  %vm298_vm10 = vcmask 254976   ;;  %s6829_s28 = smov 112  }
  0x14   : > { %284 = vst [vmem:[#allocation3 + $0x50] sm:$0xff] %v6825_v7  ;;  %285 = vst [vmem:[#allocation3 + $0x58] sm:$0xff] %v6825_v7  ;;  %v4776_v24 = vld [vmem:[%s10346_s1 + $0xc8] sm:$0xff]  ;;  %v4778_v25 = vld [vmem:[%s10346_s1 + $0xd8] sm:$0xff]  ;;  %5885 = vmatprep.subr.bf16.mxu1 %v5884_v18  ;;  %v5886_v26 = vpack.c.bf16 %v4811_v23, %v4809_v21  ;;  %vm4217_vm12 = vcmask 916480   ;;  %s5336_s19 = sshll.u32 %s10434_s22, 5 }
  0x15   : > { %286 = vst [vmem:[#allocation3 + $0x60] sm:$0xff] %v6825_v7  ;;  %287 = vst [vmem:[#allocation3 + $0x68] sm:$0xff] %v6825_v7  ;;  %v5852_v27 = vpack.c.bf16 %v4778_v25, %v4776_v24  ;;  %v4814_v28 = vld [vmem:[%s10346_s1 + $0x1c8] sm:$0xff]  ;;  %v4816_v29 = vld [vmem:[%s10346_s1 + $0x1d8] sm:$0xff]  ;;  %5851 = vmatpush1.bf16.msra.mxu0 %v5850_v22  ;;  %s259_s7 = scalar_lea.vmem %s10350_s5, %s5336_s19  ;;  %vm4662_vm13 = vcmask 252928   ;;  %vm4666_vm14 = vcmask 251904   ;;  %s264_s8 = scalar_lea.vmem %s10351_s6, %s5336_s19 }
  0x16   : > { %289 = vst [vmem:[#allocation3 + $0x78] sm:$0xff] %v6825_v7  ;;  %290 = vst [vmem:[#allocation3 + $0x80] sm:$0xff] %v6825_v7  ;;  %v4775_v30 = vld [vmem:[%s10346_s1 + $0xc0] sm:$0xff]  ;;  %v5888_v31 = vpack.c.bf16 %v4816_v29, %v4814_v28  ;;  %v4777_v32 = vld [vmem:[%s10346_s1 + $0xd0] sm:$0xff]  ;;  %5887 = vmatpush1.bf16.msra.mxu1 %v5886_v26  ;;  %vm4043_vm15 = vcmask 7168  }
  0x17   : > { %291 = vst [vmem:[#allocation3 + $0x88] sm:$0xff] %v6825_v7  ;;  %292 = vst [vmem:[#allocation3 + $0x90] sm:$0xff] %v6825_v7  ;;  %v4813_v33 = vld [vmem:[%s10346_s1 + $0x1c0] sm:$0xff]  ;;  %v4815_v34 = vld [vmem:[%s10346_s1 + $0x1d0] sm:$0xff]  ;;  %v5854_v35 = vpack.c.bf16 %v4777_v32, %v4775_v30  ;;  %5853 = vmatprep.subr.bf16.mxu0 %v5852_v27 }
  0x18   : > { %294 = vst [vmem:[#allocation3 + $0xa0] sm:$0x3] %v6825_v7  ;;  %295 = vst [vmem:[#allocation3 + $0xa8] sm:$0x3] %v6825_v7  ;;  %v4780_v36 = vld [vmem:[%s10346_s1 + $0xe8] sm:$0xff]  ;;  %v5890_v39 = vpack.c.bf16 %v4815_v34, %v4813_v33  ;;  %v4779_v43 = vld [vmem:[%s10346_s1 + $0xe0] sm:$0xff]  ;;  %5889 = vmatprep.subr.bf16.mxu1 %v5888_v31 }
  0x19   : > { %296 = vst [vmem:[#allocation3 + $0xb0] sm:$0x3] %v6825_v7  ;;  %297 = vst [vmem:[#allocation3 + $0xb8] sm:$0x3] %v6825_v7  ;;  %v4782_v37 = vld [vmem:[%s10346_s1 + $0xf8] sm:$0xf]  ;;  %5855 = vmatpush1.bf16.msra.mxu0 %v5854_v35 }
  0x1a   : > { %vm6984_vm2 = vmpackc.low %vm344_vm0, %vm6826_vm1  ;;  %v5856_v40 = vpack.c.bf16 %v4782_v37, %v4780_v36  ;;  %v4818_v41 = vld [vmem:[%s10346_s1 + $0x1e8] sm:$0xff]  ;;  %v4820_v42 = vld [vmem:[%s10346_s1 + $0x1f8] sm:$0xf]  ;;  %5891 = vmatpush1.bf16.msra.mxu1 %v5890_v39  ;;  %267 = vst.msk [vmem:[#allocation2 + $0x8] sm:$0xff] %vm266_vm6, %v6825_v7 }
  0x1b   : > { %v5892_v44 = vpack.c.bf16 %v4820_v42, %v4818_v41  ;;  %v4781_v45 = vld [vmem:[%s10346_s1 + $0xf0] sm:$0xf]  ;;  %v4817_v46 = vld [vmem:[%s10346_s1 + $0x1e0] sm:$0xff]  ;;  %v303_v48 = vld [vmem:[%s10346_s1 + $0x8] sm:$0xff]  ;;  %269 = vst.msk [vmem:[#allocation2 + $0x18] sm:$0xff] %vm266_vm6, %v6825_v7 }
  0x1c   : > { %v4819_v47 = vld [vmem:[%s10346_s1 + $0x1f0] sm:$0xf]  ;;  %v305_v49 = vld [vmem:[%s10346_s1 + $0x18] sm:$0xff]  ;;  %v4790_v50 = vld [vmem:[%s10346_s1 + $0x108] sm:$0xff]  ;;  %v5859_v51 = vpack.c.bf16 %v4781_v45, %v4779_v43  ;;  %5858 = vmatprep.subr.msk.bf16.mxu0 %vm6984_vm2, %v5856_v40  ;;  %272 = vst.msk [vmem:[#allocation2 + $0x28] sm:$0x3] %vm271_vm7, %v6825_v7 }
  0x1d   : > { %v5895_v52 = vpack.c.bf16 %v4819_v47, %v4817_v46  ;;  %v4792_v53 = vld [vmem:[%s10346_s1 + $0x118] sm:$0xff]  ;;  %v7021_v54 = vld [vmem:[%s254_s16] sm:$0xff]  ;;  %v301_v55 = vld [vmem:[%s254_s16 + $0x8] sm:$0x3]  ;;  %v5862_v56 = vpack.c.bf16 %v305_v49, %v303_v48  ;;  %5894 = vmatprep.subr.msk.bf16.mxu1 %vm6984_vm2, %v5892_v44 }
  0x1e   : > { %v338_v57 = vrot.slane %v7021_v54, 1  ;;  %v339_v58 = vrot.slane %v301_v55, 1  ;;  %v302_v59 = vld [vmem:[%s10346_s1] sm:$0xff]  ;;  %v304_v60 = vld [vmem:[%s10346_s1 + $0x10] sm:$0xff]  ;;  %v628_v61 = vrot.slane %v7021_v54, 2  ;;  %v5898_v63 = vpack.c.bf16 %v4792_v53, %v4790_v50  ;;  %v307_v2 = vld [vmem:[%s10346_s1 + $0x28] sm:$0xff]  ;;  %5861 = vmatpush1.bf16.msk.msra.mxu0 %vm6984_vm2, %v5859_v51 }
  0x1f   : > { %v4789_v62 = vld [vmem:[%s10346_s1 + $0x100] sm:$0xff]  ;;  %v629_v0 = vrot.slane %v301_v55, 2  ;;  %v4791_v1 = vld [vmem:[%s10346_s1 + $0x110] sm:$0xff]  ;;  %v309_v3 = vld [vmem:[%s10346_s1 + $0x38] sm:$0xff]  ;;  %v5864_v8 = vpack.c.bf16 %v304_v60, %v302_v59  ;;  %5897 = vmatpush1.bf16.msk.msra.mxu1 %vm6984_vm2, %v5895_v52  ;;  %5863 = vmatprep.subr.bf16.mxu0 %v5862_v56 }
  0x20   : > { %v4794_v4 = vld [vmem:[%s10346_s1 + $0x128] sm:$0xff]  ;;  %v4796_v5 = vld [vmem:[%s10346_s1 + $0x138] sm:$0xff]  ;;  %v7056_v6 = vsel %vm337_vm3, %v338_v57, %v339_v58  ;;  %v5900_v10 = vpack.c.bf16 %v4791_v1, %v4789_v62  ;;  %v5866_v11 = vpack.c.bf16 %v309_v3, %v307_v2  ;;  %v306_v12 = vld [vmem:[%s10346_s1 + $0x20] sm:$0xff]  ;;  %5899 = vmatprep.subr.bf16.mxu1 %v5898_v63 }
  0x21   : > { %v630_v9 = vsel %vm627_vm4, %v628_v61, %v629_v0  ;;  %v308_v13 = vld [vmem:[%s10346_s1 + $0x30] sm:$0xff]  ;;  %v4793_v14 = vld [vmem:[%s10346_s1 + $0x120] sm:$0xff]  ;;  %v5902_v15 = vpack.c.bf16 %v4796_v5, %v4794_v4  ;;  %v311_v17 = vld [vmem:[%s10346_s1 + $0x48] sm:$0xff]  ;;  %4785 = vmatmul.mubr.msk.f32.vlgmr.msra.gmra.mrb[0].mxu0 %vm341_vm5, %v7056_v6 }
  0x22   : > { %v4795_v16 = vld [vmem:[%s10346_s1 + $0x130] sm:$0xff]  ;;  %v313_v18 = vld [vmem:[%s10346_s1 + $0x58] sm:$0xff]  ;;  %v4798_v19 = vld [vmem:[%s10346_s1 + $0x148] sm:$0xff]  ;;  %5865 = vmatpush1.bf16.msra.mxu0 %v5864_v8  ;;  %4823 = vmatmul.mubr.msk.f32.vlgmr.msra.gmra.mrb[0].mxu1 %vm341_vm5, %v630_v9  ;;  %v5868_v21 = vpack.c.bf16 %v308_v13, %v306_v12 }
  0x23   : > { %v4800_v20 = vld [vmem:[%s10346_s1 + $0x158] sm:$0xff]  ;;  %5901 = vmatpush1.bf16.msra.mxu1 %v5900_v10  ;;  %5867 = vmatprep.subr.bf16.mxu0 %v5866_v11  ;;  %v5904_v22 = vpack.c.bf16 %v4795_v16, %v4793_v14  ;;  %v5870_v23 = vpack.c.bf16 %v313_v18, %v311_v17  ;;  %v310_v24 = vld [vmem:[%s10346_s1 + $0x40] sm:$0xff]  ;;  %v312_v25 = vld [vmem:[%s10346_s1 + $0x50] sm:$0xff] }
  0x24   : > { %v4797_v26 = vld [vmem:[%s10346_s1 + $0x140] sm:$0xff]  ;;  %5903 = vmatprep.subr.bf16.mxu1 %v5902_v15  ;;  %v5906_v27 = vpack.c.bf16 %v4800_v20, %v4798_v19  ;;  %v4799_v28 = vld [vmem:[%s10346_s1 + $0x150] sm:$0xff]  ;;  %v315_v29 = vld [vmem:[%s10346_s1 + $0x68] sm:$0xff]  ;;  %494 = vmatprep.mubr.f32.mxu0 %v6825_v7  ;;  %v5872_v33 = vpack.c.bf16 %v312_v25, %v310_v24 }
  0x25   : > { %v317_v30 = vld [vmem:[%s10346_s1 + $0x78] sm:$0xf]  ;;  %v4802_v31 = vld [vmem:[%s10346_s1 + $0x168] sm:$0xff]  ;;  %780 = vmatprep.mubr.f32.mxu1 %v6825_v7  ;;  %v5908_v34 = vpack.c.bf16 %v4799_v28, %v4797_v26  ;;  %v314_v36 = vld [vmem:[%s10346_s1 + $0x60] sm:$0xff] }
  0x26   : > { %v4804_v32 = vld [vmem:[%s10346_s1 + $0x178] sm:$0xf]  ;;  %5869 = vmatpush1.bf16.msra.mxu0 %v5868_v21  ;;  %v5874_v35 = vpack.c.bf16 %v317_v30, %v315_v29  ;;  %v316_v37 = vld [vmem:[%s10346_s1 + $0x70] sm:$0xf]  ;;  %v4801_v39 = vld [vmem:[%s10346_s1 + $0x160] sm:$0xff] }
  0x27   : > { %5905 = vmatpush1.bf16.msra.mxu1 %v5904_v22  ;;  %5871 = vmatprep.subr.bf16.mxu0 %v5870_v23  ;;  %v5910_v40 = vpack.c.bf16 %v4804_v32, %v4802_v31  ;;  %v4803_v41 = vld [vmem:[%s10346_s1 + $0x170] sm:$0xf]  ;;  %v4828_v42 = vld [vmem:[%s10347_s2 + $0x2d8] sm:$0xff]  ;;  %v4833_v43 = vld [vmem:[%s10347_s2 + $0x300] sm:$0xff]  ;;  %v5877_v46 = vpack.c.bf16 %v316_v37, %v314_v36 }
  0x28   : > { %5907 = vmatprep.subr.bf16.mxu1 %v5906_v27  ;;  %v4830_v44 = vld [vmem:[%s10347_s2 + $0x2e8] sm:$0xff]  ;;  %v4835_v45 = vld [vmem:[%s10347_s2 + $0x310] sm:$0xff]  ;;  %v5913_v47 = vpack.c.bf16 %v4803_v41, %v4801_v39  ;;  %v5916_v48 = vpack.c.bf16 %v4833_v43, %v4828_v42  ;;  %v4832_v50 = vld [vmem:[%s10347_s2 + $0x2f8] sm:$0xff] }
  0x29   : > { %v4827_v49 = vld [vmem:[%s10347_s2 + $0x2d0] sm:$0xff]  ;;  %v4829_v51 = vld [vmem:[%s10347_s2 + $0x2e0] sm:$0xff]  ;;  %v5952_v52 = vpack.c.bf16 %v4835_v45, %v4830_v44  ;;  %v4834_v53 = vld [vmem:[%s10347_s2 + $0x308] sm:$0xff] }
  0x2a   : > { %5873 = vmatpush1.bf16.msra.mxu0 %v5872_v33  ;;  %v4838_v55 = vld [vmem:[%s10347_s2 + $0x328] sm:$0xff]  ;;  %v4843_v56 = vld [vmem:[%s10347_s2 + $0x350] sm:$0xff]  ;;  %v4840_v57 = vld [vmem:[%s10347_s2 + $0x338] sm:$0xff]  ;;  %v5918_v59 = vpack.c.bf16 %v4832_v50, %v4827_v49  ;;  %v5954_v60 = vpack.c.bf16 %v4834_v53, %v4829_v51 }
  0x2b   : > { %5909 = vmatpush1.bf16.msra.mxu1 %v5908_v34  ;;  %5876 = vmatprep.subr.msk.bf16.mxu0 %vm6984_vm2, %v5874_v35  ;;  %v4845_v58 = vld [vmem:[%s10347_s2 + $0x360] sm:$0xff]  ;;  %v5920_v61 = vpack.c.bf16 %v4843_v56, %v4838_v55  ;;  %v4842_v63 = vld [vmem:[%s10347_s2 + $0x348] sm:$0xff]  ;;  %v4839_v0 = vld [vmem:[%s10347_s2 + $0x330] sm:$0xff] }
  0x2c   : > { %5912 = vmatprep.subr.msk.bf16.mxu1 %vm6984_vm2, %v5910_v40  ;;  %v4837_v62 = vld [vmem:[%s10347_s2 + $0x320] sm:$0xff]  ;;  %v5956_v1 = vpack.c.bf16 %v4845_v58, %v4840_v57  ;;  %v4844_v38 = vld [vmem:[%s10347_s2 + $0x358] sm:$0xff]  ;;  %v4850_v4 = vld [vmem:[%s10347_s2 + $0x388] sm:$0xff] }
  0x2d   : > { %v4848_v2 = vld [vmem:[%s10347_s2 + $0x378] sm:$0xff]  ;;  %v4853_v3 = vld [vmem:[%s10347_s2 + $0x3a0] sm:$0xff]  ;;  %v4855_v5 = vld [vmem:[%s10347_s2 + $0x3b0] sm:$0xff]  ;;  %v5922_v8 = vpack.c.bf16 %v4842_v63, %v4837_v62  ;;  %v5958_v9 = vpack.c.bf16 %v4844_v38, %v4839_v0 }
  0x2e   : > { %5879 = vmatpush1.bf16.msk.msra.mxu0 %vm6984_vm2, %v5877_v46  ;;  %v5924_v10 = vpack.c.bf16 %v4853_v3, %v4848_v2  ;;  %v5960_v11 = vpack.c.bf16 %v4855_v5, %v4850_v4  ;;  %v4849_v12 = vld [vmem:[%s10347_s2 + $0x380] sm:$0xff]  ;;  %v4854_v14 = vld [vmem:[%s10347_s2 + $0x3a8] sm:$0xff]  ;;  %v4863_v17 = vld [vmem:[%s10347_s2 + $0x3f0] sm:$0xff] }
  0x2f   : > { %5915 = vmatpush1.bf16.msk.msra.mxu1 %vm6984_vm2, %v5913_v47  ;;  %5917 = vmatprep.subr.bf16.mxu0 %v5916_v48  ;;  %v5962_v15 = vpack.c.bf16 %v4854_v14, %v4849_v12  ;;  %v4858_v16 = vld [vmem:[%s10347_s2 + $0x3c8] sm:$0xff]  ;;  %v4860_v18 = vld [vmem:[%s10347_s2 + $0x3d8] sm:$0xff]  ;;  %v4865_v20 = vld [vmem:[%s10347_s2 + $0x400] sm:$0xff] }
  0x30   : > { %5953 = vmatprep.subr.bf16.mxu1 %v5952_v52  ;;  %v5928_v19 = vpack.c.bf16 %v4863_v17, %v4858_v16  ;;  %v4857_v21 = vld [vmem:[%s10347_s2 + $0x3c0] sm:$0xff]  ;;  %v4862_v22 = vld [vmem:[%s10347_s2 + $0x3e8] sm:$0xff]  ;;  %v5964_v23 = vpack.c.bf16 %v4865_v20, %v4860_v18  ;;  %v4859_v25 = vld [vmem:[%s10347_s2 + $0x3d0] sm:$0xff] }
  0x31   : > { %4788 = vmatmul.mubr.msk.f32.vlgmr.msra.gmra.mrb[0].mxu0 %vm341_vm5, %v7021_v54  ;;  %v4847_v54 = vld [vmem:[%s10347_s2 + $0x370] sm:$0xff]  ;;  %v5930_v24 = vpack.c.bf16 %v4862_v22, %v4857_v21  ;;  %v4864_v26 = vld [vmem:[%s10347_s2 + $0x3f8] sm:$0xff]  ;;  %v4873_v29 = vld [vmem:[%s10347_s2 + $0x440] sm:$0xff] }
  0x32   : > { %4826 = vmatmul.mubr.msk.f32.vlgmr.msra.gmra.mrb[0].mxu1 %vm341_vm5, %v7056_v6  ;;  %5919 = vmatpush1.bf16.msra.mxu0 %v5918_v59  ;;  %v4852_v6 = vld [vmem:[%s10347_s2 + $0x398] sm:$0xff]  ;;  %v5966_v27 = vpack.c.bf16 %v4864_v26, %v4859_v25  ;;  %v4870_v30 = vld [vmem:[%s10347_s2 + $0x428] sm:$0xff]  ;;  %v4875_v32 = vld [vmem:[%s10347_s2 + $0x450] sm:$0xff] }
  0x33   : > { %5955 = vmatpush1.bf16.msra.mxu1 %v5954_v60  ;;  %5921 = vmatprep.subr.bf16.mxu0 %v5920_v61  ;;  %v5926_v13 = vpack.c.bf16 %v4852_v6, %v4847_v54  ;;  %v4868_v28 = vld [vmem:[%s10347_s2 + $0x418] sm:$0xff]  ;;  %v4867_v33 = vld [vmem:[%s10347_s2 + $0x410] sm:$0xff]  ;;  %v5968_v35 = vpack.c.bf16 %v4875_v32, %v4870_v30  ;;  %v4869_v37 = vld [vmem:[%s10347_s2 + $0x420] sm:$0xff]  ;;  %v511_v30 = vlaneseq }
  0x34   : > { %5957 = vmatprep.subr.bf16.mxu1 %v5956_v1  ;;  %v5932_v31 = vpack.c.bf16 %v4873_v29, %v4868_v28  ;;  %v4872_v34 = vld [vmem:[%s10347_s2 + $0x438] sm:$0xff]  ;;  %v4874_v39 = vld [vmem:[%s10347_s2 + $0x448] sm:$0xff]  ;;  %v4883_v42 = vld [vmem:[%s10347_s2 + $0x490] sm:$0xff]  ;;  %v6828_v28 = vmov 1966171168  }
  0x35   : > { %v5934_v36 = vpack.c.bf16 %v4872_v34, %v4867_v33  ;;  %v5970_v40 = vpack.c.bf16 %v4874_v39, %v4869_v37  ;;  %v4878_v41 = vld [vmem:[%s10347_s2 + $0x468] sm:$0xff]  ;;  %v4880_v43 = vld [vmem:[%s10347_s2 + $0x478] sm:$0xff]  ;;  %v4885_v45 = vld [vmem:[%s10347_s2 + $0x4a0] sm:$0xff]  ;;  %v509_v29 = vunpack.c.l.s4 %v6828_v28  ;;  %v512_v33 = vshrl.u32 %v511_v30, 7 }
  0x36   : > { %5923 = vmatpush1.bf16.msra.mxu0 %v5922_v8  ;;  %v5936_v44 = vpack.c.bf16 %v4883_v42, %v4878_v41  ;;  %v4877_v46 = vld [vmem:[%s10347_s2 + $0x460] sm:$0xff]  ;;  %v4882_v47 = vld [vmem:[%s10347_s2 + $0x488] sm:$0xff]  ;;  %v5972_v48 = vpack.c.bf16 %v4885_v45, %v4880_v43  ;;  %v4879_v50 = vld [vmem:[%s10347_s2 + $0x470] sm:$0xff]  ;;  %vm7372_vm8 = vcmp.lt.s32.totalorder %v511_v30, 144  ;;  %vm8726_vm11 = vcmp.lt.s32.totalorder %v511_v30, 544 }
  0x37   : > { %5959 = vmatpush1.bf16.msra.mxu1 %v5958_v9  ;;  %5925 = vmatprep.subr.bf16.mxu0 %v5924_v10  ;;  %v5938_v49 = vpack.c.bf16 %v4882_v47, %v4877_v46  ;;  %v4884_v51 = vld [vmem:[%s10347_s2 + $0x498] sm:$0xff]  ;;  %v4893_v55 = vld [vmem:[%s10347_s2 + $0x4e0] sm:$0xff]  ;;  %v4890_v56 = vld [vmem:[%s10347_s2 + $0x4c8] sm:$0xff]  ;;  %v510_v32 = vunpack.c.0.s8 %v509_v29 }
  0x38   : > { %5961 = vmatprep.subr.bf16.mxu1 %v5960_v11  ;;  %v5974_v52 = vpack.c.bf16 %v4884_v51, %v4879_v50  ;;  %v4888_v53 = vld [vmem:[%s10347_s2 + $0x4b8] sm:$0xff]  ;;  %v4895_v58 = vld [vmem:[%s10347_s2 + $0x4f0] sm:$0xff]  ;;  %v4889_v63 = vld [vmem:[%s10347_s2 + $0x4c0] sm:$0xff] }
  0x39   : > { %v5940_v57 = vpack.c.bf16 %v4893_v55, %v4888_v53  ;;  %v4887_v59 = vld [vmem:[%s10347_s2 + $0x4b0] sm:$0xff]  ;;  %v4892_v60 = vld [vmem:[%s10347_s2 + $0x4d8] sm:$0xff]  ;;  %v5976_v61 = vpack.c.bf16 %v4895_v58, %v4890_v56  ;;  %v4894_v0 = vld [vmem:[%s10347_s2 + $0x4e8] sm:$0xff]  ;;  %v7367_v45 = vsub.s32 %v510_v32, %v512_v33 }
  0x3a   : > { %5927 = vmatpush1.bf16.msra.mxu0 %v5926_v13  ;;  %v5942_v62 = vpack.c.bf16 %v4892_v60, %v4887_v59  ;;  %v5978_v1 = vpack.c.bf16 %v4894_v0, %v4889_v63  ;;  %v4898_v38 = vld [vmem:[%s10347_s2 + $0x508] sm:$0xff]  ;;  %v4903_v2 = vld [vmem:[%s10347_s2 + $0x530] sm:$0xff]  ;;  %v4900_v3 = vld [vmem:[%s10347_s2 + $0x518] sm:$0xff] }
  0x3b   : > { %5963 = vmatpush1.bf16.msra.mxu1 %v5962_v15  ;;  %5929 = vmatprep.subr.bf16.mxu0 %v5928_v19  ;;  %v5944_v4 = vpack.c.bf16 %v4903_v2, %v4898_v38  ;;  %v4905_v7 = vld [vmem:[%s10347_s2 + $0x540] sm:$0xff]  ;;  %v4902_v8 = vld [vmem:[%s10347_s2 + $0x528] sm:$0xff]  ;;  %v4899_v11 = vld [vmem:[%s10347_s2 + $0x510] sm:$0xff] }
  0x3c   : > { %5965 = vmatprep.subr.bf16.mxu1 %v5964_v23  ;;  %v4897_v5 = vld [vmem:[%s10347_s2 + $0x500] sm:$0xff]  ;;  %v5980_v9 = vpack.c.bf16 %v4905_v7, %v4900_v3  ;;  %v4904_v54 = vld [vmem:[%s10347_s2 + $0x538] sm:$0xff]  ;;  %v4910_v14 = vld [vmem:[%s10347_s2 + $0x568] sm:$0xff] }
  0x3d   : > { %v5946_v10 = vpack.c.bf16 %v4902_v8, %v4897_v5  ;;  %v4908_v6 = vld [vmem:[%s10347_s2 + $0x558] sm:$0xff]  ;;  %v5982_v12 = vpack.c.bf16 %v4904_v54, %v4899_v11  ;;  %v4913_v13 = vld [vmem:[%s10347_s2 + $0x580] sm:$0xff]  ;;  %v4915_v15 = vld [vmem:[%s10347_s2 + $0x590] sm:$0xff] }
  0x3e   : > { %5931 = vmatpush1.bf16.msra.mxu0 %v5930_v24  ;;  %v5948_v16 = vpack.c.bf16 %v4913_v13, %v4908_v6  ;;  %v5984_v17 = vpack.c.bf16 %v4915_v15, %v4910_v14  ;;  %v4907_v18 = vld [vmem:[%s10347_s2 + $0x550] sm:$0xff]  ;;  %v4912_v19 = vld [vmem:[%s10347_s2 + $0x578] sm:$0xff]  ;;  %v4909_v20 = vld [vmem:[%s10347_s2 + $0x560] sm:$0xff] }
  0x3f   : > { %5967 = vmatpush1.bf16.msra.mxu1 %v5966_v27  ;;  %5933 = vmatprep.subr.bf16.mxu0 %v5932_v31  ;;  %v5950_v21 = vpack.c.bf16 %v4912_v19, %v4907_v18  ;;  %v4914_v22 = vld [vmem:[%s10347_s2 + $0x588] sm:$0xff]  ;;  %v884_v24 = vld [vmem:[%s10347_s2 + $0x18] sm:$0xff]  ;;  %v889_v25 = vld [vmem:[%s10347_s2 + $0x40] sm:$0xff]  ;;  %v6827_v27 = vmov 0.0|0.0  }
  0x40   : > { %5969 = vmatprep.subr.bf16.mxu1 %v5968_v35  ;;  %v5986_v23 = vpack.c.bf16 %v4914_v22, %v4909_v20  ;;  %v6051_v26 = vpack.c.bf16 %v889_v25, %v884_v24  ;;  %v4831_v6 = vld [vmem:[%s10347_s2 + $0x2f0] sm:$0xff]  ;;  %v894_v24 = vld [vmem:[%s10347_s2 + $0x68] sm:$0xff]  ;;  %v4841_v32 = vld [vmem:[%s10347_s2 + $0x340] sm:$0xff] }
  0x41   : > { %v883_v13 = vld [vmem:[%s10347_s2 + $0x10] sm:$0xff]  ;;  %v914_v53 = vld [vmem:[%s10347_s2 + $0x108] sm:$0xff] }
  0x42   : > { %5935 = vmatpush1.bf16.msra.mxu0 %v5934_v36  ;;  %v899_v25 = vld [vmem:[%s10347_s2 + $0x90] sm:$0xff] }
  0x43   : > { %5971 = vmatpush1.bf16.msra.mxu1 %v5970_v40  ;;  %5937 = vmatprep.subr.bf16.mxu0 %v5936_v44 }
  0x44   : > { %5973 = vmatprep.subr.bf16.mxu1 %v5972_v48 }
  0x46   : > { %5939 = vmatpush1.bf16.msra.mxu0 %v5938_v49 }
  0x47   : > { %5975 = vmatpush1.bf16.msra.mxu1 %v5974_v52  ;;  %5941 = vmatprep.subr.bf16.mxu0 %v5940_v57 }
  0x48   : > { %5977 = vmatprep.subr.bf16.mxu1 %v5976_v61 }
  0x4a   : > { %5943 = vmatpush1.bf16.msra.mxu0 %v5942_v62 }
  0x4b   : > { %5979 = vmatpush1.bf16.msra.mxu1 %v5978_v1  ;;  %5945 = vmatprep.subr.bf16.mxu0 %v5944_v4 }
  0x4c   : > { %5981 = vmatprep.subr.bf16.mxu1 %v5980_v9 }
  0x4e   : > { %5947 = vmatpush1.bf16.msra.mxu0 %v5946_v10 }
  0x4f   : > { %5983 = vmatpush1.bf16.msra.mxu1 %v5982_v12  ;;  %5949 = vmatprep.subr.bf16.mxu0 %v5948_v16  ;;  %v4836_v12 = vld [vmem:[%s10347_s2 + $0x318] sm:$0xff] }
  0x50   : > { %5985 = vmatprep.subr.bf16.mxu1 %v5984_v17  ;;  %v888_v16 = vld [vmem:[%s10347_s2 + $0x38] sm:$0xff]  ;;  %v5989_v28 = vpack.c.bf16 %v4836_v12, %v4831_v6  ;;  %v4886_v12 = vld [vmem:[%s10347_s2 + $0x4a8] sm:$0xff] }
  0x51   : > { %v6053_v29 = vpack.c.bf16 %v888_v16, %v883_v13  ;;  %v933_v13 = vld [vmem:[%s10347_s2 + $0x1a0] sm:$0xff]  ;;  %v938_v16 = vld [vmem:[%s10347_s2 + $0x1c8] sm:$0xff] }
  0x52   : > { %5951 = vmatpush1.bf16.msra.mxu0 %v5950_v21 }
  0x53   : > { %5987 = vmatpush1.bf16.msra.mxu1 %v5986_v23  ;;  %5988 = vmatprep.subr.bf16.mxu0 %v6827_v27 }
  0x54   : > { %6052 = vmatprep.subr.bf16.mxu1 %v6051_v26 }
 0x104   : > { %v496_v31 = vpop.f32.mrb[0].mxu0 }
 0x105   : > { %v501_v34 = vmul.f32 0.01, %v496_v31  ;;  %v782_v35 = vpop.f32.mrb[0].mxu1  ;;  %v498_v36 = vpop.f32.mrb[1].mxu0 }
 0x106   : > { %v787_v37 = vmul.f32 0.01, %v782_v35  ;;  %v502_v39 = vmul.f32 0.01, %v498_v36  ;;  %v784_v40 = vpop.f32.mrb[1].mxu1 }
 0x107   : > { %v503_v41 = vmax.f32 %v496_v31, %v501_v34  ;;  %v788_v42 = vmul.f32 0.01, %v784_v40 }
 0x108   : > { %v789_v43 = vmax.f32 %v782_v35, %v787_v37  ;;  %v504_v44 = vmax.f32 %v498_v36, %v502_v39  ;;  %v4846_v35 = vld [vmem:[%s10347_s2 + $0x368] sm:$0xff]  ;;  %v893_v36 = vld [vmem:[%s10347_s2 + $0x60] sm:$0xff]  ;;  %v6055_v39 = vpack.c.bf16 %v899_v25, %v894_v24  ;;  %v4891_v24 = vld [vmem:[%s10347_s2 + $0x4d0] sm:$0xff] }
 0x109   : > { %v790_v46 = vmax.f32 %v784_v40, %v788_v42  ;;  %v898_v37 = vld [vmem:[%s10347_s2 + $0x88] sm:$0xff]  ;;  %v909_v42 = vld [vmem:[%s10347_s2 + $0xe0] sm:$0xff] }
 0x10a   : > { %v507_v47 = vcombine.low %v503_v41, %v504_v44  ;;  %v552_v48 = vcombine.high %v503_v41, %v504_v44  ;;  %v904_v41 = vld [vmem:[%s10347_s2 + $0xb8] sm:$0xff]  ;;  %v5992_v44 = vpack.c.bf16 %v4846_v35, %v4841_v32  ;;  %v954_v32 = vld [vmem:[%s10347_s2 + $0x248] sm:$0xff]  ;;  %v959_v35 = vld [vmem:[%s10347_s2 + $0x270] sm:$0xff] }
 0x10b   : > { %v793_v49 = vcombine.low %v789_v43, %v790_v46  ;;  %v834_v50 = vcombine.high %v789_v43, %v790_v46  ;;  %v6057_v46 = vpack.c.bf16 %v898_v37, %v893_v36 }
 0x10c   : > { %v514_v51 = vrot.slane %v507_v47, %v7367_v45  ;;  %v559_v52 = vrot.slane %v552_v48, %v7367_v45  ;;  %v4851_v47 = vld [vmem:[%s10347_s2 + $0x390] sm:$0xff]  ;;  %v4856_v48 = vld [vmem:[%s10347_s2 + $0x3b8] sm:$0xff] }
 0x10d   : > { %v800_v55 = vrot.slane %v793_v49, %v7367_v45  ;;  %v841_v56 = vrot.slane %v834_v50, %v7367_v45  ;;  %v903_v49 = vld [vmem:[%s10347_s2 + $0xb0] sm:$0xff]  ;;  %v908_v50 = vld [vmem:[%s10347_s2 + $0xd8] sm:$0xff] }
 0x10e   : > { %v521_v57 = vrot.slane %v514_v51, %v7367_v45  ;;  %v530_v58 = vcombine.high %v514_v51, %v514_v51  ;;  %v566_v59 = vrot.slane %v559_v52, %v7367_v45  ;;  %v571_v60 = vcombine.high %v559_v52, %v559_v52 }
 0x10f   : > { %v807_v61 = vrot.slane %v800_v55, %v7367_v45  ;;  %v812_v62 = vcombine.high %v800_v55, %v800_v55  ;;  %v848_v63 = vrot.slane %v841_v56, %v7367_v45  ;;  %v853_v0 = vcombine.high %v841_v56, %v841_v56  ;;  %v919_v55 = vld [vmem:[%s10347_s2 + $0x130] sm:$0xff] }
 0x110   : > { %528 = vst.msk [vmem:[#allocation2 + $0x1] ss:$8 sm:$0x3] %vm7372_vm8, %v521_v57  ;;  %v537_v1 = vrot.slane %v530_v58, %v7367_v45  ;;  %v542_v38 = vcombine.high %v521_v57, %v521_v57  ;;  %569 = vst.msk [vmem:[#allocation2 + $0x11] ss:$8 sm:$0x3] %vm7372_vm8, %v566_v59  ;;  %v578_v2 = vrot.slane %v571_v60, %v7367_v45 }
 0x111   : > { %v583_v3 = vcombine.high %v566_v59, %v566_v59  ;;  %810 = vst.msk [vmem:[#allocation2 + $0x2] ss:$8 sm:$0x3] %vm7372_vm8, %v807_v61  ;;  %v819_v4 = vrot.slane %v812_v62, %v7367_v45  ;;  %v824_v7 = vcombine.high %v807_v61, %v807_v61  ;;  %851 = vst.msk [vmem:[#allocation2 + $0x12] ss:$8 sm:$0x3] %vm7372_vm8, %v848_v63 }
 0x112   : > { %v860_v5 = vrot.slane %v853_v0, %v7367_v45  ;;  %v865_v8 = vcombine.high %v848_v63, %v848_v63  ;;  %540 = vst.msk [vmem:[#allocation2 + $0x3] ss:$8 sm:$0x3] %vm7372_vm8, %v537_v1  ;;  %545 = vst.msk [vmem:[#allocation2 + $0x5] ss:$8 sm:$0x3] %vm7372_vm8, %v542_v38  ;;  %v547_v9 = vcombine.high %v537_v1, %v537_v1 }
 0x113   : > { %581 = vst.msk [vmem:[#allocation2 + $0x13] ss:$8 sm:$0x3] %vm7372_vm8, %v578_v2  ;;  %586 = vst.msk [vmem:[#allocation2 + $0x15] ss:$8 sm:$0x3] %vm7372_vm8, %v583_v3  ;;  %v588_v10 = vcombine.high %v578_v2, %v578_v2  ;;  %v829_v11 = vcombine.high %v819_v4, %v819_v4  ;;  %v6059_v52 = vpack.c.bf16 %v909_v42, %v904_v41 }
 0x114   : > { %822 = vst.msk [vmem:[#allocation2 + $0x4] ss:$8 sm:$0x3] %vm7372_vm8, %v819_v4  ;;  %827 = vst.msk [vmem:[#allocation2 + $0x6] ss:$8 sm:$0x3] %vm7372_vm8, %v824_v7  ;;  %v870_v54 = vcombine.high %v860_v5, %v860_v5  ;;  %v5995_v56 = vpack.c.bf16 %v4856_v48, %v4851_v47  ;;  %v6061_v57 = vpack.c.bf16 %v908_v50, %v903_v49 }
 0x115   : > { %863 = vst.msk [vmem:[#allocation2 + $0x14] ss:$8 sm:$0x3] %vm7372_vm8, %v860_v5  ;;  %868 = vst.msk [vmem:[#allocation2 + $0x16] ss:$8 sm:$0x3] %vm7372_vm8, %v865_v8  ;;  %v6063_v59 = vpack.c.bf16 %v919_v55, %v914_v53 }
 0x116   : > { %550 = vst.msk [vmem:[#allocation2 + $0x7] ss:$8 sm:$0x3] %vm7372_vm8, %v547_v9  ;;  %591 = vst.msk [vmem:[#allocation2 + $0x17] ss:$8 sm:$0x3] %vm7372_vm8, %v588_v10 }
 0x117   : > { %832 = vst.msk [vmem:[#allocation2 + $0x10] ss:$8 sm:$0x3] %vm7372_vm8, %v829_v11  ;;  %873 = vst.msk [vmem:[#allocation2 + $0x20] ss:$8 sm:$0x3] %vm7372_vm8, %v870_v54 }
 0x118   : > { %v4861_v58 = vld [vmem:[%s10347_s2 + $0x3e0] sm:$0xff]  ;;  %v4866_v60 = vld [vmem:[%s10347_s2 + $0x408] sm:$0xff]  ;;  %v924_v63 = vld [vmem:[%s10347_s2 + $0x158] sm:$0xff] }
 0x119   : > { %v913_v61 = vld [vmem:[%s10347_s2 + $0x100] sm:$0xff]  ;;  %v918_v62 = vld [vmem:[%s10347_s2 + $0x128] sm:$0xff]  ;;  %v5998_v1 = vpack.c.bf16 %v4866_v60, %v4861_v58  ;;  %v4871_v2 = vld [vmem:[%s10347_s2 + $0x430] sm:$0xff] }
 0x11a   : > { %v929_v0 = vld [vmem:[%s10347_s2 + $0x180] sm:$0xff]  ;;  %v6065_v38 = vpack.c.bf16 %v918_v62, %v913_v61  ;;  %v4876_v4 = vld [vmem:[%s10347_s2 + $0x458] sm:$0xff]  ;;  %v923_v7 = vld [vmem:[%s10347_s2 + $0x150] sm:$0xff] }
 0x11b   : > { %v6067_v3 = vpack.c.bf16 %v929_v0, %v924_v63  ;;  %v928_v5 = vld [vmem:[%s10347_s2 + $0x178] sm:$0xff]  ;;  %v934_v8 = vld [vmem:[%s10347_s2 + $0x1a8] sm:$0xff]  ;;  %v939_v9 = vld [vmem:[%s10347_s2 + $0x1d0] sm:$0xff]  ;;  %v6001_v10 = vpack.c.bf16 %v4876_v4, %v4871_v2 }
 0x11c   : > { %v6069_v11 = vpack.c.bf16 %v928_v5, %v923_v7  ;;  %v4881_v54 = vld [vmem:[%s10347_s2 + $0x480] sm:$0xff]  ;;  %v6071_v6 = vpack.c.bf16 %v939_v9, %v934_v8  ;;  %v4906_v41 = vld [vmem:[%s10347_s2 + $0x548] sm:$0xff]  ;;  %v4911_v50 = vld [vmem:[%s10347_s2 + $0x570] sm:$0xff] }
 0x11d   : > { %v7427_v14 = vld [vmem:[#allocation2 + $0x8] sm:$0xff]  ;;  %v7429_v15 = vld [vmem:[#allocation2] sm:$0xff]  ;;  %v963_v55 = vld [vmem:[%s10347_s2 + $0x290] sm:$0xff] }
 0x11e   : > { %v7434_v17 = vld [vmem:[#allocation2 + $0x18] sm:$0xff]  ;;  %v1071_v18 = vrot.slane %v7427_v14, 1  ;;  %v7437_v19 = vld [vmem:[#allocation2 + $0x10] sm:$0xff]  ;;  %v1068_v20 = vrot.slane %v7429_v15, 1  ;;  %v7440_v21 = vld [vmem:[#allocation2 + $0x28] sm:$0x3] }
 0x11f   : > { %v1072_v22 = vrot.slane %v7434_v17, 1  ;;  %v1069_v23 = vrot.slane %v7437_v19, 1  ;;  %v7450_v26 = vld [vmem:[#allocation2 + $0x20] sm:$0x3]  ;;  %v1076_v31 = vrot.slane %v7440_v21, 1  ;;  %v887_v58 = vld [vmem:[%s10347_s2 + $0x30] sm:$0xff] }
 0x120   : > { %v1074_v40 = vrot.slane %v7450_v26, 1  ;;  %v953_v42 = vld [vmem:[%s10347_s2 + $0x240] sm:$0xff]  ;;  %v5019_v2 = vld [vmem:[%s10347_s2 + $0x870] sm:$0xff]  ;;  %v892_v4 = vld [vmem:[%s10347_s2 + $0x58] sm:$0xff] }
 0x121   : > { %v7457_v33 = vsel %vm337_vm3, %v1071_v18, %v1072_v22  ;;  %v7460_v34 = vsel %vm337_vm3, %v1068_v20, %v1069_v23  ;;  %v7485_v43 = vsel %vm337_vm3, %v1072_v22, %v1076_v31  ;;  %v944_v18 = vld [vmem:[%s10347_s2 + $0x1f8] sm:$0xff]  ;;  %v949_v20 = vld [vmem:[%s10347_s2 + $0x220] sm:$0xff]  ;;  %v6004_v22 = vpack.c.bf16 %v4886_v12, %v4881_v54  ;;  %v5030_v5 = vld [vmem:[%s10347_s2 + $0x8c8] sm:$0xff] }
 0x122   : > { %4917 = vmatprep.mubr.msk.f32.mxu0 %vm266_vm6, %v7457_v33  ;;  %4919 = vmatprep.mubr.msk.f32.mxu1 %vm266_vm6, %v7457_v33  ;;  %v7505_v51 = vsel %vm337_vm3, %v1069_v23, %v1074_v40  ;;  %v6073_v23 = vpack.c.bf16 %v938_v16, %v933_v13  ;;  %v6075_v25 = vpack.c.bf16 %v949_v20, %v944_v18  ;;  %v948_v31 = vld [vmem:[%s10347_s2 + $0x218] sm:$0xff]  ;;  %v969_v47 = vld [vmem:[%s10347_s2 + $0x2c0] sm:$0xff]  ;;  %v5035_v8 = vld [vmem:[%s10347_s2 + $0x8f0] sm:$0xff] }
 0x123   : > { %1149 = vmatmul.mubr.f32.vlgmr.msra.gmra.mrb[2].mxu0 %v7460_v34  ;;  %1226 = vmatmul.mubr.f32.vlgmr.msra.gmra.mrb[2].mxu1 %v7460_v34  ;;  %v6079_v40 = vpack.c.bf16 %v959_v35, %v954_v32  ;;  %v5025_v60 = vld [vmem:[%s10347_s2 + $0x8a0] sm:$0xff]  ;;  %v896_v54 = vld [vmem:[%s10347_s2 + $0x78] sm:$0xff]  ;;  %v6118_v12 = vpack.c.bf16 %v5035_v8, %v5030_v5  ;;  %v5034_v16 = vld [vmem:[%s10347_s2 + $0x8e8] sm:$0xff] }
 0x124   : > { %5990 = vmatpush1.bf16.msra.mxu0 %v5989_v28  ;;  %6054 = vmatpush1.bf16.msra.mxu1 %v6053_v29  ;;  %v4896_v28 = vld [vmem:[%s10347_s2 + $0x4f8] sm:$0xff]  ;;  %v943_v29 = vld [vmem:[%s10347_s2 + $0x1f0] sm:$0xff]  ;;  %v897_v7 = vld [vmem:[%s10347_s2 + $0x80] sm:$0xff] }
 0x125   : > { %4918 = vmatprep.mubr.msk.f32.mxu0 %vm266_vm6, %v7485_v43  ;;  %4920 = vmatprep.mubr.msk.f32.mxu1 %vm266_vm6, %v7485_v43  ;;  %v6007_v36 = vpack.c.bf16 %v4896_v28, %v4891_v24  ;;  %v6077_v37 = vpack.c.bf16 %v948_v31, %v943_v29  ;;  %v5029_v13 = vld [vmem:[%s10347_s2 + $0x8c0] sm:$0xff]  ;;  %v902_v18 = vld [vmem:[%s10347_s2 + $0xa8] sm:$0xff]  ;;  %v907_v20 = vld [vmem:[%s10347_s2 + $0xd0] sm:$0xff]  ;;  %v2062_v28 = vrot.slane %v7434_v17, 2 }
 0x126   : > { %5991 = vmatprep.subr.bf16.mxu0 %v6827_v27  ;;  %6056 = vmatprep.subr.bf16.mxu1 %v6055_v39  ;;  %v4901_v39 = vld [vmem:[%s10347_s2 + $0x520] sm:$0xff]  ;;  %v6120_v29 = vpack.c.bf16 %v5034_v16, %v5029_v13  ;;  %v906_v32 = vld [vmem:[%s10347_s2 + $0xc8] sm:$0xff]  ;;  %v5039_v35 = vld [vmem:[%s10347_s2 + $0x910] sm:$0xff] }
 0x127   : > { %1155 = vmatmul.mubr.f32.gmra.mrb[4].mxu0 %v7505_v51  ;;  %1232 = vmatmul.mubr.f32.gmra.mrb[4].mxu1 %v7505_v51  ;;  %v6010_v48 = vpack.c.bf16 %v4906_v41, %v4901_v39  ;;  %v901_v31 = vld [vmem:[%s10347_s2 + $0xa0] sm:$0xff]  ;;  %v5044_v39 = vld [vmem:[%s10347_s2 + $0x938] sm:$0xff]  ;;  %v5070_v5 = vld [vmem:[%s10347_s2 + $0xa08] sm:$0xff] }
 0x128   : > { %5993 = vmatpush1.bf16.msra.mxu0 %v5992_v44  ;;  %6058 = vmatpush1.bf16.msra.mxu1 %v6057_v46  ;;  %v958_v44 = vld [vmem:[%s10347_s2 + $0x268] sm:$0xff]  ;;  %v964_v46 = vld [vmem:[%s10347_s2 + $0x298] sm:$0xff]  ;;  %v917_v41 = vld [vmem:[%s10347_s2 + $0x120] sm:$0xff] }
 0x129   : > { %4921 = vmatprep.mubr.msk.f32.mxu0 %vm266_vm6, %v7457_v33  ;;  %4925 = vmatprep.mubr.msk.f32.mxu1 %vm266_vm6, %v7427_v14  ;;  %v6081_v49 = vpack.c.bf16 %v958_v44, %v953_v42  ;;  %v6083_v53 = vpack.c.bf16 %v969_v47, %v964_v46  ;;  %v5050_v42 = vld [vmem:[%s10347_s2 + $0x968] sm:$0xff]  ;;  %v5055_v44 = vld [vmem:[%s10347_s2 + $0x990] sm:$0xff]  ;;  %v6025_v47 = vpack.c.bf16 %v906_v32, %v901_v31  ;;  %v941_v31 = vld [vmem:[%s10347_s2 + $0x1e0] sm:$0xff] }
 0x12a   : > { %5994 = vmatprep.subr.bf16.mxu0 %v6827_v27  ;;  %6060 = vmatprep.subr.bf16.mxu1 %v6059_v52  ;;  %v4916_v52 = vld [vmem:[%s10347_s2 + $0x598] sm:$0xff]  ;;  %v5075_v8 = vld [vmem:[%s10347_s2 + $0xa30] sm:$0xff]  ;;  %v5074_v16 = vld [vmem:[%s10347_s2 + $0xa28] sm:$0xff] }
 0x12b   : > { %v6013_v61 = vpack.c.bf16 %v4916_v52, %v4911_v50  ;;  %v911_v50 = vld [vmem:[%s10347_s2 + $0xf0] sm:$0xff]  ;;  %v916_v52 = vld [vmem:[%s10347_s2 + $0x118] sm:$0xff]  ;;  %v6134_v13 = vpack.c.bf16 %v5075_v8, %v5070_v5  ;;  %v946_v32 = vld [vmem:[%s10347_s2 + $0x208] sm:$0xff] }
 0x12c   : > { %5996 = vmatpush1.bf16.msra.mxu0 %v5995_v56  ;;  %6062 = vmatpush1.bf16.msra.mxu1 %v6061_v57  ;;  %v968_v56 = vld [vmem:[%s10347_s2 + $0x2b8] sm:$0xff]  ;;  %v882_v57 = vld [vmem:[%s10347_s2 + $0x8] sm:$0xff] }
 0x12d   : > { %5997 = vmatprep.subr.bf16.mxu0 %v6827_v27  ;;  %6064 = vmatprep.subr.bf16.mxu1 %v6063_v59  ;;  %v5020_v59 = vld [vmem:[%s10347_s2 + $0x878] sm:$0xff]  ;;  %v6085_v62 = vpack.c.bf16 %v968_v56, %v963_v55  ;;  %v6015_v63 = vpack.c.bf16 %v887_v58, %v882_v57  ;;  %v6126_v55 = vpack.c.bf16 %v5055_v44, %v5050_v42  ;;  %v5054_v56 = vld [vmem:[%s10347_s2 + $0x988] sm:$0xff]  ;;  %v927_v58 = vld [vmem:[%s10347_s2 + $0x170] sm:$0xff] }
 0x12e   : > { %v6114_v0 = vpack.c.bf16 %v5025_v60, %v5020_v59  ;;  %v922_v57 = vld [vmem:[%s10347_s2 + $0x148] sm:$0xff]  ;;  %v5060_v59 = vld [vmem:[%s10347_s2 + $0x9b8] sm:$0xff]  ;;  %v5065_v60 = vld [vmem:[%s10347_s2 + $0x9e0] sm:$0xff]  ;;  %v6041_v44 = vpack.c.bf16 %v946_v32, %v941_v31 }
 0x12f   : > { %v5095_v42 = vld [vmem:[%s10347_s2 + $0xad0] sm:$0xff]  ;;  %v5036_v32 = vld [vmem:[%s10347_s2 + $0x8f8] sm:$0xff] }
 0x130   : > { %5999 = vmatpush1.bf16.msra.mxu0 %v5998_v1  ;;  %6066 = vmatpush1.bf16.msra.mxu1 %v6065_v38  ;;  %v881_v1 = vld [vmem:[%s10347_s2] sm:$0xff]  ;;  %v886_v38 = vld [vmem:[%s10347_s2 + $0x28] sm:$0xff]  ;;  %v5031_v31 = vld [vmem:[%s10347_s2 + $0x8d0] sm:$0xff] }
 0x131   : > { %6000 = vmatprep.subr.bf16.mxu0 %v6827_v27  ;;  %6068 = vmatprep.subr.bf16.mxu1 %v6067_v3  ;;  %v5024_v3 = vld [vmem:[%s10347_s2 + $0x898] sm:$0xff]  ;;  %v6017_v9 = vpack.c.bf16 %v886_v38, %v881_v1  ;;  %v926_v1 = vld [vmem:[%s10347_s2 + $0x168] sm:$0xff]  ;;  %v5059_v38 = vld [vmem:[%s10347_s2 + $0x9b0] sm:$0xff] }
 0x134   : > { %6002 = vmatpush1.bf16.msra.mxu0 %v6001_v10  ;;  %6070 = vmatpush1.bf16.msra.mxu1 %v6069_v11  ;;  %v6116_v10 = vpack.c.bf16 %v5024_v3, %v5019_v2  ;;  %v891_v11 = vld [vmem:[%s10347_s2 + $0x50] sm:$0xff]  ;;  %v6130_v2 = vpack.c.bf16 %v5065_v60, %v5060_v59  ;;  %v5064_v3 = vld [vmem:[%s10347_s2 + $0x9d8] sm:$0xff]  ;;  %v5105_v59 = vld [vmem:[%s10347_s2 + $0xb20] sm:$0xff] }
 0x135   : > { %6003 = vmatprep.subr.bf16.mxu0 %v6827_v27  ;;  %6072 = vmatprep.subr.bf16.mxu1 %v6071_v6  ;;  %v6019_v6 = vpack.c.bf16 %v897_v7, %v892_v4  ;;  %v6021_v24 = vpack.c.bf16 %v896_v54, %v891_v11  ;;  %v932_v4 = vld [vmem:[%s10347_s2 + $0x198] sm:$0xff]  ;;  %v937_v7 = vld [vmem:[%s10347_s2 + $0x1c0] sm:$0xff]  ;;  %v931_v54 = vld [vmem:[%s10347_s2 + $0x190] sm:$0xff] }
 0x136   : > { %v6035_v11 = vpack.c.bf16 %v937_v7, %v932_v4  ;;  %v5027_v4 = vld [vmem:[%s10347_s2 + $0x8b0] sm:$0xff] }
 0x138   : > { %6005 = vmatpush1.bf16.msra.mxu0 %v6004_v22  ;;  %6074 = vmatpush1.bf16.msra.mxu1 %v6073_v23  ;;  %v5040_v22 = vld [vmem:[%s10347_s2 + $0x918] sm:$0xff]  ;;  %v5045_v23 = vld [vmem:[%s10347_s2 + $0x940] sm:$0xff] }
 0x139   : > { %6006 = vmatprep.subr.bf16.mxu0 %v6827_v27  ;;  %6076 = vmatprep.subr.bf16.mxu1 %v6075_v25  ;;  %v2061_v25 = vrot.slane %v7427_v14, 2 }
 0x13b   : > { %v7727_v46 = vsel %vm627_vm4, %v2061_v25, %v2062_v28 }
 0x13c   : > { %6008 = vmatpush1.bf16.msra.mxu0 %v6007_v36  ;;  %6078 = vmatpush1.bf16.msra.mxu1 %v6077_v37  ;;  %v6023_v36 = vpack.c.bf16 %v907_v20, %v902_v18  ;;  %v6122_v37 = vpack.c.bf16 %v5045_v23, %v5040_v22  ;;  %v942_v18 = vld [vmem:[%s10347_s2 + $0x1e8] sm:$0xff]  ;;  %v947_v20 = vld [vmem:[%s10347_s2 + $0x210] sm:$0xff]  ;;  %v5080_v22 = vld [vmem:[%s10347_s2 + $0xa58] sm:$0xff] }
 0x13d   : > { %6009 = vmatprep.subr.bf16.mxu0 %v6827_v27  ;;  %6080 = vmatprep.subr.bf16.mxu1 %v6079_v40  ;;  %v912_v40 = vld [vmem:[%s10347_s2 + $0xf8] sm:$0xff]  ;;  %v5085_v23 = vld [vmem:[%s10347_s2 + $0xa80] sm:$0xff] }
 0x140   : > { %6011 = vmatpush1.bf16.msra.mxu0 %v6010_v48  ;;  %6082 = vmatpush1.bf16.msra.mxu1 %v6081_v49  ;;  %v6124_v48 = vpack.c.bf16 %v5044_v39, %v5039_v35  ;;  %v6027_v49 = vpack.c.bf16 %v917_v41, %v912_v40  ;;  %v5079_v35 = vld [vmem:[%s10347_s2 + $0xa50] sm:$0xff]  ;;  %v952_v39 = vld [vmem:[%s10347_s2 + $0x238] sm:$0xff]  ;;  %v957_v40 = vld [vmem:[%s10347_s2 + $0x260] sm:$0xff] }
 0x141   : > { %6012 = vmatprep.subr.bf16.mxu0 %v6827_v27  ;;  %6084 = vmatprep.subr.bf16.mxu1 %v6083_v53  ;;  %v5049_v53 = vld [vmem:[%s10347_s2 + $0x960] sm:$0xff]  ;;  %v5090_v41 = vld [vmem:[%s10347_s2 + $0xaa8] sm:$0xff] }
 0x144   : > { %6014 = vmatpush1.bf16.msra.mxu0 %v6013_v61  ;;  %6086 = vmatpush1.bf16.msra.mxu1 %v6085_v62  ;;  %v6029_v61 = vpack.c.bf16 %v916_v52, %v911_v50  ;;  %v6128_v62 = vpack.c.bf16 %v5054_v56, %v5049_v53  ;;  %v956_v50 = vld [vmem:[%s10347_s2 + $0x258] sm:$0xff]  ;;  %v5089_v52 = vld [vmem:[%s10347_s2 + $0xaa0] sm:$0xff]  ;;  %v6142_v53 = vpack.c.bf16 %v5095_v42, %v5090_v41  ;;  %v962_v56 = vld [vmem:[%s10347_s2 + $0x288] sm:$0xff] }
 0x145   : > { %6016 = vmatprep.subr.bf16.mxu0 %v6015_v63  ;;  %6115 = vmatprep.subr.bf16.mxu1 %v6114_v0  ;;  %v6031_v63 = vpack.c.bf16 %v927_v58, %v922_v57  ;;  %v921_v0 = vld [vmem:[%s10347_s2 + $0x140] sm:$0xff]  ;;  %v967_v57 = vld [vmem:[%s10347_s2 + $0x2b0] sm:$0xff]  ;;  %v5100_v58 = vld [vmem:[%s10347_s2 + $0xaf8] sm:$0xff] }
 0x147   : > { %1303 = vmatmul.mubr.f32.vlgmr.msra.gmra.mrb[6].mxu0 %v7460_v34  ;;  %1459 = vmatmul.mubr.f32.vlgmr.msra.gmra.mrb[2].mxu1 %v7429_v15 }
 0x148   : > { %4922 = vmatprep.mubr.msk.f32.mxu0 %vm266_vm6, %v7485_v43  ;;  %6018 = vmatpush1.bf16.msra.mxu0 %v6017_v9  ;;  %v6033_v9 = vpack.c.bf16 %v926_v1, %v921_v0  ;;  %v966_v0 = vld [vmem:[%s10347_s2 + $0x2a8] sm:$0xff]  ;;  %v6146_v1 = vpack.c.bf16 %v5105_v59, %v5100_v58  ;;  %v5067_v59 = vld [vmem:[%s10347_s2 + $0x9f0] sm:$0xff] }
 0x149   : > { %4926 = vmatprep.mubr.msk.f32.mxu1 %vm266_vm6, %v7434_v17  ;;  %6117 = vmatpush1.bf16.msra.mxu1 %v6116_v10  ;;  %v6132_v10 = vpack.c.bf16 %v5064_v3, %v5059_v38  ;;  %v5099_v38 = vld [vmem:[%s10347_s2 + $0xaf0] sm:$0xff]  ;;  %v5022_v3 = vld [vmem:[%s10347_s2 + $0x888] sm:$0xff] }
 0x14a   : > { %6020 = vmatprep.subr.bf16.mxu0 %v6019_v6  ;;  %6119 = vmatprep.subr.bf16.mxu1 %v6118_v12  ;;  %v936_v6 = vld [vmem:[%s10347_s2 + $0x1b8] sm:$0xff]  ;;  %v5069_v12 = vld [vmem:[%s10347_s2 + $0xa00] sm:$0xff]  ;;  %v6150_v8 = vpack.c.bf16 %v5027_v4, %v5022_v3  ;;  %v5062_v58 = vld [vmem:[%s10347_s2 + $0x9c8] sm:$0xff] }
 0x14b   : > { %1308 = vmatmul.mubr.f32.gmra.mrb[8].mxu0 %v7505_v51  ;;  %1465 = vmatmul.mubr.f32.gmra.mrb[4].mxu1 %v7437_v19  ;;  %v6136_v25 = vpack.c.bf16 %v5074_v16, %v5069_v12  ;;  %v5026_v12 = vld [vmem:[%s10347_s2 + $0x8a8] sm:$0xff]  ;;  %v5032_v16 = vld [vmem:[%s10347_s2 + $0x8d8] sm:$0xff]  ;;  %v5077_v3 = vld [vmem:[%s10347_s2 + $0xa40] sm:$0xff] }
 0x14c   : > { %6022 = vmatpush1.bf16.msra.mxu0 %v6021_v24  ;;  %4923 = vmatprep.mubr.msk.f32.mxu0 %vm266_vm6, %v7427_v14  ;;  %v6037_v24 = vpack.c.bf16 %v936_v6, %v931_v54  ;;  %v2059_v54 = vrot.slane %v7437_v19, 2  ;;  %v5021_v6 = vld [vmem:[%s10347_s2 + $0x880] sm:$0xff] }
 0x14d   : > { %6121 = vmatpush1.bf16.msra.mxu1 %v6120_v29  ;;  %5109 = vmatprep.mubr.msk.f32.mxu1 %vm266_vm6, %v7727_v46  ;;  %v6039_v29 = vpack.c.bf16 %v947_v20, %v942_v18  ;;  %v5037_v18 = vld [vmem:[%s10347_s2 + $0x900] sm:$0xff] }
 0x14e   : > { %6024 = vmatprep.subr.bf16.mxu0 %v6023_v36  ;;  %6123 = vmatprep.subr.bf16.mxu1 %v6122_v37  ;;  %v6138_v36 = vpack.c.bf16 %v5085_v23, %v5080_v22  ;;  %v5084_v37 = vld [vmem:[%s10347_s2 + $0xa78] sm:$0xff]  ;;  %v6152_v22 = vpack.c.bf16 %v5026_v12, %v5021_v6  ;;  %v895_v23 = vld [vmem:[%s10347_s2 + $0x70] sm:$0xff] }
 0x14f   : > { %v5087_v6 = vld [vmem:[%s10347_s2 + $0xa90] sm:$0xff] }
 0x150   : > { %6026 = vmatpush1.bf16.msra.mxu0 %v6025_v47  ;;  %v6140_v47 = vpack.c.bf16 %v5084_v37, %v5079_v35 }
 0x151   : > { %6125 = vmatpush1.bf16.msra.mxu1 %v6124_v48  ;;  %6028 = vmatprep.subr.bf16.mxu0 %v6027_v49  ;;  %v6043_v48 = vpack.c.bf16 %v957_v40, %v952_v39  ;;  %v951_v49 = vld [vmem:[%s10347_s2 + $0x230] sm:$0xff]  ;;  %v6156_v39 = vpack.c.bf16 %v5036_v32, %v5031_v31  ;;  %v910_v40 = vld [vmem:[%s10347_s2 + $0xe8] sm:$0xff] }
 0x152   : > { %6127 = vmatprep.subr.bf16.mxu1 %v6126_v55  ;;  %v5094_v55 = vld [vmem:[%s10347_s2 + $0xac8] sm:$0xff]  ;;  %v6045_v60 = vpack.c.bf16 %v956_v50, %v951_v49  ;;  %v5057_v49 = vld [vmem:[%s10347_s2 + $0x9a0] sm:$0xff]  ;;  %v955_v32 = vld [vmem:[%s10347_s2 + $0x250] sm:$0xff] }
 0x154   : > { %6030 = vmatpush1.bf16.msra.mxu0 %v6029_v61  ;;  %v6144_v61 = vpack.c.bf16 %v5094_v55, %v5089_v52 }
 0x155   : > { %6129 = vmatpush1.bf16.msra.mxu1 %v6128_v62  ;;  %6032 = vmatprep.subr.bf16.mxu0 %v6031_v63  ;;  %v6047_v62 = vpack.c.bf16 %v967_v57, %v962_v56  ;;  %v961_v63 = vld [vmem:[%s10347_s2 + $0x280] sm:$0xff]  ;;  %v5051_v56 = vld [vmem:[%s10347_s2 + $0x970] sm:$0xff]  ;;  %v5056_v57 = vld [vmem:[%s10347_s2 + $0x998] sm:$0xff] }
 0x156   : > { %6131 = vmatprep.subr.bf16.mxu1 %v6130_v2  ;;  %v5104_v2 = vld [vmem:[%s10347_s2 + $0xb18] sm:$0xff]  ;;  %v6049_v7 = vpack.c.bf16 %v966_v0, %v961_v63  ;;  %v930_v63 = vld [vmem:[%s10347_s2 + $0x188] sm:$0xff]  ;;  %v6166_v0 = vpack.c.bf16 %v5067_v59, %v5062_v58  ;;  %v5023_v58 = vld [vmem:[%s10347_s2 + $0x890] sm:$0xff] }
 0x157   : > { %v6148_v5 = vpack.c.bf16 %v5104_v2, %v5099_v38  ;;  %v5066_v38 = vld [vmem:[%s10347_s2 + $0x9e8] sm:$0xff]  ;;  %v5072_v2 = vld [vmem:[%s10347_s2 + $0xa18] sm:$0xff] }
 0x158   : > { %6034 = vmatpush1.bf16.msra.mxu0 %v6033_v9  ;;  %v885_v9 = vld [vmem:[%s10347_s2 + $0x20] sm:$0xff]  ;;  %v5028_v59 = vld [vmem:[%s10347_s2 + $0x8b8] sm:$0xff] }
 0x159   : > { %6133 = vmatpush1.bf16.msra.mxu1 %v6132_v10  ;;  %6036 = vmatprep.subr.bf16.mxu0 %v6035_v11  ;;  %v890_v10 = vld [vmem:[%s10347_s2 + $0x48] sm:$0xff]  ;;  %v2058_v11 = vrot.slane %v7429_v15, 2 }
 0x15a   : > { %6135 = vmatprep.subr.bf16.mxu1 %v6134_v13  ;;  %v2066_v13 = vrot.slane %v7440_v21, 2  ;;  %v6088_v20 = vpack.c.bf16 %v890_v10, %v885_v9  ;;  %v900_v21 = vld [vmem:[%s10347_s2 + $0x98] sm:$0xff]  ;;  %v6170_v9 = vpack.c.bf16 %v5077_v3, %v5072_v2  ;;  %v5071_v10 = vld [vmem:[%s10347_s2 + $0xa10] sm:$0xff]  ;;  %v5038_v2 = vld [vmem:[%s10347_s2 + $0x908] sm:$0xff] }
 0x15b   : > { %v6091_v37 = vpack.c.bf16 %v900_v21, %v895_v23  ;;  %v5086_v23 = vld [vmem:[%s10347_s2 + $0xa88] sm:$0xff]  ;;  %v5092_v21 = vld [vmem:[%s10347_s2 + $0xab8] sm:$0xff] }
 0x15c   : > { %6038 = vmatpush1.bf16.msra.mxu0 %v6037_v24  ;;  %v7899_v24 = vsel %vm627_vm4, %v2058_v11, %v2059_v54  ;;  %v7914_v35 = vsel %vm627_vm4, %v2062_v28, %v2066_v13  ;;  %v905_v28 = vld [vmem:[%s10347_s2 + $0xc0] sm:$0xff]  ;;  %v5076_v11 = vld [vmem:[%s10347_s2 + $0xa38] sm:$0xff] }
 0x15d   : > { %6137 = vmatpush1.bf16.msra.mxu1 %v6136_v25  ;;  %6040 = vmatprep.subr.bf16.mxu0 %v6039_v29  ;;  %v2064_v25 = vrot.slane %v7450_v26, 2  ;;  %v6154_v29 = vpack.c.bf16 %v5037_v18, %v5032_v16  ;;  %v5042_v26 = vld [vmem:[%s10347_s2 + $0x928] sm:$0xff]  ;;  %v6094_v50 = vpack.c.bf16 %v910_v40, %v905_v28  ;;  %v6172_v13 = vpack.c.bf16 %v5076_v11, %v5071_v10  ;;  %v945_v16 = vld [vmem:[%s10347_s2 + $0x200] sm:$0xff]  ;;  %v5107_v40 = vld [vmem:[%s10347_s2 + $0xb30] sm:$0xff] }
 0x15e   : > { %6139 = vmatprep.subr.bf16.mxu1 %v6138_v36  ;;  %v5047_v36 = vld [vmem:[%s10347_s2 + $0x950] sm:$0xff]  ;;  %v950_v18 = vld [vmem:[%s10347_s2 + $0x228] sm:$0xff]  ;;  %v5048_v10 = vld [vmem:[%s10347_s2 + $0x958] sm:$0xff] }
 0x15f   : > { %v7933_v41 = vsel %vm627_vm4, %v2059_v54, %v2064_v25  ;;  %v6158_v42 = vpack.c.bf16 %v5047_v36, %v5042_v26  ;;  %v5082_v54 = vld [vmem:[%s10347_s2 + $0xa68] sm:$0xff]  ;;  %v5097_v25 = vld [vmem:[%s10347_s2 + $0xae0] sm:$0xff]  ;;  %v960_v26 = vld [vmem:[%s10347_s2 + $0x278] sm:$0xff] }
 0x160   : > { %6042 = vmatpush1.bf16.msra.mxu0 %v6041_v44  ;;  %v5041_v44 = vld [vmem:[%s10347_s2 + $0x920] sm:$0xff]  ;;  %v6178_v36 = vpack.c.bf16 %v5097_v25, %v5092_v21  ;;  %v5102_v28 = vld [vmem:[%s10347_s2 + $0xb08] sm:$0xff]  ;;  %v4975_v25 = vld [vmem:[%s10347_s2 + $0x710] sm:$0xff] }
 0x161   : > { %6141 = vmatpush1.bf16.msra.mxu1 %v6140_v47  ;;  %6044 = vmatprep.subr.bf16.mxu0 %v6043_v48  ;;  %v5046_v47 = vld [vmem:[%s10347_s2 + $0x948] sm:$0xff]  ;;  %v5052_v48 = vld [vmem:[%s10347_s2 + $0x978] sm:$0xff] }
 0x162   : > { %6143 = vmatprep.subr.bf16.mxu1 %v6142_v53  ;;  %v6160_v52 = vpack.c.bf16 %v5046_v47, %v5041_v44  ;;  %v920_v53 = vld [vmem:[%s10347_s2 + $0x138] sm:$0xff]  ;;  %v6162_v55 = vpack.c.bf16 %v5057_v49, %v5052_v48  ;;  %v965_v47 = vld [vmem:[%s10347_s2 + $0x2a0] sm:$0xff]  ;;  %v970_v48 = vld [vmem:[%s10347_s2 + $0x2c8] sm:$0xff]  ;;  %v6182_v49 = vpack.c.bf16 %v5107_v40, %v5102_v28 }
 0x163   : > { %v4970_v21 = vld [vmem:[%s10347_s2 + $0x6e8] sm:$0xff]  ;;  %v4980_v28 = vld [vmem:[%s10347_s2 + $0x738] sm:$0xff]  ;;  %v4985_v40 = vld [vmem:[%s10347_s2 + $0x760] sm:$0xff] }
 0x164   : > { %6046 = vmatpush1.bf16.msra.mxu0 %v6045_v60 }
 0x165   : > { %6145 = vmatpush1.bf16.msra.mxu1 %v6144_v61  ;;  %6048 = vmatprep.subr.bf16.mxu0 %v6047_v62  ;;  %v6164_v61 = vpack.c.bf16 %v5056_v57, %v5051_v56  ;;  %v925_v62 = vld [vmem:[%s10347_s2 + $0x160] sm:$0xff] }
 0x166   : > { %6147 = vmatprep.subr.bf16.mxu1 %v6146_v1  ;;  %v5061_v1 = vld [vmem:[%s10347_s2 + $0x9c0] sm:$0xff]  ;;  %v6100_v4 = vpack.c.bf16 %v930_v63, %v925_v62  ;;  %v4940_v62 = vld [vmem:[%s10347_s2 + $0x5f8] sm:$0xff] }
 0x167   : > { %v4945_v63 = vld [vmem:[%s10347_s2 + $0x620] sm:$0xff] }
 0x168   : > { %6050 = vmatpush1.bf16.msra.mxu0 %v6049_v7  ;;  %v6168_v7 = vpack.c.bf16 %v5066_v38, %v5061_v1  ;;  %v5033_v38 = vld [vmem:[%s10347_s2 + $0x8e0] sm:$0xff]  ;;  %v6217_v3 = vpack.c.bf16 %v4945_v63, %v4940_v62  ;;  %v5000_v62 = vld [vmem:[%s10347_s2 + $0x7d8] sm:$0xff] }
 0x169   : > { %6149 = vmatpush1.bf16.msra.mxu1 %v6148_v5  ;;  %6087 = vmatprep.subr.bf16.mxu0 %v6827_v27  ;;  %v935_v5 = vld [vmem:[%s10347_s2 + $0x1b0] sm:$0xff]  ;;  %v5005_v63 = vld [vmem:[%s10347_s2 + $0x800] sm:$0xff] }
 0x16a   : > { %6151 = vmatprep.subr.bf16.mxu1 %v6150_v8  ;;  %v940_v8 = vld [vmem:[%s10347_s2 + $0x1d8] sm:$0xff] }
 0x16b   : > { %1382 = vmatmul.mubr.f32.vlgmr.msra.gmra.mrb[2].mxu0 %v7429_v15  ;;  %v6103_v12 = vpack.c.bf16 %v940_v8, %v935_v5  ;;  %v4950_v5 = vld [vmem:[%s10347_s2 + $0x648] sm:$0xff]  ;;  %v6190_v8 = vpack.c.bf16 %v5038_v2, %v5033_v38  ;;  %v5093_v38 = vld [vmem:[%s10347_s2 + $0xac0] sm:$0xff] }
 0x16c   : > { %2139 = vmatmul.mubr.f32.vlgmr.msra.gmra.mrb[6].mxu1 %v7899_v24  ;;  %4924 = vmatprep.mubr.msk.f32.mxu0 %vm266_vm6, %v7434_v17  ;;  %v5098_v2 = vld [vmem:[%s10347_s2 + $0xae8] sm:$0xff] }
 0x16d   : > { %6089 = vmatpush1.bf16.msra.mxu0 %v6088_v20  ;;  %5110 = vmatprep.mubr.msk.f32.mxu1 %vm266_vm6, %v7914_v35  ;;  %v6174_v20 = vpack.c.bf16 %v5087_v6, %v5082_v54  ;;  %v4949_v54 = vld [vmem:[%s10347_s2 + $0x640] sm:$0xff]  ;;  %v4954_v6 = vld [vmem:[%s10347_s2 + $0x668] sm:$0xff] }
 0x16e   : > { %6153 = vmatpush1.bf16.msra.mxu1 %v6152_v22  ;;  %6090 = vmatprep.subr.bf16.mxu0 %v6827_v27  ;;  %v5081_v22 = vld [vmem:[%s10347_s2 + $0xa60] sm:$0xff] }
 0x16f   : > { %1388 = vmatmul.mubr.f32.gmra.mrb[4].mxu0 %v7437_v19  ;;  %6155 = vmatprep.subr.bf16.mxu1 %v6154_v29  ;;  %v6106_v29 = vpack.c.bf16 %v950_v18, %v945_v16  ;;  %v6176_v31 = vpack.c.bf16 %v5086_v23, %v5081_v22  ;;  %v6223_v16 = vpack.c.bf16 %v4954_v6, %v4949_v54  ;;  %v5058_v18 = vld [vmem:[%s10347_s2 + $0x9a8] sm:$0xff]  ;;  %v4959_v22 = vld [vmem:[%s10347_s2 + $0x690] sm:$0xff]  ;;  %v4964_v23 = vld [vmem:[%s10347_s2 + $0x6b8] sm:$0xff] }
 0x170   : > { %2145 = vmatmul.mubr.f32.gmra.mrb[8].mxu1 %v7933_v41  ;;  %4927 = vmatprep.mubr.msk.f32.mxu0 %vm266_vm6, %v7427_v14  ;;  %v915_v14 = vld [vmem:[%s10347_s2 + $0x110] sm:$0xff]  ;;  %v5009_v54 = vld [vmem:[%s10347_s2 + $0x820] sm:$0xff]  ;;  %v5014_v6 = vld [vmem:[%s10347_s2 + $0x848] sm:$0xff] }
 0x171   : > { %6092 = vmatpush1.bf16.msra.mxu0 %v6091_v37  ;;  %5111 = vmatprep.mubr.msk.f32.mxu1 %vm266_vm6, %v7727_v46  ;;  %v6097_v60 = vpack.c.bf16 %v920_v53, %v915_v14  ;;  %v5091_v37 = vld [vmem:[%s10347_s2 + $0xab0] sm:$0xff]  ;;  %v4930_v14 = vld [vmem:[%s10347_s2 + $0x5a8] sm:$0xff] }
 0x172   : > { %6157 = vmatpush1.bf16.msra.mxu1 %v6156_v39  ;;  %6093 = vmatprep.subr.bf16.mxu0 %v6827_v27  ;;  %v5096_v39 = vld [vmem:[%s10347_s2 + $0xad8] sm:$0xff]  ;;  %v4935_v53 = vld [vmem:[%s10347_s2 + $0x5d0] sm:$0xff] }
 0x173   : > { %6159 = vmatprep.subr.bf16.mxu1 %v6158_v42  ;;  %v6109_v42 = vpack.c.bf16 %v960_v26, %v955_v32  ;;  %v6180_v44 = vpack.c.bf16 %v5096_v39, %v5091_v37  ;;  %v6213_v57 = vpack.c.bf16 %v4935_v53, %v4930_v14  ;;  %v5063_v32 = vld [vmem:[%s10347_s2 + $0x9d0] sm:$0xff]  ;;  %v5068_v26 = vld [vmem:[%s10347_s2 + $0x9f8] sm:$0xff]  ;;  %v4969_v37 = vld [vmem:[%s10347_s2 + $0x6e0] sm:$0xff] }
 0x174   : > { %v4974_v39 = vld [vmem:[%s10347_s2 + $0x708] sm:$0xff]  ;;  %v4995_v53 = vld [vmem:[%s10347_s2 + $0x7b0] sm:$0xff] }
 0x175   : > { %6095 = vmatpush1.bf16.msra.mxu0 %v6094_v50  ;;  %v5101_v50 = vld [vmem:[%s10347_s2 + $0xb00] sm:$0xff]  ;;  %v4990_v14 = vld [vmem:[%s10347_s2 + $0x788] sm:$0xff] }
 0x176   : > { %6161 = vmatpush1.bf16.msra.mxu1 %v6160_v52  ;;  %6096 = vmatprep.subr.bf16.mxu0 %v6827_v27  ;;  %v5106_v52 = vld [vmem:[%s10347_s2 + $0xb28] sm:$0xff] }
 0x177   : > { %6163 = vmatprep.subr.bf16.mxu1 %v6162_v55  ;;  %v6112_v55 = vpack.c.bf16 %v970_v48, %v965_v47  ;;  %v6184_v56 = vpack.c.bf16 %v5106_v52, %v5101_v50  ;;  %v5073_v47 = vld [vmem:[%s10347_s2 + $0xa20] sm:$0xff]  ;;  %v5078_v48 = vld [vmem:[%s10347_s2 + $0xa48] sm:$0xff]  ;;  %v4979_v50 = vld [vmem:[%s10347_s2 + $0x730] sm:$0xff] }
 0x178   : > { %v4984_v52 = vld [vmem:[%s10347_s2 + $0x758] sm:$0xff] }
 0x179   : > { %6098 = vmatpush1.bf16.msra.mxu0 %v6097_v60  ;;  %v4929_v60 = vld [vmem:[%s10347_s2 + $0x5a0] sm:$0xff] }
 0x17a   : > { %6165 = vmatpush1.bf16.msra.mxu1 %v6164_v61  ;;  %6099 = vmatprep.subr.bf16.mxu0 %v6827_v27  ;;  %v4934_v61 = vld [vmem:[%s10347_s2 + $0x5c8] sm:$0xff] }
 0x17b   : > { %6167 = vmatprep.subr.bf16.mxu1 %v6166_v0  ;;  %v6187_v0 = vpack.c.bf16 %v5028_v59, %v5023_v58  ;;  %v6215_v1 = vpack.c.bf16 %v4934_v61, %v4929_v60  ;;  %v5088_v58 = vld [vmem:[%s10347_s2 + $0xa98] sm:$0xff]  ;;  %v6237_v59 = vpack.c.bf16 %v4995_v53, %v4990_v14  ;;  %v4989_v60 = vld [vmem:[%s10347_s2 + $0x780] sm:$0xff]  ;;  %v4994_v61 = vld [vmem:[%s10347_s2 + $0x7a8] sm:$0xff] }
 0x17d   : > { %6101 = vmatpush1.bf16.msra.mxu0 %v6100_v4  ;;  %v4939_v4 = vld [vmem:[%s10347_s2 + $0x5f0] sm:$0xff] }
 0x17e   : > { %6169 = vmatpush1.bf16.msra.mxu1 %v6168_v7  ;;  %6102 = vmatprep.subr.bf16.mxu0 %v6827_v27  ;;  %v4944_v7 = vld [vmem:[%s10347_s2 + $0x618] sm:$0xff] }
 0x17f   : > { %6171 = vmatprep.subr.bf16.mxu1 %v6170_v9  ;;  %v6219_v9 = vpack.c.bf16 %v4944_v7, %v4939_v4  ;;  %v4999_v4 = vld [vmem:[%s10347_s2 + $0x7d0] sm:$0xff]  ;;  %v5004_v7 = vld [vmem:[%s10347_s2 + $0x7f8] sm:$0xff] }
 0x181   : > { %6104 = vmatpush1.bf16.msra.mxu0 %v6103_v12  ;;  %v4960_v12 = vld [vmem:[%s10347_s2 + $0x698] sm:$0xff] }
 0x182   : > { %6173 = vmatpush1.bf16.msra.mxu1 %v6172_v13  ;;  %6105 = vmatprep.subr.bf16.mxu0 %v6827_v27 }
 0x183   : > { %6175 = vmatprep.subr.bf16.mxu1 %v6174_v20 }
 0x185   : > { %6107 = vmatpush1.bf16.msra.mxu0 %v6106_v29 }
 0x186   : > { %6177 = vmatpush1.bf16.msra.mxu1 %v6176_v31  ;;  %6108 = vmatprep.subr.bf16.mxu0 %v6827_v27  ;;  %v6227_v31 = vpack.c.bf16 %v4964_v23, %v4959_v22  ;;  %v4933_v22 = vld [vmem:[%s10347_s2 + $0x5c0] sm:$0xff]  ;;  %v4938_v23 = vld [vmem:[%s10347_s2 + $0x5e8] sm:$0xff] }
 0x187   : > { %6179 = vmatprep.subr.bf16.mxu1 %v6178_v36  ;;  %v6229_v36 = vpack.c.bf16 %v4975_v25, %v4970_v21  ;;  %v4942_v21 = vld [vmem:[%s10347_s2 + $0x608] sm:$0xff]  ;;  %v4947_v25 = vld [vmem:[%s10347_s2 + $0x630] sm:$0xff] }
 0x189   : > { %6110 = vmatpush1.bf16.msra.mxu0 %v6109_v42  ;;  %v6199_v42 = vpack.c.bf16 %v5068_v26, %v5063_v32  ;;  %v6253_v32 = vpack.c.bf16 %v4947_v25, %v4942_v21  ;;  %v4941_v26 = vld [vmem:[%s10347_s2 + $0x600] sm:$0xff] }
 0x18a   : > { %6181 = vmatpush1.bf16.msra.mxu1 %v6180_v44  ;;  %6111 = vmatprep.subr.bf16.mxu0 %v6827_v27  ;;  %v6231_v44 = vpack.c.bf16 %v4974_v39, %v4969_v37  ;;  %v4943_v37 = vld [vmem:[%s10347_s2 + $0x610] sm:$0xff]  ;;  %v4948_v39 = vld [vmem:[%s10347_s2 + $0x638] sm:$0xff]  ;;  %v5001_v25 = vld [vmem:[%s10347_s2 + $0x7e0] sm:$0xff] }
 0x18b   : > { %6183 = vmatprep.subr.bf16.mxu1 %v6182_v49  ;;  %v6233_v49 = vpack.c.bf16 %v4985_v40, %v4980_v28  ;;  %v4952_v28 = vld [vmem:[%s10347_s2 + $0x658] sm:$0xff]  ;;  %v4957_v40 = vld [vmem:[%s10347_s2 + $0x680] sm:$0xff] }
 0x18d   : > { %6113 = vmatpush1.bf16.msra.mxu0 %v6112_v55  ;;  %v6202_v55 = vpack.c.bf16 %v5078_v48, %v5073_v47  ;;  %v4951_v47 = vld [vmem:[%s10347_s2 + $0x650] sm:$0xff]  ;;  %v4956_v48 = vld [vmem:[%s10347_s2 + $0x678] sm:$0xff] }
 0x18e   : > { %6185 = vmatpush1.bf16.msra.mxu1 %v6184_v56  ;;  %6186 = vmatprep.subr.bf16.mxu0 %v6827_v27  ;;  %v6235_v56 = vpack.c.bf16 %v4984_v52, %v4979_v50  ;;  %v4962_v50 = vld [vmem:[%s10347_s2 + $0x6a8] sm:$0xff]  ;;  %v4967_v52 = vld [vmem:[%s10347_s2 + $0x6d0] sm:$0xff] }
 0x18f   : > { %6214 = vmatprep.subr.bf16.mxu1 %v6213_v57  ;;  %v5083_v57 = vld [vmem:[%s10347_s2 + $0xa70] sm:$0xff]  ;;  %v6261_v53 = vpack.c.bf16 %v4967_v52, %v4962_v50  ;;  %v5154_v52 = vld [vmem:[%s10348_s3 + $0x328] sm:$0xff] }
 0x190   : > { %1536 = vmatmul.mubr.f32.vlgmr.msra.gmra.mrb[6].mxu0 %v7429_v15  ;;  %v4955_v15 = vld [vmem:[%s10347_s2 + $0x670] sm:$0xff] }
 0x191   : > { %2216 = vmatmul.mubr.f32.vlgmr.msra.gmra.mrb[10].mxu1 %v7899_v24  ;;  %4928 = vmatprep.mubr.msk.f32.mxu0 %vm266_vm6, %v7434_v17  ;;  %v5043_v17 = vld [vmem:[%s10347_s2 + $0x930] sm:$0xff]  ;;  %v6221_v11 = vpack.c.bf16 %v4955_v15, %v4950_v5  ;;  %v5010_v5 = vld [vmem:[%s10347_s2 + $0x828] sm:$0xff] }
 0x192   : > { %5112 = vmatprep.mubr.msk.f32.mxu1 %vm266_vm6, %v7914_v35  ;;  %6188 = vmatpush1.bf16.msra.mxu0 %v6187_v0  ;;  %v6193_v13 = vpack.c.bf16 %v5048_v10, %v5043_v17  ;;  %v6205_v0 = vpack.c.bf16 %v5088_v58, %v5083_v57  ;;  %v5015_v15 = vld [vmem:[%s10347_s2 + $0x850] sm:$0xff]  ;;  %v5108_v10 = vld [vmem:[%s10347_s2 + $0xb38] sm:$0xff] }
 0x193   : > { %6216 = vmatpush1.bf16.msra.mxu1 %v6215_v1  ;;  %6189 = vmatprep.subr.bf16.mxu0 %v6827_v27  ;;  %v6239_v1 = vpack.c.bf16 %v4994_v61, %v4989_v60  ;;  %v5103_v17 = vld [vmem:[%s10347_s2 + $0xb10] sm:$0xff]  ;;  %v4972_v58 = vld [vmem:[%s10347_s2 + $0x6f8] sm:$0xff] }
 0x194   : > { %1541 = vmatmul.mubr.f32.gmra.mrb[8].mxu0 %v7437_v19  ;;  %6218 = vmatprep.subr.bf16.mxu1 %v6217_v3  ;;  %v4965_v19 = vld [vmem:[%s10347_s2 + $0x6c0] sm:$0xff]  ;;  %v6241_v3 = vpack.c.bf16 %v5005_v63, %v5000_v62  ;;  %v4963_v57 = vld [vmem:[%s10347_s2 + $0x6b0] sm:$0xff] }
 0x195   : > { %2222 = vmatmul.mubr.f32.gmra.mrb[12].mxu1 %v7933_v41  ;;  %5113 = vmatprep.mubr.msk.f32.mxu0 %vm266_vm6, %v7727_v46  ;;  %v5053_v46 = vld [vmem:[%s10347_s2 + $0x980] sm:$0xff]  ;;  %v6225_v20 = vpack.c.bf16 %v4965_v19, %v4960_v12  ;;  %v4932_v12 = vld [vmem:[%s10347_s2 + $0x5b8] sm:$0xff]  ;;  %v4971_v63 = vld [vmem:[%s10347_s2 + $0x6f0] sm:$0xff] }
 0x196   : > { %6191 = vmatpush1.bf16.msra.mxu0 %v6190_v8  ;;  %5115 = vmatprep.mubr.msk.f32.mxu1 %vm266_vm6, %v7457_v33  ;;  %v6196_v29 = vpack.c.bf16 %v5058_v18, %v5053_v46  ;;  %v6208_v8 = vpack.c.bf16 %v5098_v2, %v5093_v38  ;;  %v4937_v19 = vld [vmem:[%s10347_s2 + $0x5e0] sm:$0xff]  ;;  %v4931_v18 = vld [vmem:[%s10347_s2 + $0x5b0] sm:$0xff]  ;;  %v4978_v38 = vld [vmem:[%s10347_s2 + $0x728] sm:$0xff] }
 0x197   : > { %6220 = vmatpush1.bf16.msra.mxu1 %v6219_v9  ;;  %6192 = vmatprep.subr.bf16.mxu0 %v6827_v27  ;;  %v6243_v9 = vpack.c.bf16 %v5004_v7, %v4999_v4  ;;  %v6249_v46 = vpack.c.bf16 %v4937_v19, %v4932_v12  ;;  %v4982_v2 = vld [vmem:[%s10347_s2 + $0x748] sm:$0xff]  ;;  %v4991_v19 = vld [vmem:[%s10347_s2 + $0x790] sm:$0xff] }
 0x198   : > { %6222 = vmatprep.subr.bf16.mxu1 %v6221_v11  ;;  %v6245_v11 = vpack.c.bf16 %v5015_v15, %v5010_v5  ;;  %v4981_v15 = vld [vmem:[%s10347_s2 + $0x740] sm:$0xff] }
 0x19a   : > { %6194 = vmatpush1.bf16.msra.mxu0 %v6193_v13  ;;  %v6211_v13 = vpack.c.bf16 %v5108_v10, %v5103_v17  ;;  %v4988_v17 = vld [vmem:[%s10347_s2 + $0x778] sm:$0xff] }
 0x19b   : > { %6224 = vmatpush1.bf16.msra.mxu1 %v6223_v16  ;;  %6195 = vmatprep.subr.bf16.mxu0 %v6827_v27  ;;  %v6247_v16 = vpack.c.bf16 %v5014_v6, %v5009_v54  ;;  %v4992_v10 = vld [vmem:[%s10347_s2 + $0x798] sm:$0xff] }
 0x19c   : > { %6226 = vmatprep.subr.bf16.mxu1 %v6225_v20  ;;  %v4936_v20 = vld [vmem:[%s10347_s2 + $0x5d8] sm:$0xff] }
 0x19e   : > { %6197 = vmatpush1.bf16.msra.mxu0 %v6196_v29  ;;  %v6251_v29 = vpack.c.bf16 %v4936_v20, %v4931_v18  ;;  %v5002_v18 = vld [vmem:[%s10347_s2 + $0x7e8] sm:$0xff]  ;;  %v5007_v20 = vld [vmem:[%s10347_s2 + $0x810] sm:$0xff] }
 0x19f   : > { %6228 = vmatpush1.bf16.msra.mxu1 %v6227_v31  ;;  %6198 = vmatprep.subr.bf16.mxu0 %v6827_v27  ;;  %v6286_v31 = vpack.c.bf16 %v4938_v23, %v4933_v22  ;;  %v6277_v21 = vpack.c.bf16 %v5007_v20, %v5002_v18  ;;  %v5174_v18 = vld [vmem:[%s10348_s3 + $0x3c8] sm:$0xff] }
 0x1a0   : > { %6230 = vmatprep.subr.bf16.mxu1 %v6229_v36  ;;  %v4946_v36 = vld [vmem:[%s10347_s2 + $0x628] sm:$0xff] }
 0x1a2   : > { %6200 = vmatpush1.bf16.msra.mxu0 %v6199_v42  ;;  %v6289_v42 = vpack.c.bf16 %v4948_v39, %v4943_v37 }
 0x1a3   : > { %6232 = vmatpush1.bf16.msra.mxu1 %v6231_v44  ;;  %6201 = vmatprep.subr.bf16.mxu0 %v6827_v27  ;;  %v6257_v44 = vpack.c.bf16 %v4957_v40, %v4952_v28  ;;  %v5011_v40 = vld [vmem:[%s10347_s2 + $0x830] sm:$0xff] }
 0x1a4   : > { %6234 = vmatprep.subr.bf16.mxu1 %v6233_v49  ;;  %v4958_v49 = vld [vmem:[%s10347_s2 + $0x688] sm:$0xff] }
 0x1a6   : > { %6203 = vmatpush1.bf16.msra.mxu0 %v6202_v55  ;;  %v4961_v55 = vld [vmem:[%s10347_s2 + $0x6a0] sm:$0xff] }
 0x1a7   : > { %6236 = vmatpush1.bf16.msra.mxu1 %v6235_v56  ;;  %6204 = vmatprep.subr.bf16.mxu0 %v6827_v27  ;;  %v4966_v56 = vld [vmem:[%s10347_s2 + $0x6c8] sm:$0xff] }
 0x1a8   : > { %6238 = vmatprep.subr.bf16.mxu1 %v6237_v59  ;;  %v4977_v59 = vld [vmem:[%s10347_s2 + $0x720] sm:$0xff]  ;;  %v6263_v60 = vpack.c.bf16 %v4966_v56, %v4961_v55  ;;  %v5122_v55 = vld [vmem:[%s10348_s3 + $0x228] sm:$0xff]  ;;  %v5171_v56 = vld [vmem:[%s10348_s3 + $0x3b0] sm:$0xff] }
 0x1a9   : > { %v6265_v62 = vpack.c.bf16 %v4977_v59, %v4972_v58 }
 0x1aa   : > { %6206 = vmatpush1.bf16.msra.mxu0 %v6205_v0  ;;  %v4976_v0 = vld [vmem:[%s10347_s2 + $0x718] sm:$0xff] }
 0x1ab   : > { %6240 = vmatpush1.bf16.msra.mxu1 %v6239_v1  ;;  %6207 = vmatprep.subr.bf16.mxu0 %v6827_v27  ;;  %v4973_v1 = vld [vmem:[%s10347_s2 + $0x700] sm:$0xff]  ;;  %v6267_v4 = vpack.c.bf16 %v4976_v0, %v4971_v63 }
 0x1ac   : > { %6242 = vmatprep.subr.bf16.mxu1 %v6241_v3  ;;  %v4987_v3 = vld [vmem:[%s10347_s2 + $0x770] sm:$0xff]  ;;  %v6298_v7 = vpack.c.bf16 %v4978_v38, %v4973_v1 }
 0x1ad   : > { %v6269_v5 = vpack.c.bf16 %v4987_v3, %v4982_v2 }
 0x1ae   : > { %6209 = vmatpush1.bf16.msra.mxu0 %v6208_v8  ;;  %v4986_v8 = vld [vmem:[%s10347_s2 + $0x768] sm:$0xff] }
 0x1af   : > { %6244 = vmatpush1.bf16.msra.mxu1 %v6243_v9  ;;  %6210 = vmatprep.subr.bf16.mxu0 %v6827_v27  ;;  %v4983_v9 = vld [vmem:[%s10347_s2 + $0x750] sm:$0xff]  ;;  %v6271_v54 = vpack.c.bf16 %v4986_v8, %v4981_v15 }
 0x1b0   : > { %6246 = vmatprep.subr.bf16.mxu1 %v6245_v11  ;;  %v4997_v11 = vld [vmem:[%s10347_s2 + $0x7c0] sm:$0xff]  ;;  %v6301_v6 = vpack.c.bf16 %v4988_v17, %v4983_v9  ;;  %v5139_v17 = vld [vmem:[%s10348_s3 + $0x2b0] sm:$0xff] }
 0x1b1   : > { %v6273_v12 = vpack.c.bf16 %v4997_v11, %v4992_v10  ;;  %v5140_v10 = vld [vmem:[%s10348_s3 + $0x2b8] sm:$0xff]  ;;  %v5155_v11 = vld [vmem:[%s10348_s3 + $0x330] sm:$0xff] }
 0x1b2   : > { %6212 = vmatpush1.bf16.msra.mxu0 %v6211_v13  ;;  %v4996_v13 = vld [vmem:[%s10347_s2 + $0x7b8] sm:$0xff] }
 0x1b3   : > { %6248 = vmatpush1.bf16.msra.mxu1 %v6247_v16  ;;  %6285 = vmatprep.subr.bf16.mxu0 %v6827_v27  ;;  %v4993_v16 = vld [vmem:[%s10347_s2 + $0x7a0] sm:$0xff]  ;;  %v6275_v22 = vpack.c.bf16 %v4996_v13, %v4991_v19  ;;  %v5123_v19 = vld [vmem:[%s10348_s3 + $0x230] sm:$0xff]  ;;  %v5124_v13 = vld [vmem:[%s10348_s3 + $0x238] sm:$0xff] }
 0x1b4   : > { %6250 = vmatprep.subr.bf16.mxu1 %v6249_v46  ;;  %v4998_v46 = vld [vmem:[%s10347_s2 + $0x7c8] sm:$0xff] }
 0x1b5   : > { %2293 = vmatmul.mubr.f32.vlgmr.msra.gmra.mrb[10].mxu0 %v7899_v24  ;;  %v6255_v24 = vpack.c.bf16 %v4946_v36, %v4941_v26  ;;  %v6304_v23 = vpack.c.bf16 %v4998_v46, %v4993_v16  ;;  %v5012_v26 = vld [vmem:[%s10347_s2 + $0x838] sm:$0xff]  ;;  %v5017_v36 = vld [vmem:[%s10347_s2 + $0x860] sm:$0xff]  ;;  %v6318_v16 = vpack.c.bf16 %v5124_v13, %v5123_v19 }
 0x1b6   : > { %2368 = vmatmul.mubr.f32.vlgmr.msra.gmra.mrb[6].mxu1 %v7460_v34  ;;  %5114 = vmatprep.mubr.msk.f32.mxu0 %vm266_vm6, %v7914_v35  ;;  %v4953_v35 = vld [vmem:[%s10347_s2 + $0x660] sm:$0xff]  ;;  %v6281_v28 = vpack.c.bf16 %v5017_v36, %v5012_v26  ;;  %v5126_v26 = vld [vmem:[%s10348_s3 + $0x248] sm:$0xff]  ;;  %v5164_v13 = vld [vmem:[%s10348_s3 + $0x378] sm:$0xff] }
 0x1b7   : > { %5116 = vmatprep.mubr.msk.f32.mxu1 %vm266_vm6, %v7485_v43  ;;  %6252 = vmatpush1.bf16.msra.mxu1 %v6251_v29  ;;  %v6292_v14 = vpack.c.bf16 %v4958_v49, %v4953_v35  ;;  %v5006_v29 = vld [vmem:[%s10347_s2 + $0x808] sm:$0xff]  ;;  %v5173_v46 = vld [vmem:[%s10348_s3 + $0x3c0] sm:$0xff] }
 0x1b8   : > { %6287 = vmatpush1.bf16.msra.mxu0 %v6286_v31  ;;  %6254 = vmatprep.subr.bf16.mxu1 %v6253_v32  ;;  %v5003_v31 = vld [vmem:[%s10347_s2 + $0x7f0] sm:$0xff]  ;;  %v5008_v32 = vld [vmem:[%s10347_s2 + $0x818] sm:$0xff]  ;;  %v6279_v37 = vpack.c.bf16 %v5006_v29, %v5001_v25  ;;  %v5170_v49 = vld [vmem:[%s10348_s3 + $0x3a8] sm:$0xff]  ;;  %v6352_v20 = vpack.c.bf16 %v5174_v18, %v5173_v46 }
 0x1b9   : > { %2298 = vmatmul.mubr.f32.gmra.mrb[12].mxu0 %v7933_v41  ;;  %6288 = vmatprep.subr.bf16.mxu0 %v6827_v27  ;;  %v6259_v41 = vpack.c.bf16 %v4956_v48, %v4951_v47  ;;  %v6307_v39 = vpack.c.bf16 %v5008_v32, %v5003_v31  ;;  %v5018_v47 = vld [vmem:[%s10347_s2 + $0x868] sm:$0xff]  ;;  %v5125_v32 = vld [vmem:[%s10348_s3 + $0x240] sm:$0xff]  ;;  %v5132_v46 = vld [vmem:[%s10348_s3 + $0x278] sm:$0xff] }
 0x1ba   : > { %2374 = vmatmul.mubr.f32.gmra.mrb[8].mxu1 %v7505_v51  ;;  %5119 = vmatprep.mubr.msk.f32.mxu0 %vm266_vm6, %v7457_v33  ;;  %v5158_v29 = vld [vmem:[%s10348_s3 + $0x348] sm:$0xff]  ;;  %v6322_v36 = vpack.c.bf16 %v5126_v26, %v5125_v32  ;;  %v5181_v32 = vld [vmem:[%s10348_s3 + $0x400] sm:$0xff] }
 0x1bb   : > { %6256 = vmatpush1.bf16.msra.mxu1 %v6255_v24  ;;  %5117 = vmatprep.mubr.msk.f32.mxu1 %vm266_vm6, %v7457_v33  ;;  %v4968_v33 = vld [vmem:[%s10347_s2 + $0x6d8] sm:$0xff]  ;;  %v5182_v26 = vld [vmem:[%s10348_s3 + $0x408] sm:$0xff] }
 0x1bc   : > { %6290 = vmatpush1.bf16.msra.mxu0 %v6289_v42  ;;  %6258 = vmatprep.subr.bf16.mxu1 %v6257_v44  ;;  %v6295_v61 = vpack.c.bf16 %v4968_v33, %v4963_v57  ;;  %v5016_v24 = vld [vmem:[%s10347_s2 + $0x858] sm:$0xff]  ;;  %v8419_v42 = vld [vmem:[#allocation3] sm:$0xff]  ;;  %v5013_v44 = vld [vmem:[%s10347_s2 + $0x840] sm:$0xff] }
 0x1bd   : > { %6291 = vmatprep.subr.bf16.mxu0 %v6827_v27  ;;  %278 = vst.msk [vmem:[#allocation3 + $0x20] sm:$0xff] %vm277_vm9, %v8419_v42  ;;  %283 = vst.msk [vmem:[#allocation3 + $0x48] sm:$0xff] %vm277_vm9, %v8419_v42  ;;  %v6283_v48 = vpack.c.bf16 %v5016_v24, %v5011_v40  ;;  %v6310_v35 = vpack.c.bf16 %v5018_v47, %v5013_v44  ;;  %v5172_v33 = vld [vmem:[%s10348_s3 + $0x3b8] sm:$0xff]  ;;  %v5143_v40 = vld [vmem:[%s10348_s3 + $0x2d0] sm:$0xff] }
 0x1be   : > { %288 = vst.msk [vmem:[#allocation3 + $0x70] sm:$0xff] %vm277_vm9, %v8419_v42  ;;  %293 = vst.msk [vmem:[#allocation3 + $0x98] sm:$0xff] %vm277_vm9, %v8419_v42  ;;  %v6348_v58 = vpack.c.bf16 %v5172_v33, %v5171_v56  ;;  %v5144_v24 = vld [vmem:[%s10348_s3 + $0x2d8] sm:$0xff]  ;;  %v5159_v44 = vld [vmem:[%s10348_s3 + $0x350] sm:$0xff] }
 0x1bf   : > { %6260 = vmatpush1.bf16.msra.mxu1 %v6259_v41  ;;  %v6324_v47 = vpack.c.bf16 %v5144_v24, %v5143_v40  ;;  %v5162_v33 = vld [vmem:[%s10348_s3 + $0x368] sm:$0xff]  ;;  %299 = vst.msk [vmem:[#allocation3 + $0xc0] sm:$0x3] %vm298_vm10, %v8419_v42  ;;  %v5148_v42 = vld [vmem:[%s10348_s3 + $0x2f8] sm:$0xff]  ;;  %v5133_v24 = vld [vmem:[%s10348_s3 + $0x280] sm:$0xff] }
 0x1c0   : > { %6293 = vmatpush1.bf16.msra.mxu0 %v6292_v14  ;;  %6262 = vmatprep.subr.bf16.mxu1 %v6261_v53  ;;  %v5121_v53 = vld [vmem:[%s10348_s3 + $0x220] sm:$0xff]  ;;  %v5166_v40 = vld [vmem:[%s10348_s3 + $0x388] sm:$0xff] }
 0x1c1   : > { %6294 = vmatprep.subr.bf16.mxu0 %v6827_v27  ;;  %v6314_v57 = vpack.c.bf16 %v5122_v55, %v5121_v53  ;;  %v5161_v53 = vld [vmem:[%s10348_s3 + $0x360] sm:$0xff] }
 0x1c3   : > { %6264 = vmatpush1.bf16.msra.mxu1 %v6263_v60 }
 0x1c4   : > { %6296 = vmatpush1.bf16.msra.mxu0 %v6295_v61  ;;  %6266 = vmatprep.subr.bf16.mxu1 %v6265_v62 }
 0x1c5   : > { %6297 = vmatprep.subr.bf16.mxu0 %v6827_v27 }
 0x1c7   : > { %6268 = vmatpush1.bf16.msra.mxu1 %v6267_v4 }
 0x1c8   : > { %6299 = vmatpush1.bf16.msra.mxu0 %v6298_v7  ;;  %6270 = vmatprep.subr.bf16.mxu1 %v6269_v5 }
 0x1c9   : > { %6300 = vmatprep.subr.bf16.mxu0 %v6827_v27 }
 0x1cb   : > { %6272 = vmatpush1.bf16.msra.mxu1 %v6271_v54  ;;  %v6316_v54 = vpack.c.bf16 %v5140_v10, %v5139_v17 }
 0x1cc   : > { %6302 = vmatpush1.bf16.msra.mxu0 %v6301_v6  ;;  %6274 = vmatprep.subr.bf16.mxu1 %v6273_v12  ;;  %v5156_v6 = vld [vmem:[%s10348_s3 + $0x338] sm:$0xff] }
 0x1cd   : > { %6303 = vmatprep.subr.bf16.mxu0 %v6827_v27  ;;  %v6350_v12 = vpack.c.bf16 %v5156_v6, %v5155_v11  ;;  %v5147_v11 = vld [vmem:[%s10348_s3 + $0x2f0] sm:$0xff] }
 0x1ce   : > { %v6332_v19 = vpack.c.bf16 %v5148_v42, %v5147_v11  ;;  %v5186_v11 = vld [vmem:[%s10348_s3 + $0x428] sm:$0xff] }
 0x1cf   : > { %6276 = vmatpush1.bf16.msra.mxu1 %v6275_v22  ;;  %v5141_v22 = vld [vmem:[%s10348_s3 + $0x2c0] sm:$0xff] }
 0x1d0   : > { %6305 = vmatpush1.bf16.msra.mxu0 %v6304_v23  ;;  %6278 = vmatprep.subr.bf16.mxu1 %v6277_v21  ;;  %v5142_v23 = vld [vmem:[%s10348_s3 + $0x2c8] sm:$0xff]  ;;  %v5157_v21 = vld [vmem:[%s10348_s3 + $0x340] sm:$0xff] }
 0x1d1   : > { %6306 = vmatprep.subr.bf16.mxu0 %v6827_v27  ;;  %v6320_v25 = vpack.c.bf16 %v5142_v23, %v5141_v22  ;;  %v6354_v31 = vpack.c.bf16 %v5158_v29, %v5157_v21 }
 0x1d3   : > { %6280 = vmatpush1.bf16.msra.mxu1 %v6279_v37  ;;  %v5175_v37 = vld [vmem:[%s10348_s3 + $0x3d0] sm:$0xff] }
 0x1d4   : > { %6308 = vmatpush1.bf16.msra.mxu0 %v6307_v39  ;;  %6282 = vmatprep.subr.bf16.mxu1 %v6281_v28  ;;  %v5176_v39 = vld [vmem:[%s10348_s3 + $0x3d8] sm:$0xff] }
 0x1d5   : > { %6309 = vmatprep.subr.bf16.mxu0 %v6827_v27  ;;  %v5169_v27 = vld [vmem:[%s10348_s3 + $0x3a0] sm:$0xff]  ;;  %v6356_v28 = vpack.c.bf16 %v5176_v39, %v5175_v37  ;;  %v5150_v37 = vld [vmem:[%s10348_s3 + $0x308] sm:$0xff] }
 0x1d6   : > { %v6344_v50 = vpack.c.bf16 %v5170_v49, %v5169_v27  ;;  %v5128_v27 = vld [vmem:[%s10348_s3 + $0x258] sm:$0xff]  ;;  %v5165_v39 = vld [vmem:[%s10348_s3 + $0x380] sm:$0xff] }
 0x1d7   : > { %6284 = vmatpush1.bf16.msra.mxu1 %v6283_v48  ;;  %v5160_v48 = vld [vmem:[%s10348_s3 + $0x358] sm:$0xff] }
 0x1d8   : > { %6311 = vmatpush1.bf16.msra.mxu0 %v6310_v35  ;;  %6345 = vmatprep.subr.bf16.mxu1 %v6344_v50  ;;  %v5127_v35 = vld [vmem:[%s10348_s3 + $0x250] sm:$0xff]  ;;  %v6358_v49 = vpack.c.bf16 %v5160_v48, %v5159_v44  ;;  %v5177_v50 = vld [vmem:[%s10348_s3 + $0x3e0] sm:$0xff]  ;;  %v5134_v44 = vld [vmem:[%s10348_s3 + $0x288] sm:$0xff] }
 0x1da   : > { %2445 = vmatmul.mubr.f32.vlgmr.msra.gmra.mrb[10].mxu1 %v7460_v34 }
 0x1db   : > { %2522 = vmatmul.mubr.f32.vlgmr.msra.gmra.mrb[10].mxu0 %v7460_v34  ;;  %5118 = vmatprep.mubr.msk.f32.mxu1 %vm266_vm6, %v7485_v43  ;;  %v5137_v34 = vld [vmem:[%s10348_s3 + $0x2a0] sm:$0xff] }
 0x1dc   : > { %5120 = vmatprep.mubr.msk.f32.mxu0 %vm266_vm6, %v7485_v43  ;;  %v5138_v43 = vld [vmem:[%s10348_s3 + $0x2a8] sm:$0xff] }
 0x1dd   : > { %v6312_v41 = vpack.c.bf16 %v5138_v43, %v5137_v34  ;;  %v6326_v34 = vpack.c.bf16 %v5128_v27, %v5127_v35  ;;  %v5178_v43 = vld [vmem:[%s10348_s3 + $0x3e8] sm:$0xff] }
 0x1de   : > { %2451 = vmatmul.mubr.f32.gmra.mrb[12].mxu1 %v7505_v51 }
 0x1df   : > { %2527 = vmatmul.mubr.f32.gmra.mrb[12].mxu0 %v7505_v51  ;;  %v5153_v51 = vld [vmem:[%s10348_s3 + $0x320] sm:$0xff]  ;;  %6313 = vmatprep.subr.bf16.mxu0 %v6312_v41 }
 0x1e0   : > { %v6346_v14 = vpack.c.bf16 %v5154_v52, %v5153_v51  ;;  %6315 = vmatpush3.bf16.msra.mxu0 %v6314_v57  ;;  %v6360_v52 = vpack.c.bf16 %v5178_v43, %v5177_v50  ;;  %v5145_v41 = vld [vmem:[%s10348_s3 + $0x2e0] sm:$0xff]  ;;  %v6370_v50 = vpack.c.bf16 %v5166_v40, %v5165_v39  ;;  %v6338_v43 = vpack.c.bf16 %v5134_v44, %v5133_v24 }
 0x1e1   : > { %6317 = vmatprep.subr.bf16.mxu0 %v6316_v54  ;;  %v5163_v54 = vld [vmem:[%s10348_s3 + $0x370] sm:$0xff] }
 0x1e2   : > { %6347 = vmatpush3.bf16.msra.mxu1 %v6346_v14  ;;  %v5146_v14 = vld [vmem:[%s10348_s3 + $0x2e8] sm:$0xff]  ;;  %v6366_v23 = vpack.c.bf16 %v5164_v13, %v5163_v54 }
 0x1e3   : > { %6349 = vmatprep.subr.bf16.mxu1 %v6348_v58  ;;  %v6328_v57 = vpack.c.bf16 %v5146_v14, %v5145_v41  ;;  %v5129_v58 = vld [vmem:[%s10348_s3 + $0x260] sm:$0xff]  ;;  %v5151_v41 = vld [vmem:[%s10348_s3 + $0x310] sm:$0xff] }
 0x1e4   : > { %6319 = vmatpush3.bf16.msra.mxu0 %v6318_v16  ;;  %v5131_v16 = vld [vmem:[%s10348_s3 + $0x270] sm:$0xff] }
 0x1e5   : > { %6321 = vmatprep.subr.bf16.mxu0 %v6320_v25 }
 0x1e6   : > { %6351 = vmatpush3.bf16.msra.mxu1 %v6350_v12 }
 0x1e7   : > { %6353 = vmatprep.subr.bf16.mxu1 %v6352_v20 }
 0x1e8   : > { %6323 = vmatpush3.bf16.msra.mxu0 %v6322_v36 }
 0x1e9   : > { %6325 = vmatprep.subr.bf16.mxu0 %v6324_v47 }
 0x1ea   : > { %6355 = vmatpush3.bf16.msra.mxu1 %v6354_v31  ;;  %v6334_v31 = vpack.c.bf16 %v5132_v46, %v5131_v16 }
 0x1eb   : > { %6357 = vmatprep.subr.bf16.mxu1 %v6356_v28 }
 0x1ec   : > { %6327 = vmatpush3.bf16.msra.mxu0 %v6326_v34 }
 0x1ed   : > { %6329 = vmatprep.subr.bf16.mxu0 %v6328_v57  ;;  %v5168_v57 = vld [vmem:[%s10348_s3 + $0x398] sm:$0xff] }
 0x1ee   : > { %6359 = vmatpush3.bf16.msra.mxu1 %v6358_v49 }
 0x1ef   : > { %6361 = vmatprep.subr.bf16.mxu1 %v6360_v52  ;;  %v5184_v52 = vld [vmem:[%s10348_s3 + $0x418] sm:$0xff] }
 0x21a   : > { %v1460_v59 = vpop.f32.mrb[2].mxu1 }
 0x21b   : > { %v1548_v60 = vmul.f32 0.01, %v1460_v59  ;;  %v1462_v61 = vpop.f32.mrb[3].mxu1 }
 0x21c   : > { %v1549_v62 = vmul.f32 0.01, %v1462_v61 }
 0x21d   : > { %v8475_v63 = vmax.f32 %v1460_v59, %v1548_v60  ;;  %v5130_v59 = vld [vmem:[%s10348_s3 + $0x268] sm:$0xff] }
 0x21e   : > { %v8477_v0 = vmax.f32 %v1462_v61, %v1549_v62  ;;  %v1466_v1 = vpop.f32.mrb[4].mxu1  ;;  %v6362_v61 = vpack.c.bf16 %v5162_v33, %v5161_v53  ;;  %v6330_v62 = vpack.c.bf16 %v5130_v59, %v5129_v58 }
 0x21f   : > { %v1553_v38 = vmul.f32 0.01, %v1466_v1  ;;  %v1468_v2 = vpop.f32.mrb[5].mxu1 }
 0x220   : > { %v1572_v3 = vcombine.low %v8475_v63, %v8477_v0  ;;  %v1648_v4 = vcombine.high %v8475_v63, %v8477_v0  ;;  %v1554_v7 = vmul.f32 0.01, %v1468_v2  ;;  %6363 = vmatpush3.bf16.msra.mxu1 %v6362_v61  ;;  %6331 = vmatpush3.bf16.msra.mxu0 %v6330_v62  ;;  %v6368_v0 = vpack.c.bf16 %v5182_v26, %v5181_v32 }
 0x221   : > { %v8483_v5 = vmax.f32 %v1466_v1, %v1553_v38  ;;  %v5179_v38 = vld [vmem:[%s10348_s3 + $0x3f0] sm:$0xff]  ;;  %6333 = vmatprep.subr.bf16.mxu0 %v6332_v19 }
 0x222   : > { %v8485_v15 = vmax.f32 %v1468_v2, %v1554_v7  ;;  %v5180_v2 = vld [vmem:[%s10348_s3 + $0x3f8] sm:$0xff]  ;;  %v8610_v21 = vrot.slane %v1572_v3, %v7367_v45  ;;  %v8616_v25 = vrot.slane %v1648_v4, %v7367_v45  ;;  %v5149_v4 = vld [vmem:[%s10348_s3 + $0x300] sm:$0xff] }
 0x223   : > { %v6364_v10 = vpack.c.bf16 %v5180_v2, %v5179_v38  ;;  %v6336_v28 = vpack.c.bf16 %v5150_v37, %v5149_v4  ;;  %v2901_v2 = vld [vmem:[%s10348_s3 + $0x80] sm:$0xff] }
 0x224   : > { %v1728_v8 = vcombine.low %v8483_v5, %v8485_v15  ;;  %v1802_v9 = vcombine.high %v8483_v5, %v8485_v15  ;;  %6335 = vmatpush3.bf16.msra.mxu0 %v6334_v31  ;;  %v5135_v15 = vld [vmem:[%s10348_s3 + $0x290] sm:$0xff] }
 0x225   : > { %6365 = vmatprep.subr.bf16.mxu1 %v6364_v10  ;;  %6337 = vmatprep.subr.bf16.mxu0 %v6336_v28  ;;  %v5185_v10 = vld [vmem:[%s10348_s3 + $0x420] sm:$0xff] }
 0x226   : > { %6367 = vmatpush3.bf16.msra.mxu1 %v6366_v23  ;;  %v8669_v14 = vrot.slane %v1728_v8, %v7367_v45  ;;  %v8675_v53 = vrot.slane %v1802_v9, %v7367_v45  ;;  %v5136_v9 = vld [vmem:[%s10348_s3 + $0x298] sm:$0xff]  ;;  %v8718_v42 = vpack.c.bf16 %v5186_v11, %v5185_v10 }
 0x227   : > { %6369 = vmatprep.subr.bf16.mxu1 %v6368_v0 }
 0x228   : > { %6339 = vmatpush3.bf16.msra.mxu0 %v6338_v43 }
 0x22a   : > { %6371 = vmatpush3.bf16.msra.mxu1 %v6370_v50 }
 0x23e   : > { %v1383_v51 = vpop.f32.mrb[2].mxu0 }
 0x23f   : > { %v1546_v55 = vmul.f32 0.01, %v1383_v51  ;;  %v1385_v56 = vpop.f32.mrb[3].mxu0 }
 0x240   : > { %v1547_v60 = vmul.f32 0.01, %v1385_v56 }
 0x241   : > { %v1556_v1 = vmax.f32 %v1383_v51, %v1546_v55  ;;  %v5183_v51 = vld [vmem:[%s10348_s3 + $0x410] sm:$0xff]  ;;  %v5152_v55 = vld [vmem:[%s10348_s3 + $0x318] sm:$0xff] }
 0x242   : > { %v1557_v7 = vmax.f32 %v1385_v56, %v1547_v60  ;;  %v1389_v17 = vpop.f32.mrb[4].mxu0  ;;  %v5167_v56 = vld [vmem:[%s10348_s3 + $0x390] sm:$0xff]  ;;  %v6372_v5 = vpack.c.bf16 %v5184_v52, %v5183_v51  ;;  %v6340_v58 = vpack.c.bf16 %v5152_v55, %v5151_v41  ;;  %v6342_v60 = vpack.c.bf16 %v5136_v9, %v5135_v15 }
 0x243   : > { %v1551_v6 = vmul.f32 0.01, %v1389_v17  ;;  %v1391_v12 = vpop.f32.mrb[5].mxu0  ;;  %v6374_v59 = vpack.c.bf16 %v5168_v57, %v5167_v56 }
 0x244   : > { %v1571_v18 = vcombine.low %v1556_v1, %v1557_v7  ;;  %v1647_v20 = vcombine.high %v1556_v1, %v1557_v7  ;;  %v1552_v22 = vmul.f32 0.01, %v1391_v12  ;;  %6373 = vmatprep.subr.bf16.mxu1 %v6372_v5  ;;  %v2902_v7 = vld [vmem:[%s10348_s3 + $0x88] sm:$0xff]  ;;  %6341 = vmatprep.subr.bf16.mxu0 %v6340_v58 }
 0x245   : > { %v1561_v29 = vmax.f32 %v1389_v17, %v1551_v6  ;;  %v6384_v17 = vpack.c.bf16 %v2902_v7, %v2901_v2  ;;  %6375 = vmatpush3.bf16.msra.mxu1 %v6374_v59  ;;  %6343 = vmatpush3.bf16.msra.mxu0 %v6342_v60 }
 0x246   : > { %v8625_v3 = vrot.slane %v1571_v18, %v7367_v45  ;;  %v8628_v36 = vrot.slane %v1647_v20, %v7367_v45  ;;  %v1562_v63 = vmax.f32 %v1391_v12, %v1552_v22  ;;  %6377 = vmatprep.subr.bf16.mxu0 %v8718_v42 }
 0x247   : > { %6385 = vmatprep.subr.bf16.mxu1 %v6384_v17 }
 0x248   : > { %v1594_v47 = vcombine.low %v8625_v3, %v8610_v21  ;;  %v1616_v48 = vcombine.high %v8625_v3, %v8610_v21  ;;  %v1671_v35 = vcombine.low %v8628_v36, %v8616_v25  ;;  %v1691_v27 = vcombine.high %v8628_v36, %v8616_v25 }
 0x249   : > { %v1727_v49 = vcombine.low %v1561_v29, %v1562_v63  ;;  %v1801_v34 = vcombine.high %v1561_v29, %v1562_v63 }
 0x24a   : > { %v1601_v22 = vrot.slane %v1594_v47, %v7367_v45  ;;  %v1624_v32 = vrot.slane %v1616_v48, %v7367_v45  ;;  %v1678_v26 = vrot.slane %v1671_v35, %v7367_v45  ;;  %v1699_v3 = vrot.slane %v1691_v27, %v7367_v45 }
 0x24b   : > { %v8687_v8 = vrot.slane %v1727_v49, %v7367_v45  ;;  %v8690_v33 = vrot.slane %v1801_v34, %v7367_v45 }
 0x24d   : > { %v1750_v61 = vcombine.low %v8687_v8, %v8669_v14  ;;  %v1770_v62 = vcombine.high %v8687_v8, %v8669_v14  ;;  %v1825_v1 = vcombine.low %v8690_v33, %v8675_v53  ;;  %v1845_v38 = vcombine.high %v8690_v33, %v8675_v53 }
 0x24f   : > { %v1757_v30 = vrot.slane %v1750_v61, %v7367_v45  ;;  %v1778_v34 = vrot.slane %v1770_v62, %v7367_v45  ;;  %v1832_v41 = vrot.slane %v1825_v1, %v7367_v45  ;;  %v1853_v5 = vrot.slane %v1845_v38, %v7367_v45 }
 0x263   : > { %v1537_v54 = vpop.f32.mrb[6].mxu0 }
 0x264   : > { %v1550_v6 = vmul.f32 0.01, %v1537_v54  ;;  %v1539_v12 = vpop.f32.mrb[7].mxu0 }
 0x266   : > { %v1560_v19 = vmax.f32 %v1537_v54, %v1550_v6 }
 0x267   : > { %v1542_v13 = vpop.f32.mrb[8].mxu0 }
 0x268   : > { %v1593_v16 = vrot.slane %v1560_v19, %v7367_v45  ;;  %v1649_v46 = vcombine.high %v1560_v19, %v1560_v19  ;;  %v1555_v18 = vmul.f32 0.01, %v1542_v13  ;;  %v1544_v20 = vpop.f32.mrb[9].mxu0 }
 0x26a   : > { %v1608_v23 = vrot.slane %v1593_v16, %v7367_v45  ;;  %v1617_v21 = vcombine.high %v1593_v16, %v1593_v16  ;;  %v1670_v25 = vrot.slane %v1649_v46, %v7367_v45  ;;  %v1565_v29 = vmax.f32 %v1542_v13, %v1555_v18 }
 0x26c   : > { %v1609_v36 = vcombine.low %v1601_v22, %v1608_v23  ;;  %v1631_v63 = vrot.slane %v1617_v21, %v7367_v45  ;;  %v1637_v0 = vcombine.high %v1601_v22, %v1608_v23  ;;  %v1685_v4 = vrot.slane %v1670_v25, %v7367_v45 }
 0x26d   : > { %v1692_v37 = vcombine.high %v1670_v25, %v1670_v25  ;;  %v1749_v39 = vrot.slane %v1565_v29, %v7367_v45  ;;  %v1803_v28 = vcombine.high %v1565_v29, %v1565_v29 }
 0x26e   : > { %1614 = vst.msk [vmem:[#allocation3 + $0x1] ss:$8 sm:$0xf] %vm8726_vm11, %v1609_v36  ;;  %1615 = vst.msk [vmem:[#allocation3 + $0x1] ss:$8 sm:$0x10] %vm8726_vm11, %v1609_v36  ;;  %v1632_v40 = vcombine.low %v1624_v32, %v1631_v63  ;;  %v1642_v24 = vcombine.high %v1624_v32, %v1631_v63  ;;  %v1686_v44 = vcombine.low %v1678_v26, %v1685_v4 }
 0x26f   : > { %1640 = vst.msk [vmem:[#allocation3 + $0x5] ss:$8 sm:$0xf] %vm8726_vm11, %v1637_v0  ;;  %1641 = vst.msk [vmem:[#allocation3 + $0x5] ss:$8 sm:$0x10] %vm8726_vm11, %v1637_v0  ;;  %v1712_v47 = vcombine.high %v1678_v26, %v1685_v4  ;;  %v1706_v48 = vrot.slane %v1692_v37, %v7367_v45  ;;  %v1764_v35 = vrot.slane %v1749_v39, %v7367_v45 }
 0x270   : > { %v1771_v27 = vcombine.high %v1749_v39, %v1749_v39  ;;  %v1824_v49 = vrot.slane %v1803_v28, %v7367_v45  ;;  %1635 = vst.msk [vmem:[#allocation3 + $0x3] ss:$8 sm:$0xf] %vm8726_vm11, %v1632_v40  ;;  %1636 = vst.msk [vmem:[#allocation3 + $0x3] ss:$8 sm:$0x10] %vm8726_vm11, %v1632_v40 }
 0x271   : > { %1645 = vst.msk [vmem:[#allocation3 + $0x7] ss:$8 sm:$0xf] %vm8726_vm11, %v1642_v24  ;;  %1646 = vst.msk [vmem:[#allocation3 + $0x7] ss:$8 sm:$0x10] %vm8726_vm11, %v1642_v24  ;;  %v1707_v50 = vcombine.low %v1699_v3, %v1706_v48  ;;  %v1717_v43 = vcombine.high %v1699_v3, %v1706_v48  ;;  %v1765_v51 = vcombine.low %v1757_v30, %v1764_v35 }
 0x272   : > { %1689 = vst.msk [vmem:[#allocation3 + $0x29] ss:$8 sm:$0xf] %vm8726_vm11, %v1686_v44  ;;  %1690 = vst.msk [vmem:[#allocation3 + $0x29] ss:$8 sm:$0x10] %vm8726_vm11, %v1686_v44  ;;  %v1785_v52 = vrot.slane %v1771_v27, %v7367_v45  ;;  %v1791_v14 = vcombine.high %v1757_v30, %v1764_v35  ;;  %v1839_v55 = vrot.slane %v1824_v49, %v7367_v45 }
 0x273   : > { %1715 = vst.msk [vmem:[#allocation3 + $0x2d] ss:$8 sm:$0xf] %vm8726_vm11, %v1712_v47  ;;  %1716 = vst.msk [vmem:[#allocation3 + $0x2d] ss:$8 sm:$0x10] %vm8726_vm11, %v1712_v47  ;;  %v1846_v56 = vcombine.high %v1824_v49, %v1824_v49 }
 0x274   : > { %1710 = vst.msk [vmem:[#allocation3 + $0x2b] ss:$8 sm:$0xf] %vm8726_vm11, %v1707_v50  ;;  %1711 = vst.msk [vmem:[#allocation3 + $0x2b] ss:$8 sm:$0x10] %vm8726_vm11, %v1707_v50  ;;  %v1786_v57 = vcombine.low %v1778_v34, %v1785_v52  ;;  %v1796_v8 = vcombine.high %v1778_v34, %v1785_v52  ;;  %v1840_v15 = vcombine.low %v1832_v41, %v1839_v55 }
 0x275   : > { %1720 = vst.msk [vmem:[#allocation3 + $0x2f] ss:$8 sm:$0xf] %vm8726_vm11, %v1717_v43  ;;  %1721 = vst.msk [vmem:[#allocation3 + $0x2f] ss:$8 sm:$0x10] %vm8726_vm11, %v1717_v43  ;;  %v1860_v9 = vrot.slane %v1846_v56, %v7367_v45  ;;  %v1866_v58 = vcombine.high %v1832_v41, %v1839_v55 }
 0x276   : > { %1768 = vst.msk [vmem:[#allocation3 + $0x51] ss:$8 sm:$0xf] %vm8726_vm11, %v1765_v51  ;;  %1769 = vst.msk [vmem:[#allocation3 + $0x51] ss:$8 sm:$0x10] %vm8726_vm11, %v1765_v51 }
 0x277   : > { %1794 = vst.msk [vmem:[#allocation3 + $0x55] ss:$8 sm:$0xf] %vm8726_vm11, %v1791_v14  ;;  %1795 = vst.msk [vmem:[#allocation3 + $0x55] ss:$8 sm:$0x10] %vm8726_vm11, %v1791_v14  ;;  %v1861_v53 = vcombine.low %v1853_v5, %v1860_v9  ;;  %v1871_v33 = vcombine.high %v1853_v5, %v1860_v9 }
 0x278   : > { %1789 = vst.msk [vmem:[#allocation3 + $0x53] ss:$8 sm:$0xf] %vm8726_vm11, %v1786_v57  ;;  %1790 = vst.msk [vmem:[#allocation3 + $0x53] ss:$8 sm:$0x10] %vm8726_vm11, %v1786_v57 }
 0x279   : > { %1799 = vst.msk [vmem:[#allocation3 + $0x57] ss:$8 sm:$0xf] %vm8726_vm11, %v1796_v8  ;;  %1800 = vst.msk [vmem:[#allocation3 + $0x57] ss:$8 sm:$0x10] %vm8726_vm11, %v1796_v8 }
 0x27a   : > { %1843 = vst.msk [vmem:[#allocation3 + $0x79] ss:$8 sm:$0xf] %vm8726_vm11, %v1840_v15  ;;  %1844 = vst.msk [vmem:[#allocation3 + $0x79] ss:$8 sm:$0x10] %vm8726_vm11, %v1840_v15 }
 0x27b   : > { %1869 = vst.msk [vmem:[#allocation3 + $0x7d] ss:$8 sm:$0xf] %vm8726_vm11, %v1866_v58  ;;  %1870 = vst.msk [vmem:[#allocation3 + $0x7d] ss:$8 sm:$0x10] %vm8726_vm11, %v1866_v58 }
 0x27c   : > { %1864 = vst.msk [vmem:[#allocation3 + $0x7b] ss:$8 sm:$0xf] %vm8726_vm11, %v1861_v53  ;;  %1865 = vst.msk [vmem:[#allocation3 + $0x7b] ss:$8 sm:$0x10] %vm8726_vm11, %v1861_v53 }
 0x27d   : > { %1874 = vst.msk [vmem:[#allocation3 + $0x7f] ss:$8 sm:$0xf] %vm8726_vm11, %v1871_v33  ;;  %1875 = vst.msk [vmem:[#allocation3 + $0x7f] ss:$8 sm:$0x10] %vm8726_vm11, %v1871_v33 }
 0x289   : > { %v2369_v59 = vpop.f32.mrb[6].mxu1 }
 0x28a   : > { %v2532_v60 = vmul.f32 0.01, %v2369_v59  ;;  %v2371_v61 = vpop.f32.mrb[7].mxu1 }
 0x28b   : > { %v2533_v62 = vmul.f32 0.01, %v2371_v61 }
 0x28c   : > { %v2542_v1 = vmax.f32 %v2369_v59, %v2532_v60 }
 0x28d   : > { %v2543_v38 = vmax.f32 %v2371_v61, %v2533_v62  ;;  %v2375_v2 = vpop.f32.mrb[8].mxu1 }
 0x28e   : > { %v2537_v7 = vmul.f32 0.01, %v2375_v2  ;;  %v2377_v17 = vpop.f32.mrb[9].mxu1 }
 0x28f   : > { %v2557_v10 = vcombine.low %v2542_v1, %v2543_v38  ;;  %v2631_v11 = vcombine.high %v2542_v1, %v2543_v38  ;;  %v2538_v54 = vmul.f32 0.01, %v2377_v17 }
 0x290   : > { %v8816_v6 = vmax.f32 %v2375_v2, %v2537_v7 }
 0x291   : > { %v8818_v12 = vmax.f32 %v2377_v17, %v2538_v54  ;;  %v2565_v28 = vrot.slane %v2557_v10, %v7367_v45  ;;  %v2640_v27 = vrot.slane %v2631_v11, %v7367_v45 }
 0x293   : > { %v2711_v19 = vcombine.low %v8816_v6, %v8818_v12  ;;  %v2785_v13 = vcombine.high %v8816_v6, %v8818_v12  ;;  %v8887_v6 = vld [vmem:[%s10348_s3] sm:$0xff]  ;;  %v8892_v12 = vld [vmem:[%s10348_s3 + $0x8] sm:$0xff] }
 0x295   : > { %v2719_v54 = vrot.slane %v2711_v19, %v7367_v45 }
 0x2ad   : > { %v2446_v16 = vpop.f32.mrb[10].mxu1 }
 0x2ae   : > { %v2534_v46 = vmul.f32 0.01, %v2446_v16  ;;  %v2523_v18 = vpop.f32.mrb[10].mxu0  ;;  %v2448_v20 = vpop.f32.mrb[11].mxu1 }
 0x2af   : > { %v2536_v22 = vmul.f32 0.01, %v2523_v18  ;;  %v2535_v23 = vmul.f32 0.01, %v2448_v20  ;;  %v2525_v21 = vpop.f32.mrb[11].mxu0 }
 0x2b0   : > { %v2544_v25 = vmax.f32 %v2446_v16, %v2534_v46 }
 0x2b1   : > { %v2546_v29 = vmax.f32 %v2523_v18, %v2536_v22  ;;  %v2545_v32 = vmax.f32 %v2448_v20, %v2535_v23  ;;  %v2452_v26 = vpop.f32.mrb[12].mxu1  ;;  %v2794_v18 = vrot.slane %v2785_v13, %v7367_v45 }
 0x2b2   : > { %v2539_v3 = vmul.f32 0.01, %v2452_v26  ;;  %v2528_v36 = vpop.f32.mrb[12].mxu0  ;;  %v2454_v63 = vpop.f32.mrb[13].mxu1 }
 0x2b3   : > { %v2579_v0 = vrot.slane %v2546_v29, %v7367_v45  ;;  %v2633_v4 = vcombine.high %v2546_v29, %v2546_v29  ;;  %v2558_v37 = vcombine.low %v2544_v25, %v2545_v32  ;;  %v2632_v39 = vcombine.high %v2544_v25, %v2545_v32  ;;  %v2530_v30 = vpop.f32.mrb[13].mxu0 }
 0x2b4   : > { %v2541_v40 = vmul.f32 0.01, %v2528_v36  ;;  %v2540_v24 = vmul.f32 0.01, %v2454_v63  ;;  %v2549_v35 = vmax.f32 %v2452_v26, %v2539_v3 }
 0x2b5   : > { %v2601_v44 = vcombine.high %v2579_v0, %v2579_v0  ;;  %v2654_v47 = vrot.slane %v2633_v4, %v7367_v45  ;;  %v2572_v48 = vrot.slane %v2558_v37, %v7367_v45  ;;  %v2647_v49 = vrot.slane %v2632_v39, %v7367_v45  ;;  %v8897_v37 = vld [vmem:[%s10348_s3 + $0x90] sm:$0xff]  ;;  %v8902_v39 = vld [vmem:[%s10348_s3 + $0x98] sm:$0xff] }
 0x2b6   : > { %v2551_v34 = vmax.f32 %v2528_v36, %v2541_v40  ;;  %v2550_v50 = vmax.f32 %v2454_v63, %v2540_v24  ;;  %v2594_v43 = vrot.slane %v2579_v0, %v7367_v45 }
 0x2b7   : > { %v2615_v51 = vrot.slane %v2601_v44, %v7367_v45  ;;  %v2676_v52 = vcombine.high %v2654_v47, %v2654_v47  ;;  %v2580_v41 = vcombine.low %v2565_v28, %v2572_v48  ;;  %v2600_v14 = vcombine.high %v2565_v28, %v2572_v48 }
 0x2b8   : > { %v2655_v55 = vcombine.low %v2640_v27, %v2647_v49  ;;  %v2675_v56 = vcombine.high %v2640_v27, %v2647_v49  ;;  %v2733_v57 = vrot.slane %v2551_v34, %v7367_v45  ;;  %v2787_v15 = vcombine.high %v2551_v34, %v2551_v34  ;;  %v5188_v34 = vld [vmem:[%s10348_s3 + $0x438] sm:$0xff] }
 0x2b9   : > { %v2690_v8 = vrot.slane %v2676_v52, %v7367_v45  ;;  %v2587_v5 = vrot.slane %v2580_v41, %v7367_v45  ;;  %v2712_v9 = vcombine.low %v2549_v35, %v2550_v50  ;;  %v2669_v58 = vrot.slane %v2654_v47, %v7367_v45  ;;  %v5187_v47 = vld [vmem:[%s10348_s3 + $0x430] sm:$0xff] }
 0x2ba   : > { %v2608_v53 = vrot.slane %v2600_v14, %v7367_v45  ;;  %v2662_v33 = vrot.slane %v2655_v55, %v7367_v45  ;;  %v2683_v59 = vrot.slane %v2675_v56, %v7367_v45  ;;  %v2808_v62 = vrot.slane %v2787_v15, %v7367_v45  ;;  %v8950_v56 = vld [vmem:[%s10348_s3 + $0x10] sm:$0xff] }
 0x2bb   : > { %v2595_v60 = vcombine.low %v2587_v5, %v2594_v43  ;;  %v2621_v61 = vcombine.high %v2587_v5, %v2594_v43  ;;  %v2755_v11 = vcombine.high %v2733_v57, %v2733_v57  ;;  %v2726_v19 = vrot.slane %v2712_v9, %v7367_v45 }
 0x2bc   : > { %v2616_v1 = vcombine.low %v2608_v53, %v2615_v51  ;;  %v2626_v38 = vcombine.high %v2608_v53, %v2615_v51  ;;  %v2670_v2 = vcombine.low %v2662_v33, %v2669_v58  ;;  %v2691_v7 = vcombine.low %v2683_v59, %v2690_v8  ;;  %v8967_v53 = vld [vmem:[%s10348_s3 + $0xa0] sm:$0xff] }
 0x2bd   : > { %2598 = vst.msk [vmem:[#allocation3 + $0x2] ss:$8 sm:$0xf] %vm8726_vm11, %v2595_v60  ;;  %2599 = vst.msk [vmem:[#allocation3 + $0x2] ss:$8 sm:$0x10] %vm8726_vm11, %v2595_v60  ;;  %v2696_v17 = vcombine.high %v2662_v33, %v2669_v58  ;;  %v2701_v10 = vcombine.high %v2683_v59, %v2690_v8  ;;  %v2786_v16 = vcombine.high %v2549_v35, %v2550_v50 }
 0x2be   : > { %2624 = vst.msk [vmem:[#allocation3 + $0x6] ss:$8 sm:$0xf] %vm8726_vm11, %v2621_v61  ;;  %2625 = vst.msk [vmem:[#allocation3 + $0x6] ss:$8 sm:$0x10] %vm8726_vm11, %v2621_v61  ;;  %v2830_v46 = vcombine.high %v2808_v62, %v2808_v62  ;;  %v2734_v20 = vcombine.low %v2719_v54, %v2726_v19  ;;  %v2754_v22 = vcombine.high %v2719_v54, %v2726_v19 }
 0x2bf   : > { %2619 = vst.msk [vmem:[#allocation3 + $0x4] ss:$8 sm:$0xf] %vm8726_vm11, %v2616_v1  ;;  %2620 = vst.msk [vmem:[#allocation3 + $0x4] ss:$8 sm:$0x10] %vm8726_vm11, %v2616_v1  ;;  %v2801_v23 = vrot.slane %v2786_v16, %v7367_v45  ;;  %v2748_v21 = vrot.slane %v2733_v57, %v7367_v45  ;;  %v2769_v25 = vrot.slane %v2755_v11, %v7367_v45 }
 0x2c0   : > { %2629 = vst.msk [vmem:[#allocation3 + $0x28] ss:$8 sm:$0xf] %vm8726_vm11, %v2626_v38  ;;  %2630 = vst.msk [vmem:[#allocation3 + $0x28] ss:$8 sm:$0x10] %vm8726_vm11, %v2626_v38  ;;  %v2741_v29 = vrot.slane %v2734_v20, %v7367_v45  ;;  %v2762_v32 = vrot.slane %v2754_v22, %v7367_v45  ;;  %v2844_v36 = vrot.slane %v2830_v46, %v7367_v45 }
 0x2c1   : > { %2673 = vst.msk [vmem:[#allocation3 + $0x2a] ss:$8 sm:$0xf] %vm8726_vm11, %v2670_v2  ;;  %2674 = vst.msk [vmem:[#allocation3 + $0x2a] ss:$8 sm:$0x10] %vm8726_vm11, %v2670_v2  ;;  %v2809_v26 = vcombine.low %v2794_v18, %v2801_v23  ;;  %v2829_v3 = vcombine.high %v2794_v18, %v2801_v23  ;;  %v2823_v30 = vrot.slane %v2808_v62, %v7367_v45 }
 0x2c2   : > { %2694 = vst.msk [vmem:[#allocation3 + $0x2c] ss:$8 sm:$0xf] %vm8726_vm11, %v2691_v7  ;;  %2695 = vst.msk [vmem:[#allocation3 + $0x2c] ss:$8 sm:$0x10] %vm8726_vm11, %v2691_v7  ;;  %v2749_v13 = vcombine.low %v2741_v29, %v2748_v21  ;;  %v2770_v63 = vcombine.low %v2762_v32, %v2769_v25  ;;  %v2775_v0 = vcombine.high %v2741_v29, %v2748_v21 }
 0x2c3   : > { %2699 = vst.msk [vmem:[#allocation3 + $0x2e] ss:$8 sm:$0xf] %vm8726_vm11, %v2696_v17  ;;  %2700 = vst.msk [vmem:[#allocation3 + $0x2e] ss:$8 sm:$0x10] %vm8726_vm11, %v2696_v17  ;;  %v2780_v4 = vcombine.high %v2762_v32, %v2769_v25  ;;  %v2816_v28 = vrot.slane %v2809_v26, %v7367_v45  ;;  %v2837_v40 = vrot.slane %v2829_v3, %v7367_v45 }
 0x2c4   : > { %2704 = vst.msk [vmem:[#allocation3 + $0x50] ss:$8 sm:$0xf] %vm8726_vm11, %v2701_v10  ;;  %2705 = vst.msk [vmem:[#allocation3 + $0x50] ss:$8 sm:$0x10] %vm8726_vm11, %v2701_v10  ;;  %v6386_v49 = vpack.c.bf16 %v8892_v12, %v8887_v6  ;;  %v6388_v9 = vpack.c.bf16 %v8902_v39, %v8897_v37  ;;  %v9010_v7 = vpack.c.bf16 %v5188_v34, %v5187_v47 }
 0x2c5   : > { %2752 = vst.msk [vmem:[#allocation3 + $0x52] ss:$8 sm:$0xf] %vm8726_vm11, %v2749_v13  ;;  %2753 = vst.msk [vmem:[#allocation3 + $0x52] ss:$8 sm:$0x10] %vm8726_vm11, %v2749_v13  ;;  %v2824_v50 = vcombine.low %v2816_v28, %v2823_v30  ;;  %v2845_v43 = vcombine.low %v2837_v40, %v2844_v36  ;;  %v2850_v51 = vcombine.high %v2816_v28, %v2823_v30 }
 0x2c6   : > { %v8907_v24 = vld [vmem:[#allocation3 + $0x8] sm:$0xff]  ;;  %v8909_v44 = vld [vmem:[#allocation3 + $0x18] sm:$0xff]  ;;  %2773 = vst.msk [vmem:[#allocation3 + $0x54] ss:$8 sm:$0xf] %vm8726_vm11, %v2770_v63  ;;  %v2855_v52 = vcombine.high %v2837_v40, %v2844_v36  ;;  %v8941_v41 = vld [vmem:[#allocation3] sm:$0xff] }
 0x2c7   : > { %2774 = vst.msk [vmem:[#allocation3 + $0x54] ss:$8 sm:$0x10] %vm8726_vm11, %v2770_v63  ;;  %2778 = vst.msk [vmem:[#allocation3 + $0x56] ss:$8 sm:$0xf] %vm8726_vm11, %v2775_v0 }
 0x2c8   : > { %2779 = vst.msk [vmem:[#allocation3 + $0x56] ss:$8 sm:$0x10] %vm8726_vm11, %v2775_v0  ;;  %2783 = vst.msk [vmem:[#allocation3 + $0x78] ss:$8 sm:$0xf] %vm8726_vm11, %v2780_v4 }
 0x2c9   : > { %2784 = vst.msk [vmem:[#allocation3 + $0x78] ss:$8 sm:$0x10] %vm8726_vm11, %v2780_v4  ;;  %v3050_v48 = vrot.slane %v8907_v24, 1  ;;  %v3056_v27 = vrot.slane %v8909_v44, 1  ;;  %v8945_v55 = vld [vmem:[#allocation3 + $0x10] sm:$0xff] }
 0x2ca   : > { %v8930_v45 = vld [vmem:[#allocation3 + $0x30] sm:$0xff]  ;;  %v8933_v35 = vld [vmem:[#allocation3 + $0x40] sm:$0xff]  ;;  %v8943_v14 = vld [vmem:[#allocation3 + $0x28] sm:$0xff]  ;;  %10382 = vst [vmem:[#allocation5_spill] sm:$0xff] %v8945_v55  ;;  %v3047_v5 = vrot.slane %v8941_v41, 1  ;;  %v3053_v59 = vrot.slane %v8945_v55, 1 }
 0x2cb   : > { %10381 = vst [vmem:[#allocation4_spill] sm:$0xff] %v8933_v35  ;;  %v3051_v57 = vrot.slane %v8930_v45, 1  ;;  %v3057_v8 = vrot.slane %v8933_v35, 1  ;;  %v8955_v15 = vld [vmem:[#allocation3 + $0x38] sm:$0xff]  ;;  %v8962_v58 = vld [vmem:[%s10348_s3 + $0x18] sm:$0xff]  ;;  %v3048_v33 = vrot.slane %v8943_v14, 1 }
 0x2cc   : > { %10383 = vst [vmem:[#allocation6_spill] sm:$0xff] %v8955_v15  ;;  %2827 = vst.msk [vmem:[#allocation3 + $0x7a] ss:$8 sm:$0xf] %vm8726_vm11, %v2824_v50  ;;  %v3054_v60 = vrot.slane %v8955_v15, 1  ;;  %v3706_v61 = vrot.slane %v8907_v24, 2  ;;  %v6390_v20 = vpack.c.bf16 %v8962_v58, %v8950_v56 }
 0x2cd   : > { %2828 = vst.msk [vmem:[#allocation3 + $0x7a] ss:$8 sm:$0x10] %vm8726_vm11, %v2824_v50  ;;  %2848 = vst.msk [vmem:[#allocation3 + $0x7c] ss:$8 sm:$0xf] %vm8726_vm11, %v2845_v43  ;;  %v9002_v31 = vsel %vm337_vm3, %v3050_v48, %v3051_v57  ;;  %v9007_v38 = vsel %vm337_vm3, %v3056_v27, %v3057_v8  ;;  %v9030_v54 = vsel %vm337_vm3, %v3047_v5, %v3048_v33 }
 0x2ce   : > { %2849 = vst.msk [vmem:[#allocation3 + $0x7c] ss:$8 sm:$0x10] %vm8726_vm11, %v2845_v43  ;;  %2853 = vst.msk [vmem:[#allocation3 + $0x7e] ss:$8 sm:$0xf] %vm8726_vm11, %v2850_v51  ;;  %3180 = vmatprep.mubr.f32.mxu0 %v9002_v31  ;;  %3265 = vmatprep.mubr.f32.mxu1 %v9007_v38  ;;  %v9035_v19 = vsel %vm337_vm3, %v3053_v59, %v3054_v60 }
 0x2cf   : > { %2854 = vst.msk [vmem:[#allocation3 + $0x7e] ss:$8 sm:$0x10] %vm8726_vm11, %v2850_v51  ;;  %2858 = vst.msk [vmem:[#allocation3 + $0xa0] ss:$8 sm:$0xf] %vm8726_vm11, %v2855_v52  ;;  %3181 = vmatmul.mubr.f32.vlgmr.msra.gmra.mrb[14].mxu0 %v9030_v54  ;;  %3266 = vmatmul.mubr.f32.vlgmr.msra.gmra.mrb[14].mxu1 %v9035_v19 }
 0x2d0   : > { %2859 = vst.msk [vmem:[#allocation3 + $0xa0] ss:$8 sm:$0x10] %vm8726_vm11, %v2855_v52  ;;  %v8992_v62 = vld [vmem:[%s10348_s3 + $0xa8] sm:$0xff]  ;;  %v8997_v1 = vld [vmem:[%s10348_s3 + $0x20] sm:$0xff]  ;;  %v3707_v2 = vrot.slane %v8930_v45, 2  ;;  %6387 = vmatpush3.bf16.msra.mxu1 %v6386_v49  ;;  %6379 = vmatpush3.bf16.msra.mxu0 %v8718_v42 }
 0x2d1   : > { %v9015_v17 = vld [vmem:[%s10348_s3 + $0x28] sm:$0xff]  ;;  %v9020_v10 = vld [vmem:[%s10348_s3 + $0x180] sm:$0xff]  ;;  %v3709_v16 = vrot.slane %v8945_v55, 2  ;;  %v3710_v18 = vrot.slane %v8955_v15, 2  ;;  %v9051_v22 = vld [vmem:[%s10348_s3 + $0xb0] sm:$0xff]  ;;  %6389 = vmatprep.subr.bf16.mxu1 %v6388_v9  ;;  %6381 = vmatprep.subr.bf16.mxu0 %v9010_v7  ;;  %v3703_v47 = vrot.slane %v8941_v41, 2 }
 0x2d2   : > { %v9025_v11 = vld [vmem:[%s10348_s3 + $0x188] sm:$0xff]  ;;  %v9043_v46 = vsel %vm627_vm4, %v3706_v61, %v3707_v2  ;;  %v9056_v23 = vld [vmem:[%s10348_s3 + $0xb8] sm:$0xff]  ;;  %v9063_v29 = vld [vmem:[#allocation3 + $0x50] sm:$0xff]  ;;  %v10354_v48 = vrot.slane %v8943_v14, 2  ;;  %v10394_v15 = vpack.c.bf16 %v9015_v17, %v8997_v1 }
 0x2d3   : > { %10384 = vst [vmem:[#allocation7_spill] sm:$0xff] %v9043_v46  ;;  %v9059_v21 = vld [vmem:[#allocation3 + $0x58] sm:$0xff]  ;;  %v9061_v25 = vld [vmem:[#allocation3 + $0x68] sm:$0xff]  ;;  %v9072_v3 = vld [vmem:[%s10348_s3 + $0x30] sm:$0xff]  ;;  %v6416_v12 = vpack.c.bf16 %v9025_v11, %v9020_v10  ;;  %v9098_v0 = vsel %vm627_vm4, %v3709_v16, %v3710_v18  ;;  %v3062_v39 = vrot.slane %v9063_v29, 1  ;;  %v6396_v61 = vpack.c.bf16 %v9056_v23, %v9051_v22 }
 0x2d4   : > { %v9077_v42 = vld [vmem:[%s10348_s3 + $0x38] sm:$0xff]  ;;  %v9082_v36 = vld [vmem:[%s10348_s3 + $0xc0] sm:$0xff]  ;;  %v9087_v6 = vld [vmem:[%s10348_s3 + $0xc8] sm:$0xff]  ;;  %10385 = vst [vmem:[#allocation8_spill] sm:$0xff] %v9098_v0  ;;  %v3064_v4 = vrot.slane %v9059_v21, 1  ;;  %v3068_v37 = vrot.slane %v9061_v25, 1  ;;  %v6721_v28 = vpack.i.bf16 %v9098_v0, %v9043_v46  ;;  %6383 = vmatpush3.bf16.msra.mxu0 %v9010_v7  ;;  %6391 = vmatpush3.bf16.msra.mxu1 %v6390_v20  ;;  %v9205_v22 = vsel %vm627_vm4, %v3703_v47, %v10354_v48 }
 0x2d5   : > { %v9091_v13 = vld [vmem:[#allocation3 + $0x20] sm:$0xff]  ;;  %v9093_v63 = vld [vmem:[#allocation3 + $0x48] sm:$0xff]  ;;  %v9114_v27 = vld [vmem:[%s10348_s3 + $0x40] sm:$0xff]  ;;  %v9137_v51 = vsel %vm337_vm3, %v3048_v33, %v3062_v39  ;;  %v10352_v56 = vrot.slane %v9059_v21, 2  ;;  %10391 = vst [vmem:[#allocation14_spill] sm:$0xff] %v9205_v22  ;;  %6417 = vmatprep.subr.bf16.mxu0 %v6416_v12  ;;  %v10393_v7 = vpack.c.bf16 %v8992_v62, %v8967_v53 }
 0x2d6   : > { %v9103_v30 = vld [vmem:[#allocation3 + $0x60] sm:$0xff]  ;;  %v9119_v49 = vld [vmem:[%s10348_s3 + $0x48] sm:$0xff]  ;;  %v9124_v34 = vld [vmem:[%s10348_s3 + $0x100] sm:$0xff]  ;;  %v9129_v50 = vsel %vm337_vm3, %v3051_v57, %v3064_v4  ;;  %v9134_v43 = vsel %vm337_vm3, %v3057_v8, %v3068_v37  ;;  %v3059_v8 = vrot.slane %v9091_v13, 1  ;;  %v10353_v9 = vrot.slane %v9093_v63, 1  ;;  %6722 = vrot.lane.b32.xlu0 %v6721_v28, %s6829_s28 }
 0x2d7   : > { %10386 = vst [vmem:[#allocation9_spill] sm:$0xff] %v9103_v30  ;;  %v3066_v40 = vrot.slane %v9103_v30, 1  ;;  %v9139_v52 = vld [vmem:[#allocation3 + $0x90] sm:$0xff]  ;;  %v9145_v5 = vld [vmem:[%s10348_s3 + $0x108] sm:$0xff]  ;;  %v9150_v57 = vld [vmem:[%s10348_s3 + $0xd0] sm:$0xff]  ;;  %3185 = vmatprep.mubr.f32.mxu0 %v9129_v50  ;;  %3270 = vmatprep.mubr.f32.mxu1 %v9134_v43  ;;  %v9191_v28 = vsel %vm627_vm4, %v3707_v2, %v10352_v56  ;;  %v3722_v26 = vrot.slane %v9103_v30, 2 }
 0x2d8   : > { %v9161_v33 = vld [vmem:[#allocation3 + $0x80] sm:$0xff]  ;;  %v9163_v59 = vld [vmem:[#allocation3 + $0x78] sm:$0xff]  ;;  %v9170_v10 = vld [vmem:[%s10348_s3 + $0xd8] sm:$0xff]  ;;  %3186 = vmatmul.mubr.f32.gmra.mrb[16].mxu0 %v9137_v51  ;;  %v9175_v11 = vrot.slane %v9139_v52, 1  ;;  %10390 = vst [vmem:[#allocation13_spill] sm:$0xff] %v9191_v28  ;;  %v9219_v20 = vsel %vm337_vm3, %v3059_v8, %v10353_v9  ;;  %6393 = vmatprep.subr.bf16.mxu1 %v10393_v7  ;;  %v3712_v9 = vrot.slane %v8909_v44, 2 }
 0x2d9   : > { %v9159_v58 = vsel %vm337_vm3, %v3054_v60, %v3066_v40  ;;  %10387 = vst [vmem:[#allocation10_spill] sm:$0xff] %v9163_v59  ;;  %v9177_v60 = vld [vmem:[#allocation3 + $0x88] sm:$0xff]  ;;  %v9195_v32 = vrot.slane %v9161_v33, 1  ;;  %v9197_v16 = vld [vmem:[#allocation3 + $0xb8] sm:$0x3]  ;;  %v9212_v56 = vrot.slane %v9163_v59, 1  ;;  %6395 = vmatpush3.bf16.msra.mxu1 %v10394_v15 }
 0x2da   : > { %10388 = vst [vmem:[#allocation11_spill] sm:$0xff] %v9175_v11  ;;  %10389 = vst [vmem:[#allocation12_spill] sm:$0xff] %v9177_v60  ;;  %3271 = vmatmul.mubr.f32.gmra.mrb[16].mxu1 %v9159_v58  ;;  %v9209_v2 = vsel %vm337_vm3, %v3068_v37, %v9175_v11  ;;  %4177 = vrot.lane.b32.xlu0 %v9205_v22, %s6829_s28  ;;  %v9227_v37 = vsel %vm627_vm4, %v3710_v18, %v3722_v26  ;;  %v9234_v47 = vrot.slane %v9177_v60, 1  ;;  %v2880_v62 = vld [vmem:[#allocation3 + $0xa0] sm:$0x3]  ;;  %v9263_v30 = vld [vmem:[#allocation3 + $0x70] sm:$0xff] }
 0x2db   : > { %3275 = vmatprep.mubr.f32.mxu1 %v9209_v2  ;;  %10392 = vst [vmem:[#allocation15_spill] sm:$0xff] %v9227_v37  ;;  %v9231_v12 = vsel %vm337_vm3, %v3064_v4, %v9195_v32  ;;  %v6726_v8 = vpack.i.bf16 %v9227_v37, %v9191_v28  ;;  %v9244_v18 = vsel %vm337_vm3, %v3062_v39, %v9212_v56  ;;  %v3088_v23 = vrot.slane %v9197_v16, 1  ;;  %v2881_v4 = vld [vmem:[#allocation3 + $0xa8] sm:$0x3] }
 0x2dc   : > { %3190 = vmatprep.mubr.f32.mxu0 %v9231_v12  ;;  %v9251_v48 = vsel %vm337_vm3, %v3066_v40, %v9234_v47  ;;  %v3718_v37 = vrot.slane %v9063_v29, 2  ;;  %v3728_v53 = vrot.slane %v9163_v59, 2  ;;  %v3713_v7 = vrot.slane %v8933_v35, 2  ;;  %v2882_v40 = vld [vmem:[#allocation3 + $0xb0] sm:$0x3]  ;;  %6397 = vmatprep.subr.bf16.mxu1 %v6396_v61 }
 0x2dd   : > { %3191 = vmatmul.mubr.f32.gmra.mrb[18].mxu0 %v9244_v18  ;;  %6727 = vrot.lane.b32.xlu1 %v6726_v8, %s6829_s28  ;;  %v3089_v39 = vsel %vm337_vm3, %v9175_v11, %v3088_v23  ;;  %v3732_v0 = vrot.slane %v9177_v60, 2  ;;  %v3730_v28 = vrot.slane %v9161_v33, 2  ;;  %v3716_v22 = vrot.slane %v9093_v63, 2 }
 0x2de   : > { %3276 = vmatmul.mubr.f32.gmra.mrb[18].mxu1 %v9251_v48  ;;  %v9269_v8 = vsel %vm627_vm4, %v3718_v37, %v3728_v53  ;;  %v10396_v35 = vrot.slane %v8943_v14, 2  ;;  %v3084_v60 = vrot.slane %v2881_v4, 1  ;;  %v3740_v55 = vrot.slane %v2881_v4, 2 }
 0x2df   : > { %3280 = vmatprep.mubr.f32.mxu1 %v3089_v39  ;;  %10395 = vst [vmem:[#allocation16_spill] sm:$0xff] %v9269_v8  ;;  %v9277_v46 = vsel %vm627_vm4, %v3722_v26, %v3732_v0  ;;  %v10399_v59 = vrot.slane %v9059_v21, 2  ;;  %v3082_v15 = vrot.slane %v2880_v62, 1  ;;  %v3738_v1 = vrot.slane %v2880_v62, 2  ;;  %v9290_v26 = vld [vmem:[#allocation3 + $0x98] sm:$0xff] }
 0x2e0   : > { %v9274_v23 = vsel %vm627_vm4, %v10396_v35, %v3718_v37  ;;  %10398 = vst [vmem:[#allocation18_spill] sm:$0xff] %v9277_v46  ;;  %v6736_v17 = vpack.i.bf16 %v9269_v8, %v9277_v46  ;;  %v3085_v37 = vsel %vm337_vm3, %v9195_v32, %v3084_v60  ;;  %v3086_v4 = vrot.slane %v2882_v40, 1 }
 0x2e1   : > { %10397 = vst [vmem:[#allocation17_spill] sm:$0xff] %v9274_v23  ;;  %v9282_v11 = vsel %vm627_vm4, %v10399_v59, %v3730_v28  ;;  %v3070_v39 = vrot.slane %v9263_v30, 1  ;;  %3195 = vmatprep.mubr.f32.mxu0 %v3085_v37  ;;  %v3083_v59 = vsel %vm337_vm3, %v9212_v56, %v3082_v15  ;;  %v3742_v61 = vrot.slane %v2882_v40, 2  ;;  %v2936_v40 = vld [vmem:[%s10348_s3 + $0x198] sm:$0xff]  ;;  %v9315_v15 = vld [vmem:[#allocation3 + $0xc0] sm:$0x3] }
 0x2e2   : > { %10400 = vst [vmem:[#allocation19_spill] sm:$0xff] %v9282_v11  ;;  %v6731_v35 = vpack.i.bf16 %v9282_v11, %v9274_v23  ;;  %v9296_v62 = vsel %vm627_vm4, %v3728_v53, %v3738_v1  ;;  %6737 = vrot.lane.b32.xlu0 %v6736_v17, %s6829_s28  ;;  %v3087_v60 = vsel %vm337_vm3, %v9234_v47, %v3086_v4  ;;  %v3724_v37 = vrot.slane %v9061_v25, 2  ;;  %v2935_v53 = vld [vmem:[%s10348_s3 + $0x190] sm:$0xff] }
 0x2e3   : > { %10401 = vst [vmem:[#allocation20_spill] sm:$0xff] %v9296_v62  ;;  %v9303_v46 = vsel %vm627_vm4, %v3712_v9, %v3713_v7  ;;  %v9306_v8 = vsel %vm627_vm4, %v3730_v28, %v3740_v55  ;;  %3196 = vmatmul.mubr.f32.gmra.mrb[20].mxu0 %v3083_v59  ;;  %3281 = vmatmul.mubr.f32.gmra.mrb[20].mxu1 %v3087_v60  ;;  %v3726_v55 = vrot.slane %v9263_v30, 2  ;;  %v3734_v28 = vrot.slane %v9139_v52, 2  ;;  %v2895_v17 = vld [vmem:[%s10348_s3 + $0x50] sm:$0xff]  ;;  %v2896_v60 = vld [vmem:[%s10348_s3 + $0x58] sm:$0xff] }
 0x2e4   : > { %6732 = vrot.lane.b32.xlu1 %v6731_v35, %s6829_s28  ;;  %10402 = vst [vmem:[#allocation21_spill] sm:$0xff] %v9303_v46  ;;  %10403 = vst [vmem:[#allocation22_spill] sm:$0xff] %v9306_v8  ;;  %v9318_v9 = vsel %vm627_vm4, %v3732_v0, %v3742_v61  ;;  %v3715_v1 = vrot.slane %v9091_v13, 2  ;;  %v9328_v4 = vrot.slane %v9290_v26, 1  ;;  %v10405_v59 = vpack.c.bf16 %v9077_v42, %v9072_v3  ;;  %v2919_v35 = vld [vmem:[%s10348_s3 + $0x110] sm:$0xff]  ;;  %v2920_v3 = vld [vmem:[%s10348_s3 + $0x118] sm:$0xff] }
 0x2e5   : > { %10404 = vst [vmem:[#allocation23_spill] sm:$0xff] %v9318_v9  ;;  %3443 = vmatprep.mubr.f32.mxu1 %v8907_v24  ;;  %v6746_v0 = vpack.i.bf16 %v9303_v46, %v9296_v62  ;;  %v6741_v61 = vpack.i.bf16 %v9318_v9, %v9306_v8  ;;  %v3744_v24 = vrot.slane %v9197_v16, 2  ;;  %5810 = vmatprep.mubr.msk.f32.mxu0 %vm277_vm9, %v9219_v20  ;;  %v10407_v8 = vrot.slane %v9093_v63, 1  ;;  %v2938_v46 = vld [vmem:[%s10348_s3 + $0x1a8] sm:$0xff] }
 0x2e6   : > { %6399 = vmatpush3.bf16.msra.mxu1 %v10405_v59  ;;  %v10406_v42 = vpack.c.bf16 %v9087_v6, %v9082_v36  ;;  %v9354_v59 = vsel %vm627_vm4, %v3716_v22, %v3726_v55  ;;  %v9357_v9 = vsel %vm627_vm4, %v3724_v37, %v3734_v28  ;;  %v9360_v62 = vsel %vm627_vm4, %v3713_v7, %v3724_v37  ;;  %v2913_v6 = vld [vmem:[%s10348_s3 + $0xe0] sm:$0xff]  ;;  %v2914_v7 = vld [vmem:[%s10348_s3 + $0xe8] sm:$0xff] }
 0x2e7   : > { %v9365_v16 = vsel %vm337_vm3, %v10407_v8, %v3070_v39  ;;  %6747 = vrot.lane.b32.xlu0 %v6746_v0, %s6829_s28  ;;  %v3090_v36 = vrot.slane %v9315_v15, 1  ;;  %v9379_v8 = vsel %vm627_vm4, %v3715_v1, %v3716_v22  ;;  %v6420_v37 = vpack.c.bf16 %v2936_v40, %v2935_v53  ;;  %v2897_v1 = vld [vmem:[%s10348_s3 + $0x60] sm:$0xff] }
 0x2e8   : > { %6401 = vmatprep.subr.bf16.mxu1 %v10406_v42  ;;  %6742 = vrot.lane.b32.xlu1 %v6741_v61, %s6829_s28  ;;  %v6406_v0 = vpack.c.bf16 %v2896_v60, %v2895_v17  ;;  %v6422_v42 = vpack.c.bf16 %v2920_v3, %v2919_v35  ;;  %v2937_v61 = vld [vmem:[%s10348_s3 + $0x1a0] sm:$0xff]  ;;  %v9389_v11 = vsel %vm337_vm3, %v3070_v39, %v9328_v4  ;;  %v2898_v39 = vld [vmem:[%s10348_s3 + $0x68] sm:$0xff]  ;;  %v2915_v60 = vld [vmem:[%s10348_s3 + $0xf0] sm:$0xff] }
 0x2e9   : > { %5811 = vmatmul.mubr.msk.f32.vlgmr.msra.gmra.mrb[22].mxu0 %vm277_vm9, %v9365_v16  ;;  %v10408_v23 = vpack.c.bf16 %v9119_v49, %v9114_v27  ;;  %v10409_v22 = vpack.c.bf16 %v9145_v5, %v9124_v34  ;;  %v6756_v53 = vpack.i.bf16 %v9357_v9, %v9354_v59  ;;  %v6751_v40 = vpack.i.bf16 %v9360_v62, %v9379_v8  ;;  %v2921_v27 = vld [vmem:[%s10348_s3 + $0x120] sm:$0xff] }
 0x2ea   : > { %v3746_v49 = vrot.slane %v9315_v15, 2  ;;  %5813 = vmatprep.mubr.msk.f32.mxu0 %vm277_vm9, %v9389_v11  ;;  %v10410_v34 = vpack.c.bf16 %v9170_v10, %v9150_v57  ;;  %v10411_v5 = vrot.slane %v9290_v26, 2  ;;  %v9422_v17 = vsel %vm627_vm4, %v3734_v28, %v3744_v24  ;;  %v2922_v15 = vld [vmem:[%s10348_s3 + $0x128] sm:$0xff]  ;;  %v2916_v57 = vld [vmem:[%s10348_s3 + $0xf8] sm:$0xff] }
 0x2eb   : > { %6403 = vmatpush3.bf16.msra.mxu1 %v10408_v23  ;;  %6419 = vmatpush3.bf16.msra.mxu0 %v10409_v22  ;;  %v6408_v35 = vpack.c.bf16 %v2914_v7, %v2913_v6  ;;  %v3091_v10 = vsel %vm337_vm3, %v9328_v4, %v3090_v36  ;;  %v2940_v28 = vld [vmem:[%s10348_s3 + $0x1b8] sm:$0xff]  ;;  %v6424_v3 = vpack.c.bf16 %v2938_v46, %v2937_v61  ;;  %v2899_v22 = vld [vmem:[%s10348_s3 + $0x70] sm:$0xff] }
 0x2ec   : > { %6405 = vmatprep.subr.bf16.mxu1 %v10410_v34  ;;  %v9419_v23 = vsel %vm627_vm4, %v3726_v55, %v10411_v5  ;;  %6757 = vrot.lane.b32.xlu0 %v6756_v53, %s6829_s28  ;;  %v2939_v55 = vld [vmem:[%s10348_s3 + $0x1b0] sm:$0xff]  ;;  %v6410_v24 = vpack.c.bf16 %v2898_v39, %v2897_v1  ;;  %v6771_v6 = vpack.i.bf16 %v9219_v20, %v9007_v38  ;;  %v2924_v61 = vld [vmem:[%s10348_s3 + $0x138] sm:$0xff]  ;;  %v2941_v53 = vld [vmem:[%s10348_s3 + $0x1c0] sm:$0xff] }
 0x2ed   : > { %6752 = vrot.lane.b32.xlu1 %v6751_v40, %s6829_s28  ;;  %6421 = vmatprep.subr.bf16.mxu0 %v6420_v37  ;;  %v6761_v36 = vpack.i.bf16 %v9422_v17, %v9419_v23  ;;  %v6426_v7 = vpack.c.bf16 %v2922_v15, %v2921_v27  ;;  %v2900_v37 = vld [vmem:[%s10348_s3 + $0x78] sm:$0xff]  ;;  %v2923_v46 = vld [vmem:[%s10348_s3 + $0x130] sm:$0xff]  ;;  %v10412_v38 = vmov %v10411_v5  ;;  %v2942_v40 = vld [vmem:[%s10348_s3 + $0x1c8] sm:$0xff] }
 0x2ee   : > { %5814 = vmatmul.mubr.msk.f32.gmra.mrb[24].mxu0 %vm277_vm9, %v3091_v10  ;;  %v9460_v20 = vsel %vm627_vm4, %v10412_v38, %v3746_v49  ;;  %v5214_v1 = vld [vmem:[%s10348_s3 + $0x4c8] sm:$0xff]  ;;  %v6414_v39 = vpack.c.bf16 %v2900_v37, %v2899_v22  ;;  %v6766_v49 = vpack.i.bf16 %v9030_v54, %v9035_v19  ;;  %v6430_v34 = vpack.c.bf16 %v2924_v61, %v2923_v46  ;;  %v2925_v5 = vld [vmem:[%s10348_s3 + $0x140] sm:$0xff]  ;;  %v2943_v19 = vld [vmem:[%s10348_s3 + $0x1d0] sm:$0xff] }
 0x2ef   : > { %6407 = vmatpush3.bf16.msra.mxu1 %v6406_v0  ;;  %6423 = vmatpush3.bf16.msra.mxu0 %v6422_v42  ;;  %v6412_v0 = vpack.c.bf16 %v2916_v57, %v2915_v60  ;;  %v6428_v42 = vpack.c.bf16 %v2940_v28, %v2939_v55  ;;  %v6776_v27 = vpack.i.bf16 %v9002_v31, %v9460_v20  ;;  %v2926_v60 = vld [vmem:[%s10348_s3 + $0x148] sm:$0xff]  ;;  %v5197_v31 = vld [vmem:[%s10348_s3 + $0x440] sm:$0xff]  ;;  %v2944_v57 = vld [vmem:[%s10348_s3 + $0x1d8] sm:$0xff] }
 0x2f0   : > { %3528 = vmatprep.mubr.f32.mxu0 %v8909_v44  ;;  %6409 = vmatprep.subr.bf16.mxu1 %v6408_v35  ;;  %v5213_v44 = vld [vmem:[%s10348_s3 + $0x4c0] sm:$0xff]  ;;  %v6432_v35 = vpack.c.bf16 %v2942_v40, %v2941_v53  ;;  %v5198_v54 = vld [vmem:[%s10348_s3 + $0x448] sm:$0xff]  ;;  %v6786_v10 = vpack.i.bf16 %v9134_v43, %v9137_v51  ;;  %v6781_v55 = vpack.i.bf16 %v9159_v58, %v9129_v50  ;;  %v2928_v50 = vld [vmem:[%s10348_s3 + $0x158] sm:$0xff] }
 0x2f1   : > { %6772 = vrot.lane.b32.xlu0 %v6771_v6, %s6829_s28  ;;  %6762 = vrot.lane.b32.xlu1 %v6761_v36, %s6829_s28  ;;  %v6456_v15 = vpack.c.bf16 %v5214_v1, %v5213_v44  ;;  %v6434_v28 = vpack.c.bf16 %v2926_v60, %v2925_v5  ;;  %v2927_v6 = vld [vmem:[%s10348_s3 + $0x150] sm:$0xff]  ;;  %v6458_v43 = vpack.c.bf16 %v5198_v54, %v5197_v31  ;;  %v5200_v36 = vld [vmem:[%s10348_s3 + $0x458] sm:$0xff] }
 0x2f2   : > { %6425 = vmatprep.subr.bf16.mxu0 %v6424_v3  ;;  %v5215_v3 = vld [vmem:[%s10348_s3 + $0x4d0] sm:$0xff]  ;;  %v6436_v51 = vpack.c.bf16 %v2944_v57, %v2943_v19  ;;  %v2946_v22 = vld [vmem:[%s10348_s3 + $0x1e8] sm:$0xff]  ;;  %v6791_v46 = vpack.i.bf16 %v9231_v12, %v9365_v16  ;;  %v6796_v38 = vpack.i.bf16 %v9244_v18, %v9251_v48  ;;  %v5201_v18 = vld [vmem:[%s10348_s3 + $0x460] sm:$0xff]  ;;  %v6806_v1 = vpack.i.bf16 %v9389_v11, %v9209_v2 }
 0x2f3   : > { %6411 = vmatpush3.bf16.msra.mxu1 %v6410_v24  ;;  %6427 = vmatpush3.bf16.msra.mxu0 %v6426_v7  ;;  %v5216_v24 = vld [vmem:[%s10348_s3 + $0x4d8] sm:$0xff]  ;;  %v5199_v58 = vld [vmem:[%s10348_s3 + $0x450] sm:$0xff]  ;;  %v2945_v7 = vld [vmem:[%s10348_s3 + $0x1e0] sm:$0xff] }
 0x2f4   : > { %6413 = vmatprep.subr.bf16.mxu1 %v6412_v0  ;;  %6429 = vmatprep.subr.bf16.mxu0 %v6428_v42  ;;  %v6460_v37 = vpack.c.bf16 %v5216_v24, %v5215_v3  ;;  %v6438_v0 = vpack.c.bf16 %v2928_v50, %v2927_v6  ;;  %v5217_v42 = vld [vmem:[%s10348_s3 + $0x4e0] sm:$0xff]  ;;  %v5218_v61 = vld [vmem:[%s10348_s3 + $0x4e8] sm:$0xff]  ;;  %v6462_v12 = vpack.c.bf16 %v5200_v36, %v5199_v58  ;;  %v2947_v53 = vld [vmem:[%s10348_s3 + $0x1f0] sm:$0xff] }
 0x2f5   : > { %6777 = vrot.lane.b32.xlu0 %v6776_v27, %s6829_s28  ;;  %6767 = vrot.lane.b32.xlu1 %v6766_v49, %s6829_s28  ;;  %v6440_v48 = vpack.c.bf16 %v2946_v22, %v2945_v7  ;;  %v5202_v16 = vld [vmem:[%s10348_s3 + $0x468] sm:$0xff]  ;;  %v2948_v40 = vld [vmem:[%s10348_s3 + $0x1f8] sm:$0xff]  ;;  %v6464_v44 = vpack.c.bf16 %v5218_v61, %v5217_v42  ;;  %v10413_v54 = vld [vmem:[#allocation11_spill] sm:$0xff] }
 0x2f6   : > { %v5219_v49 = vld [vmem:[%s10348_s3 + $0x4f0] sm:$0xff]  ;;  %v6444_v11 = vpack.c.bf16 %v2948_v40, %v2947_v53  ;;  %v2949_v5 = vld [vmem:[%s10348_s3 + $0x200] sm:$0xff]  ;;  %v5222_v31 = vld [vmem:[%s10348_s3 + $0x508] sm:$0xff]  ;;  %v6811_v19 = vpack.i.bf16 %v10413_v54, %v9212_v56 }
 0x2f7   : > { %6415 = vmatpush3.bf16.msra.mxu1 %v6414_v39  ;;  %6431 = vmatpush3.bf16.msra.mxu0 %v6430_v34  ;;  %v6801_v39 = vpack.i.bf16 %v9234_v47, %v9195_v32  ;;  %v2931_v34 = vld [vmem:[%s10348_s3 + $0x170] sm:$0xff]  ;;  %v2932_v32 = vld [vmem:[%s10348_s3 + $0x178] sm:$0xff]  ;;  %v5221_v60 = vld [vmem:[%s10348_s3 + $0x500] sm:$0xff] }
 0x2f8   : > { %6433 = vmatprep.subr.bf16.mxu0 %v6432_v35  ;;  %6457 = vmatprep.subr.bf16.mxu1 %v6456_v15  ;;  %v5203_v2 = vld [vmem:[%s10348_s3 + $0x470] sm:$0xff]  ;;  %v5204_v47 = vld [vmem:[%s10348_s3 + $0x478] sm:$0xff]  ;;  %v2950_v35 = vld [vmem:[%s10348_s3 + $0x208] sm:$0xff]  ;;  %v6446_v57 = vpack.c.bf16 %v2932_v32, %v2931_v34 }
 0x2f9   : > { %6782 = vrot.lane.b32.xlu1 %v6781_v55, %s6829_s28  ;;  %6787 = vrot.lane.b32.xlu0 %v6786_v10, %s6829_s28  ;;  %v6448_v10 = vpack.c.bf16 %v2950_v35, %v2949_v5  ;;  %v5205_v55 = vld [vmem:[%s10348_s3 + $0x480] sm:$0xff]  ;;  %v2951_v56 = vld [vmem:[%s10348_s3 + $0x210] sm:$0xff]  ;;  %v10414_v24 = vld [vmem:[#allocation10_spill] sm:$0xff] }
 0x2fa   : > { %3444 = vmatmul.mubr.f32.vlgmr.msra.gmra.mrb[22].mxu1 %v8941_v41  ;;  %v2929_v41 = vld [vmem:[%s10348_s3 + $0x160] sm:$0xff]  ;;  %v2952_v3 = vld [vmem:[%s10348_s3 + $0x218] sm:$0xff]  ;;  %v5223_v6 = vld [vmem:[%s10348_s3 + $0x510] sm:$0xff] }
 0x2fb   : > { %3448 = vmatprep.mubr.f32.mxu1 %v8930_v45  ;;  %6435 = vmatpush3.bf16.msra.mxu0 %v6434_v28  ;;  %v2930_v45 = vld [vmem:[%s10348_s3 + $0x168] sm:$0xff]  ;;  %v5207_v50 = vld [vmem:[%s10348_s3 + $0x490] sm:$0xff]  ;;  %v6452_v58 = vpack.c.bf16 %v2952_v3, %v2951_v56  ;;  %v5208_v7 = vld [vmem:[%s10348_s3 + $0x498] sm:$0xff] }
 0x2fc   : > { %6459 = vmatpush3.bf16.msra.mxu1 %v6458_v43  ;;  %6437 = vmatprep.subr.bf16.mxu0 %v6436_v51  ;;  %v6442_v27 = vpack.c.bf16 %v2930_v45, %v2929_v41  ;;  %v5206_v28 = vld [vmem:[%s10348_s3 + $0x488] sm:$0xff]  ;;  %v10415_v43 = vld [vmem:[#allocation7_spill] sm:$0xff]  ;;  %v5245_v22 = vld [vmem:[%s10348_s3 + $0x5c0] sm:$0xff]  ;;  %v6478_v61 = vpack.c.bf16 %v5208_v7, %v5207_v50 }
 0x2fd   : > { %6792 = vrot.lane.b32.xlu1 %v6791_v46, %s6829_s28  ;;  %6797 = vrot.lane.b32.xlu0 %v6796_v38, %s6829_s28  ;;  %v6474_v51 = vpack.c.bf16 %v5206_v28, %v5205_v55  ;;  %v10416_v46 = vld [vmem:[#allocation5_spill] sm:$0xff]  ;;  %v10417_v42 = vld [vmem:[#allocation4_spill] sm:$0xff]  ;;  %v5210_v45 = vld [vmem:[%s10348_s3 + $0x4a8] sm:$0xff] }
 0x2fe   : > { %3449 = vmatmul.mubr.f32.gmra.mrb[24].mxu1 %v8943_v14  ;;  %6461 = vmatprep.subr.bf16.mxu1 %v6460_v37  ;;  %v5220_v14 = vld [vmem:[%s10348_s3 + $0x4f8] sm:$0xff]  ;;  %v5246_v37 = vld [vmem:[%s10348_s3 + $0x5c8] sm:$0xff]  ;;  %v5225_v38 = vld [vmem:[%s10348_s3 + $0x520] sm:$0xff] }
 0x2ff   : > { %3453 = vmatprep.mubr.f32.mxu1 %v9059_v21  ;;  %6439 = vmatpush3.bf16.msra.mxu0 %v6438_v0  ;;  %v6466_v21 = vpack.c.bf16 %v5202_v16, %v5201_v18  ;;  %v6468_v15 = vpack.c.bf16 %v5220_v14, %v5219_v49  ;;  %v5226_v0 = vld [vmem:[%s10348_s3 + $0x528] sm:$0xff]  ;;  %v6488_v41 = vpack.c.bf16 %v5246_v37, %v5245_v22  ;;  %v5227_v16 = vld [vmem:[%s10348_s3 + $0x530] sm:$0xff]  ;;  %v5228_v53 = vld [vmem:[%s10348_s3 + $0x538] sm:$0xff] }
 0x300   : > { %6463 = vmatpush3.bf16.msra.mxu1 %v6462_v12  ;;  %6441 = vmatprep.subr.bf16.mxu0 %v6440_v48  ;;  %v6480_v12 = vpack.c.bf16 %v5226_v0, %v5225_v38  ;;  %v5209_v48 = vld [vmem:[%s10348_s3 + $0x4a0] sm:$0xff]  ;;  %v10418_v18 = vld [vmem:[#allocation6_spill] sm:$0xff]  ;;  %v5232_v54 = vld [vmem:[%s10348_s3 + $0x558] sm:$0xff] }
 0x301   : > { %6807 = vrot.lane.b32.xlu1 %v6806_v1, %s6829_s28  ;;  %6802 = vrot.lane.b32.xlu0 %v6801_v39, %s6829_s28  ;;  %v6482_v40 = vpack.c.bf16 %v5210_v45, %v5209_v48  ;;  %v5211_v1 = vld [vmem:[%s10348_s3 + $0x4b0] sm:$0xff]  ;;  %v5212_v39 = vld [vmem:[%s10348_s3 + $0x4b8] sm:$0xff]  ;;  %v10423_v22 = vld [vmem:[#allocation17_spill] sm:$0xff] }
 0x302   : > { %3454 = vmatmul.mubr.f32.gmra.mrb[26].mxu1 %v9063_v29  ;;  %6465 = vmatprep.subr.bf16.mxu1 %v6464_v44  ;;  %v6470_v29 = vpack.c.bf16 %v5204_v47, %v5203_v2  ;;  %v6484_v44 = vpack.c.bf16 %v5228_v53, %v5227_v16  ;;  %v5286_v49 = vld [vmem:[%s10349_s4 + $0x288] sm:$0xff]  ;;  %v6486_v14 = vpack.c.bf16 %v5212_v39, %v5211_v1  ;;  %v5229_v34 = vld [vmem:[%s10348_s3 + $0x540] sm:$0xff]  ;;  %v10420_v2 = vld [vmem:[#allocation12_spill] sm:$0xff] }
 0x303   : > { %3458 = vmatprep.mubr.f32.mxu1 %v9161_v33  ;;  %6443 = vmatpush3.bf16.msra.mxu0 %v6442_v27  ;;  %v6472_v33 = vpack.c.bf16 %v5222_v31, %v5221_v60  ;;  %v10419_v27 = vld [vmem:[#allocation9_spill] sm:$0xff]  ;;  %v5270_v5 = vld [vmem:[%s10349_s4 + $0x208] sm:$0xff]  ;;  %v5288_v60 = vld [vmem:[%s10349_s4 + $0x298] sm:$0xff] }
 0x304   : > { %6467 = vmatpush3.bf16.msra.mxu1 %v6466_v21  ;;  %6445 = vmatprep.subr.bf16.mxu0 %v6444_v11  ;;  %v5230_v21 = vld [vmem:[%s10348_s3 + $0x548] sm:$0xff]  ;;  %v5247_v11 = vld [vmem:[%s10348_s3 + $0x5d0] sm:$0xff]  ;;  %v5269_v47 = vld [vmem:[%s10349_s4 + $0x200] sm:$0xff] }
 0x305   : > { %6812 = vrot.lane.b32.xlu1 %v6811_v19, %s6829_s28  ;;  %4458 = vrot.lane.b32.xlu0 %v9328_v4, %s6829_s28  ;;  %v5224_v4 = vld [vmem:[%s10348_s3 + $0x518] sm:$0xff]  ;;  %v6490_v35 = vpack.c.bf16 %v5230_v21, %v5229_v34  ;;  %v5231_v31 = vld [vmem:[%s10348_s3 + $0x550] sm:$0xff]  ;;  %v10425_v0 = vld [vmem:[#allocation21_spill] sm:$0xff] }
 0x306   : > { %3459 = vmatmul.mubr.f32.gmra.mrb[28].mxu1 %v10414_v24  ;;  %6469 = vmatprep.subr.bf16.mxu1 %v6468_v15  ;;  %v6476_v36 = vpack.c.bf16 %v5224_v4, %v5223_v6  ;;  %v5287_v15 = vld [vmem:[%s10349_s4 + $0x290] sm:$0xff]  ;;  %v5272_v28 = vld [vmem:[%s10349_s4 + $0x218] sm:$0xff]  ;;  %v6494_v56 = vpack.c.bf16 %v5232_v54, %v5231_v31  ;;  %v5290_v3 = vld [vmem:[%s10349_s4 + $0x2a8] sm:$0xff] }
 0x307   : > { %6447 = vmatpush3.bf16.msra.mxu0 %v6446_v57  ;;  %3836 = vmatprep.mubr.f32.mxu1 %v10415_v43  ;;  %v6530_v57 = vpack.c.bf16 %v5270_v5, %v5269_v47  ;;  %v5271_v55 = vld [vmem:[%s10349_s4 + $0x210] sm:$0xff]  ;;  %v10422_v24 = vld [vmem:[#allocation13_spill] sm:$0xff]  ;;  %v5234_v4 = vld [vmem:[%s10348_s3 + $0x568] sm:$0xff] }
 0x308   : > { %6471 = vmatpush3.bf16.msra.mxu1 %v6470_v29  ;;  %6449 = vmatprep.subr.bf16.mxu0 %v6448_v10  ;;  %v5250_v29 = vld [vmem:[%s10348_s3 + $0x5e8] sm:$0xff]  ;;  %v5233_v6 = vld [vmem:[%s10348_s3 + $0x560] sm:$0xff]  ;;  %v6534_v50 = vpack.c.bf16 %v5272_v28, %v5271_v55  ;;  %v10424_v38 = vld [vmem:[#allocation19_spill] sm:$0xff] }
 0x309   : > { %6473 = vmatprep.subr.bf16.mxu1 %v6472_v33  ;;  %v10421_v33 = vld [vmem:[#allocation14_spill] sm:$0xff]  ;;  %v6498_v37 = vpack.c.bf16 %v5234_v4, %v5233_v6  ;;  %v5275_v16 = vld [vmem:[%s10349_s4 + $0x230] sm:$0xff]  ;;  %v5276_v53 = vld [vmem:[%s10349_s4 + $0x238] sm:$0xff] }
 0x30a   : > { %3529 = vmatmul.mubr.f32.vlgmr.msra.gmra.mrb[26].mxu0 %v10416_v46  ;;  %v5274_v7 = vld [vmem:[%s10349_s4 + $0x228] sm:$0xff]  ;;  %v5291_v46 = vld [vmem:[%s10349_s4 + $0x2b0] sm:$0xff]  ;;  %v5293_v1 = vld [vmem:[%s10349_s4 + $0x2c0] sm:$0xff] }
 0x30b   : > { %3533 = vmatprep.mubr.f32.mxu0 %v10417_v42  ;;  %6451 = vmatpush3.bf16.msra.mxu0 %v6448_v10  ;;  %v6532_v10 = vpack.c.bf16 %v5288_v60, %v5287_v15  ;;  %v5254_v48 = vld [vmem:[%s10348_s3 + $0x608] sm:$0xff]  ;;  %v5255_v34 = vld [vmem:[%s10348_s3 + $0x610] sm:$0xff]  ;;  %v5256_v21 = vld [vmem:[%s10348_s3 + $0x618] sm:$0xff] }
 0x30c   : > { %6475 = vmatpush3.bf16.msra.mxu1 %v6474_v51  ;;  %6453 = vmatprep.subr.bf16.mxu0 %v6452_v58  ;;  %v5251_v51 = vld [vmem:[%s10348_s3 + $0x5f0] sm:$0xff]  ;;  %v5294_v39 = vld [vmem:[%s10349_s4 + $0x2c8] sm:$0xff]  ;;  %v10428_v47 = vld [vmem:[#allocation20_spill] sm:$0xff]  ;;  %v6508_v60 = vpack.c.bf16 %v5256_v21, %v5255_v34 }
 0x30d   : > { %6477 = vmatprep.subr.bf16.mxu1 %v6476_v36  ;;  %v5273_v36 = vld [vmem:[%s10349_s4 + $0x220] sm:$0xff]  ;;  %v5296_v15 = vld [vmem:[%s10349_s4 + $0x2d8] sm:$0xff]  ;;  %v5239_v31 = vld [vmem:[%s10348_s3 + $0x590] sm:$0xff] }
 0x30e   : > { %3534 = vmatmul.mubr.f32.gmra.mrb[28].mxu0 %v10418_v18  ;;  %v6538_v45 = vpack.c.bf16 %v5274_v7, %v5273_v36  ;;  %v5240_v54 = vld [vmem:[%s10348_s3 + $0x598] sm:$0xff]  ;;  %v5259_v6 = vld [vmem:[%s10348_s3 + $0x630] sm:$0xff]  ;;  %v10431_v34 = vld [vmem:[#allocation18_spill] sm:$0xff] }
 0x30f   : > { %3538 = vmatprep.mubr.f32.mxu0 %v9061_v25  ;;  %6455 = vmatpush3.bf16.msra.mxu0 %v6452_v58  ;;  %v5285_v25 = vld [vmem:[%s10349_s4 + $0x280] sm:$0xff]  ;;  %v5280_v55 = vld [vmem:[%s10349_s4 + $0x258] sm:$0xff]  ;;  %v6510_v28 = vpack.c.bf16 %v5240_v54, %v5239_v31  ;;  %v5299_v36 = vld [vmem:[%s10349_s4 + $0x2f0] sm:$0xff] }
 0x310   : > { %6479 = vmatpush3.bf16.msra.mxu1 %v6478_v61  ;;  %6489 = vmatprep.subr.bf16.mxu0 %v6488_v41  ;;  %v6528_v32 = vpack.c.bf16 %v5286_v49, %v5285_v25  ;;  %v5235_v61 = vld [vmem:[%s10348_s3 + $0x570] sm:$0xff]  ;;  %v5236_v41 = vld [vmem:[%s10348_s3 + $0x578] sm:$0xff]  ;;  %v5237_v49 = vld [vmem:[%s10348_s3 + $0x580] sm:$0xff] }
 0x311   : > { %6481 = vmatprep.subr.bf16.mxu1 %v6480_v12  ;;  %v5253_v12 = vld [vmem:[%s10348_s3 + $0x600] sm:$0xff]  ;;  %v5260_v4 = vld [vmem:[%s10348_s3 + $0x638] sm:$0xff]  ;;  %v5302_v31 = vld [vmem:[%s10349_s4 + $0x308] sm:$0xff] }
 0x312   : > { %3539 = vmatmul.mubr.f32.gmra.mrb[30].mxu0 %v10419_v27  ;;  %v10427_v27 = vld [vmem:[#allocation22_spill] sm:$0xff]  ;;  %v6504_v25 = vpack.c.bf16 %v5254_v48, %v5253_v12  ;;  %v5300_v7 = vld [vmem:[%s10349_s4 + $0x2f8] sm:$0xff]  ;;  %v5317_v48 = vld [vmem:[%s10349_s4 + $0x380] sm:$0xff] }
 0x313   : > { %3543 = vmatprep.mubr.f32.mxu0 %v9139_v52  ;;  %v5248_v52 = vld [vmem:[%s10348_s3 + $0x5d8] sm:$0xff]  ;;  %v4048_v21 = vld [vmem:[%s10349_s4] sm:$0xff] }
 0x314   : > { %6483 = vmatpush3.bf16.msra.mxu1 %v6482_v40  ;;  %v6492_v19 = vpack.c.bf16 %v5248_v52, %v5247_v11  ;;  %v10426_v40 = vld [vmem:[#allocation16_spill] sm:$0xff]  ;;  %v6542_v11 = vpack.c.bf16 %v5276_v53, %v5275_v16  ;;  %v5278_v52 = vld [vmem:[%s10349_s4 + $0x248] sm:$0xff]  ;;  %v5263_v16 = vld [vmem:[%s10348_s3 + $0x650] sm:$0xff] }
 0x315   : > { %6485 = vmatprep.subr.bf16.mxu1 %v6484_v44  ;;  %v6502_v44 = vpack.c.bf16 %v5236_v41, %v5235_v61  ;;  %v5283_v61 = vld [vmem:[%s10349_s4 + $0x270] sm:$0xff]  ;;  %v5284_v41 = vld [vmem:[%s10349_s4 + $0x278] sm:$0xff] }
 0x316   : > { %3544 = vmatmul.mubr.f32.gmra.mrb[32].mxu0 %v10420_v2  ;;  %v5277_v2 = vld [vmem:[%s10349_s4 + $0x240] sm:$0xff]  ;;  %v5264_v53 = vld [vmem:[%s10348_s3 + $0x658] sm:$0xff] }
 0x317   : > { %5824 = vmatprep.mubr.msk.f32.mxu0 %vm277_vm9, %v9091_v13  ;;  %v5249_v13 = vld [vmem:[%s10348_s3 + $0x5e0] sm:$0xff] }
 0x318   : > { %6487 = vmatpush3.bf16.msra.mxu1 %v6486_v14  ;;  %v6496_v43 = vpack.c.bf16 %v5250_v29, %v5249_v13  ;;  %v5238_v14 = vld [vmem:[%s10348_s3 + $0x588] sm:$0xff] }
 0x319   : > { %6529 = vmatprep.subr.bf16.mxu1 %v6528_v32  ;;  %v6544_v32 = vpack.c.bf16 %v5294_v39, %v5293_v1  ;;  %v6506_v5 = vpack.c.bf16 %v5238_v14, %v5237_v49  ;;  %v5258_v13 = vld [vmem:[%s10348_s3 + $0x628] sm:$0xff]  ;;  %v6524_v1 = vpack.c.bf16 %v5264_v53, %v5263_v16  ;;  %v4064_v39 = vld [vmem:[%s10349_s4 + $0x80] sm:$0xff]  ;;  %v10430_v14 = vld [vmem:[#allocation15_spill] sm:$0xff] }
 0x31a   : > { %5825 = vmatmul.mubr.msk.f32.vlgmr.msra.gmra.mrb[22].mxu0 %vm277_vm9, %v9093_v63  ;;  %v5289_v63 = vld [vmem:[%s10349_s4 + $0x2a0] sm:$0xff]  ;;  %v4074_v53 = vld [vmem:[%s10349_s4 + $0xd0] sm:$0xff] }
 0x31b   : > { %3837 = vmatmul.mubr.f32.vlgmr.msra.gmra.mrb[30].mxu1 %v10421_v33  ;;  %6491 = vmatpush3.bf16.msra.mxu0 %v6490_v35  ;;  %v6536_v58 = vpack.c.bf16 %v5290_v3, %v5289_v63  ;;  %v5295_v35 = vld [vmem:[%s10349_s4 + $0x2d0] sm:$0xff]  ;;  %v5297_v33 = vld [vmem:[%s10349_s4 + $0x2e0] sm:$0xff] }
 0x31c   : > { %5827 = vmatprep.mubr.msk.f32.mxu0 %vm277_vm9, %v9263_v30  ;;  %3841 = vmatprep.mubr.f32.mxu1 %v10422_v24  ;;  %v5252_v30 = vld [vmem:[%s10348_s3 + $0x5f8] sm:$0xff]  ;;  %v6548_v29 = vpack.c.bf16 %v5296_v15, %v5295_v35  ;;  %v5241_v3 = vld [vmem:[%s10348_s3 + $0x5a0] sm:$0xff]  ;;  %v5242_v24 = vld [vmem:[%s10348_s3 + $0x5a8] sm:$0xff] }
 0x31d   : > { %6493 = vmatprep.subr.bf16.mxu0 %v6492_v19  ;;  %6531 = vmatpush3.bf16.msra.mxu1 %v6530_v57  ;;  %v6500_v42 = vpack.c.bf16 %v5252_v30, %v5251_v51  ;;  %v5257_v19 = vld [vmem:[%s10348_s3 + $0x620] sm:$0xff]  ;;  %v6546_v57 = vpack.c.bf16 %v5278_v52, %v5277_v2  ;;  %v4050_v52 = vld [vmem:[%s10349_s4 + $0x10] sm:$0xff]  ;;  %v4069_v35 = vld [vmem:[%s10349_s4 + $0xa8] sm:$0xff] }
 0x31e   : > { %5828 = vmatmul.mubr.msk.f32.gmra.mrb[24].mxu0 %vm277_vm9, %v9290_v26  ;;  %6533 = vmatprep.subr.bf16.mxu1 %v6532_v10  ;;  %v5292_v26 = vld [vmem:[%s10349_s4 + $0x2b8] sm:$0xff]  ;;  %v5279_v10 = vld [vmem:[%s10349_s4 + $0x250] sm:$0xff]  ;;  %v6512_v63 = vpack.c.bf16 %v5258_v13, %v5257_v19  ;;  %v5281_v30 = vld [vmem:[%s10349_s4 + $0x260] sm:$0xff] }
 0x31f   : > { %3842 = vmatmul.mubr.f32.gmra.mrb[32].mxu1 %v10423_v22  ;;  %6495 = vmatpush3.bf16.msra.mxu0 %v6494_v56  ;;  %v6540_v18 = vpack.c.bf16 %v5292_v26, %v5291_v46  ;;  %v5298_v56 = vld [vmem:[%s10349_s4 + $0x2e8] sm:$0xff]  ;;  %v6516_v22 = vpack.c.bf16 %v5260_v4, %v5259_v6  ;;  %v5244_v46 = vld [vmem:[%s10348_s3 + $0x5b8] sm:$0xff]  ;;  %v5261_v26 = vld [vmem:[%s10348_s3 + $0x640] sm:$0xff] }
 0x320   : > { %3846 = vmatprep.mubr.f32.mxu1 %v10424_v38  ;;  %3921 = vmatprep.mubr.f32.mxu0 %v10425_v0  ;;  %v6552_v51 = vpack.c.bf16 %v5298_v56, %v5297_v33  ;;  %v5262_v38 = vld [vmem:[%s10348_s3 + $0x648] sm:$0xff]  ;;  %v5304_v6 = vld [vmem:[%s10349_s4 + $0x318] sm:$0xff] }
 0x321   : > { %6497 = vmatprep.subr.bf16.mxu0 %v6496_v43  ;;  %6535 = vmatpush3.bf16.msra.mxu1 %v6534_v50  ;;  %v6550_v43 = vpack.c.bf16 %v5280_v55, %v5279_v10  ;;  %v5282_v50 = vld [vmem:[%s10349_s4 + $0x268] sm:$0xff]  ;;  %v4070_v10 = vld [vmem:[%s10349_s4 + $0xb0] sm:$0xff]  ;;  %v4071_v55 = vld [vmem:[%s10349_s4 + $0xb8] sm:$0xff] }
 0x322   : > { %6537 = vmatprep.subr.bf16.mxu1 %v6536_v58  ;;  %v6514_v58 = vpack.c.bf16 %v5242_v24, %v5241_v3  ;;  %v6554_v0 = vpack.c.bf16 %v5282_v50, %v5281_v30  ;;  %v4053_v13 = vld [vmem:[%s10349_s4 + $0x28] sm:$0xff]  ;;  %v5303_v24 = vld [vmem:[%s10349_s4 + $0x310] sm:$0xff]  ;;  %v5321_v30 = vld [vmem:[%s10349_s4 + $0x3a0] sm:$0xff] }
 0x323   : > { %3847 = vmatmul.mubr.f32.gmra.mrb[34].mxu1 %v10426_v40  ;;  %6499 = vmatpush3.bf16.msra.mxu0 %v6498_v37  ;;  %v5243_v37 = vld [vmem:[%s10348_s3 + $0x5b0] sm:$0xff]  ;;  %v6558_v40 = vpack.c.bf16 %v5284_v41, %v5283_v61  ;;  %v5322_v50 = vld [vmem:[%s10349_s4 + $0x3a8] sm:$0xff]  ;;  %v4056_v41 = vld [vmem:[%s10349_s4 + $0x40] sm:$0xff] }
 0x324   : > { %3851 = vmatprep.mubr.f32.mxu1 %v10427_v27  ;;  %6501 = vmatprep.subr.bf16.mxu0 %v6500_v42  ;;  %v6556_v42 = vpack.c.bf16 %v5300_v7, %v5299_v36  ;;  %v6518_v12 = vpack.c.bf16 %v5244_v46, %v5243_v37  ;;  %v4065_v27 = vld [vmem:[%s10349_s4 + $0x88] sm:$0xff] }
 0x325   : > { %6539 = vmatpush3.bf16.msra.mxu1 %v6538_v45  ;;  %v5318_v45 = vld [vmem:[%s10349_s4 + $0x388] sm:$0xff]  ;;  %v6592_v49 = vpack.c.bf16 %v4065_v27, %v4064_v39  ;;  %v5307_v27 = vld [vmem:[%s10349_s4 + $0x330] sm:$0xff] }
 0x326   : > { %6541 = vmatprep.subr.bf16.mxu1 %v6540_v18  ;;  %v6520_v18 = vpack.c.bf16 %v5262_v38, %v5261_v26  ;;  %v4073_v36 = vld [vmem:[%s10349_s4 + $0xc8] sm:$0xff]  ;;  %v6568_v38 = vpack.c.bf16 %v5322_v50, %v5321_v30  ;;  %v5311_v50 = vld [vmem:[%s10349_s4 + $0x350] sm:$0xff] }
 0x327   : > { %3852 = vmatmul.mubr.f32.gmra.mrb[36].mxu1 %v10428_v47  ;;  %6503 = vmatpush3.bf16.msra.mxu0 %v6502_v44  ;;  %v6560_v44 = vpack.c.bf16 %v5318_v45, %v5317_v48  ;;  %v4051_v47 = vld [vmem:[%s10349_s4 + $0x18] sm:$0xff]  ;;  %v5323_v45 = vld [vmem:[%s10349_s4 + $0x3b0] sm:$0xff] }
 0x328   : > { %6505 = vmatprep.subr.bf16.mxu0 %v6504_v25  ;;  %v10429_v25 = vld [vmem:[#allocation8_spill] sm:$0xff]  ;;  %v6598_v15 = vpack.c.bf16 %v4051_v47, %v4050_v52 }
 0x329   : > { %6543 = vmatpush3.bf16.msra.mxu1 %v6542_v11  ;;  %v4066_v11 = vld [vmem:[%s10349_s4 + $0x90] sm:$0xff] }
 0x32a   : > { %6545 = vmatprep.subr.bf16.mxu1 %v6544_v32  ;;  %v10432_v32 = vld [vmem:[#allocation23_spill] sm:$0xff] }
 0x32b   : > { %6507 = vmatpush3.bf16.msra.mxu0 %v6506_v5  ;;  %v4068_v5 = vld [vmem:[%s10349_s4 + $0xa0] sm:$0xff] }
 0x32c   : > { %6509 = vmatprep.subr.bf16.mxu0 %v6508_v60  ;;  %v5301_v60 = vld [vmem:[%s10349_s4 + $0x300] sm:$0xff]  ;;  %v6600_v19 = vpack.c.bf16 %v4069_v35, %v4068_v5 }
 0x32d   : > { %6547 = vmatpush3.bf16.msra.mxu1 %v6546_v57  ;;  %v5319_v57 = vld [vmem:[%s10349_s4 + $0x390] sm:$0xff]  ;;  %v6562_v33 = vpack.c.bf16 %v5302_v31, %v5301_v60  ;;  %v4076_v35 = vld [vmem:[%s10349_s4 + $0xe0] sm:$0xff] }
 0x32e   : > { %6549 = vmatprep.subr.bf16.mxu1 %v6548_v29  ;;  %v5320_v29 = vld [vmem:[%s10349_s4 + $0x398] sm:$0xff] }
 0x32f   : > { %6511 = vmatpush3.bf16.msra.mxu0 %v6510_v28  ;;  %v6564_v3 = vpack.c.bf16 %v5320_v29, %v5319_v57 }
 0x330   : > { %6513 = vmatprep.subr.bf16.mxu0 %v6512_v63 }
 0x331   : > { %6551 = vmatpush3.bf16.msra.mxu1 %v6550_v43  ;;  %v6604_v43 = vpack.c.bf16 %v4071_v55, %v4070_v10  ;;  %v4060_v10 = vld [vmem:[%s10349_s4 + $0x60] sm:$0xff]  ;;  %v4061_v55 = vld [vmem:[%s10349_s4 + $0x68] sm:$0xff] }
 0x332   : > { %6553 = vmatprep.subr.bf16.mxu1 %v6552_v51  ;;  %v4055_v51 = vld [vmem:[%s10349_s4 + $0x38] sm:$0xff]  ;;  %v6618_v30 = vpack.c.bf16 %v4061_v55, %v4060_v10 }
 0x333   : > { %6515 = vmatpush3.bf16.msra.mxu0 %v6514_v58  ;;  %v4072_v58 = vld [vmem:[%s10349_s4 + $0xc0] sm:$0xff] }
 0x334   : > { %6517 = vmatprep.subr.bf16.mxu0 %v6516_v22  ;;  %v6566_v22 = vpack.c.bf16 %v5304_v6, %v5303_v24  ;;  %v6608_v61 = vpack.c.bf16 %v4073_v36, %v4072_v58  ;;  %v5312_v58 = vld [vmem:[%s10349_s4 + $0x358] sm:$0xff]  ;;  %v4062_v36 = vld [vmem:[%s10349_s4 + $0x70] sm:$0xff] }
 0x335   : > { %6555 = vmatpush3.bf16.msra.mxu1 %v6554_v0  ;;  %v5305_v0 = vld [vmem:[%s10349_s4 + $0x320] sm:$0xff] }
 0x336   : > { %6557 = vmatprep.subr.bf16.mxu1 %v6556_v42  ;;  %v5306_v42 = vld [vmem:[%s10349_s4 + $0x328] sm:$0xff] }
 0x337   : > { %6519 = vmatpush3.bf16.msra.mxu0 %v6518_v12  ;;  %v4057_v12 = vld [vmem:[%s10349_s4 + $0x48] sm:$0xff]  ;;  %v6570_v16 = vpack.c.bf16 %v5306_v42, %v5305_v0  ;;  %v5329_v0 = vld [vmem:[%s10349_s4 + $0x3e0] sm:$0xff] }
 0x338   : > { %6521 = vmatprep.subr.bf16.mxu0 %v6520_v18  ;;  %v6610_v39 = vpack.c.bf16 %v4057_v12, %v4056_v41  ;;  %v5330_v42 = vld [vmem:[%s10349_s4 + $0x3e8] sm:$0xff] }
 0x339   : > { %6559 = vmatpush3.bf16.msra.mxu1 %v6558_v40  ;;  %v4075_v40 = vld [vmem:[%s10349_s4 + $0xd8] sm:$0xff] }
 0x33a   : > { %3922 = vmatmul.mubr.f32.vlgmr.msra.gmra.mrb[34].mxu0 %v10429_v25  ;;  %6561 = vmatprep.subr.bf16.mxu1 %v6560_v44  ;;  %v5308_v25 = vld [vmem:[%s10349_s4 + $0x338] sm:$0xff] }
 0x33b   : > { %3926 = vmatprep.mubr.f32.mxu0 %v9360_v62  ;;  %6523 = vmatpush3.bf16.msra.mxu0 %v6520_v18  ;;  %v4049_v62 = vld [vmem:[%s10349_s4 + $0x8] sm:$0xff]  ;;  %v5324_v18 = vld [vmem:[%s10349_s4 + $0x3b8] sm:$0xff]  ;;  %v6574_v5 = vpack.c.bf16 %v5308_v25, %v5307_v27 }
 0x33c   : > { %6525 = vmatprep.subr.bf16.mxu0 %v6524_v1  ;;  %v5332_v27 = vld [vmem:[%s10349_s4 + $0x3f8] sm:$0xff] }
 0x33e   : > { %3927 = vmatmul.mubr.f32.gmra.mrb[36].mxu0 %v10430_v14 }
 0x33f   : > { %3931 = vmatprep.mubr.f32.mxu0 %v9357_v9  ;;  %6527 = vmatpush3.bf16.msra.mxu0 %v6524_v1  ;;  %v4067_v9 = vld [vmem:[%s10349_s4 + $0x98] sm:$0xff] }
 0x340   : > { %6593 = vmatprep.subr.bf16.mxu0 %v6592_v49  ;;  %v6596_v2 = vpack.c.bf16 %v4067_v9, %v4066_v11  ;;  %v4059_v11 = vld [vmem:[%s10349_s4 + $0x58] sm:$0xff]  ;;  %v6612_v9 = vpack.c.bf16 %v4075_v40, %v4074_v53  ;;  %v6584_v53 = vpack.c.bf16 %v5330_v42, %v5329_v0  ;;  %v5313_v40 = vld [vmem:[%s10349_s4 + $0x360] sm:$0xff]  ;;  %v4101_v0 = vld [vmem:[%s10349_s4 + $0x1a8] sm:$0xff] }
 0x342   : > { %3932 = vmatmul.mubr.f32.gmra.mrb[38].mxu0 %v10431_v34 }
 0x343   : > { %3936 = vmatprep.mubr.f32.mxu0 %v9422_v17  ;;  %v6594_v17 = vpack.c.bf16 %v4049_v62, %v4048_v21  ;;  %v6572_v21 = vpack.c.bf16 %v5324_v18, %v5323_v45  ;;  %v4058_v62 = vld [vmem:[%s10349_s4 + $0x50] sm:$0xff] }
 0x346   : > { %3937 = vmatmul.mubr.f32.gmra.mrb[40].mxu0 %v10432_v32  ;;  %v5325_v32 = vld [vmem:[%s10349_s4 + $0x3c0] sm:$0xff] }
 0x347   : > { %5838 = vmatprep.mubr.msk.f32.mxu0 %vm277_vm9, %v9379_v8 }
 0x348   : > { %v9937_v8 = vpop.permute.xlu0 %6722 }
 0x349   : > { %v6725_v54 = vunpack.i.h.bf16 %v9937_v8 }
 0x34a   : > { %5839 = vmatmul.mubr.msk.f32.vlgmr.msra.gmra.mrb[22].mxu0 %vm277_vm9, %v9354_v59  ;;  %v4052_v59 = vld [vmem:[%s10349_s4 + $0x20] sm:$0xff] }
 0x34b   : > { %5841 = vmatprep.mubr.msk.f32.mxu0 %vm277_vm9, %v9419_v23  ;;  %6595 = vmatpush3.bf16.msra.mxu0 %v6594_v17  ;;  %v6724_v23 = vunpack.i.l.bf16 %v9937_v8  ;;  %v6602_v63 = vpack.c.bf16 %v4053_v13, %v4052_v59  ;;  %v5326_v17 = vld [vmem:[%s10349_s4 + $0x3c8] sm:$0xff]  ;;  %v6614_v59 = vpack.c.bf16 %v4059_v11, %v4058_v62  ;;  %v5315_v62 = vld [vmem:[%s10349_s4 + $0x370] sm:$0xff]  ;;  %v5316_v11 = vld [vmem:[%s10349_s4 + $0x378] sm:$0xff] }
 0x34c   : > { %6597 = vmatprep.subr.bf16.mxu0 %v6596_v2  ;;  %v4178_v56 = vpop.permute.xlu0 %4177  ;;  %v6576_v29 = vpack.c.bf16 %v5326_v17, %v5325_v32 }
 0x34d   : > { %v4219_v28 = vsel %vm4217_vm12, %v6724_v23, %v6725_v54  ;;  %v4218_v4 = vsel %vm4217_vm12, %v4178_v56, %v6724_v23  ;;  %v5309_v23 = vld [vmem:[%s10349_s4 + $0x340] sm:$0xff]  ;;  %v5328_v56 = vld [vmem:[%s10349_s4 + $0x3d8] sm:$0xff] }
 0x34e   : > { %5842 = vmatmul.mubr.msk.f32.gmra.mrb[24].mxu0 %vm277_vm9, %v9460_v20  ;;  %4314 = vmatprep.mubr.f32.mxu1 %v4219_v28  ;;  %v4054_v20 = vld [vmem:[%s10349_s4 + $0x30] sm:$0xff] }
 0x34f   : > { %6599 = vmatpush3.bf16.msra.mxu0 %v6598_v15  ;;  %4315 = vmatmul.mubr.f32.vlgmr.msra.gmra.mrb[38].mxu1 %v4218_v4  ;;  %v9995_v7 = vpop.permute.xlu1 %6727  ;;  %v6606_v26 = vpack.c.bf16 %v4055_v51, %v4054_v20  ;;  %v4077_v15 = vld [vmem:[%s10349_s4 + $0xe8] sm:$0xff]  ;;  %v4078_v20 = vld [vmem:[%s10349_s4 + $0xf0] sm:$0xff]  ;;  %v4079_v4 = vld [vmem:[%s10349_s4 + $0xf8] sm:$0xff] }
 0x350   : > { %6601 = vmatprep.subr.bf16.mxu0 %v6600_v19  ;;  %6563 = vmatpush3.bf16.msra.mxu1 %v6562_v33  ;;  %v6730_v37 = vunpack.i.h.bf16 %v9995_v7  ;;  %v6729_v46 = vunpack.i.l.bf16 %v9995_v7  ;;  %v5310_v19 = vld [vmem:[%s10349_s4 + $0x348] sm:$0xff]  ;;  %v6616_v28 = vpack.c.bf16 %v4077_v15, %v4076_v35  ;;  %v5327_v33 = vld [vmem:[%s10349_s4 + $0x3d0] sm:$0xff]  ;;  %v6590_v35 = vpack.c.bf16 %v5316_v11, %v5315_v62 }
 0x351   : > { %6565 = vmatprep.subr.bf16.mxu1 %v6564_v3  ;;  %v6578_v6 = vpack.c.bf16 %v5310_v19, %v5309_v23  ;;  %v4080_v19 = vld [vmem:[%s10349_s4 + $0x100] sm:$0xff] }
 0x352   : > { %v4223_v48 = vsel %vm4217_vm12, %v6729_v46, %v6730_v37 }
 0x353   : > { %6603 = vmatpush3.bf16.msra.mxu0 %v6602_v63  ;;  %4319 = vmatprep.mubr.f32.mxu1 %v4223_v48  ;;  %v6582_v48 = vpack.c.bf16 %v5312_v58, %v5311_v50  ;;  %v4082_v50 = vld [vmem:[%s10349_s4 + $0x110] sm:$0xff] }
 0x354   : > { %6605 = vmatprep.subr.bf16.mxu0 %v6604_v43  ;;  %6567 = vmatpush3.bf16.msra.mxu1 %v6566_v22  ;;  %v10026_v44 = vpop.permute.xlu0 %6737 }
 0x355   : > { %6569 = vmatprep.subr.bf16.mxu1 %v6568_v38  ;;  %v6739_v49 = vunpack.i.l.bf16 %v10026_v44  ;;  %v6740_v2 = vunpack.i.h.bf16 %v10026_v44  ;;  %v4063_v38 = vld [vmem:[%s10349_s4 + $0x78] sm:$0xff] }
 0x356   : > { %v6733_v1 = vpop.permute.xlu1 %6732 }
 0x357   : > { %6607 = vmatpush3.bf16.msra.mxu0 %v6606_v26  ;;  %v6735_v14 = vunpack.i.h.bf16 %v6733_v1  ;;  %v6734_v34 = vunpack.i.l.bf16 %v6733_v1  ;;  %v6580_v26 = vpack.c.bf16 %v5328_v56, %v5327_v33  ;;  %v5314_v1 = vld [vmem:[%s10349_s4 + $0x368] sm:$0xff]  ;;  %v4099_v33 = vld [vmem:[%s10349_s4 + $0x198] sm:$0xff] }
 0x358   : > { %6609 = vmatprep.subr.bf16.mxu0 %v6608_v61  ;;  %6571 = vmatpush3.bf16.msra.mxu1 %v6570_v16  ;;  %v6620_v61 = vpack.c.bf16 %v4079_v4, %v4078_v20  ;;  %v6622_v16 = vpack.c.bf16 %v4063_v38, %v4062_v36  ;;  %v6586_v25 = vpack.c.bf16 %v5314_v1, %v5313_v40  ;;  %v4100_v38 = vld [vmem:[%s10349_s4 + $0x1a0] sm:$0xff] }
 0x359   : > { %v4222_v52 = vsel %vm4217_vm12, %v6734_v34, %v6729_v46  ;;  %v4227_v47 = vsel %vm4217_vm12, %v6735_v14, %v6739_v49  ;;  %v10058_v60 = vpop.permute.xlu0 %6747  ;;  %6573 = vmatprep.subr.bf16.mxu1 %v6572_v21  ;;  %v4226_v3 = vsel %vm4217_vm12, %v6740_v2, %v6735_v14  ;;  %v4096_v2 = vld [vmem:[%s10349_s4 + $0x180] sm:$0xff] }
 0x35a   : > { %v10060_v31 = vpop.permute.xlu1 %6742  ;;  %4320 = vmatmul.mubr.f32.gmra.mrb[40].mxu1 %v4222_v52  ;;  %v6749_v63 = vunpack.i.l.bf16 %v10058_v60  ;;  %v6750_v22 = vunpack.i.h.bf16 %v10058_v60  ;;  %v4097_v52 = vld [vmem:[%s10349_s4 + $0x188] sm:$0xff] }
 0x35b   : > { %6611 = vmatpush3.bf16.msra.mxu0 %v6610_v39  ;;  %v6745_v13 = vunpack.i.h.bf16 %v10060_v31  ;;  %v6744_v57 = vunpack.i.l.bf16 %v10060_v31  ;;  %4324 = vmatprep.mubr.f32.mxu1 %v4227_v47  ;;  %v5331_v39 = vld [vmem:[%s10349_s4 + $0x3f0] sm:$0xff]  ;;  %v6624_v23 = vpack.c.bf16 %v4097_v52, %v4096_v2 }
 0x35c   : > { %6613 = vmatprep.subr.bf16.mxu0 %v6612_v9  ;;  %6575 = vmatpush3.bf16.msra.mxu1 %v6574_v5  ;;  %v6588_v21 = vpack.c.bf16 %v5332_v27, %v5331_v39  ;;  %v4102_v39 = vld [vmem:[%s10349_s4 + $0x1b0] sm:$0xff]  ;;  %v4103_v27 = vld [vmem:[%s10349_s4 + $0x1b8] sm:$0xff] }
 0x35d   : > { %v4231_v24 = vsel %vm4217_vm12, %v6744_v57, %v6745_v13  ;;  %6577 = vmatprep.subr.bf16.mxu1 %v6576_v29  ;;  %v4230_v41 = vsel %vm4217_vm12, %v6749_v63, %v6744_v57  ;;  %v4081_v57 = vld [vmem:[%s10349_s4 + $0x108] sm:$0xff]  ;;  %v4090_v31 = vld [vmem:[%s10349_s4 + $0x150] sm:$0xff] }
 0x35e   : > { %v10093_v43 = vpop.permute.xlu0 %6757  ;;  %4325 = vmatmul.mubr.f32.gmra.mrb[42].mxu1 %v4226_v3 }
 0x35f   : > { %v10095_v51 = vpop.permute.xlu1 %6752  ;;  %6615 = vmatpush3.bf16.msra.mxu0 %v6614_v59  ;;  %4329 = vmatprep.mubr.f32.mxu1 %v4231_v24  ;;  %v6759_v56 = vunpack.i.l.bf16 %v10093_v43 }
 0x360   : > { %v6754_v46 = vunpack.i.l.bf16 %v10095_v51  ;;  %6617 = vmatprep.subr.bf16.mxu0 %v6616_v28  ;;  %6579 = vmatpush3.bf16.msra.mxu1 %v6578_v6  ;;  %v4098_v28 = vld [vmem:[%s10349_s4 + $0x190] sm:$0xff]  ;;  %v6755_v63 = vunpack.i.h.bf16 %v10095_v51  ;;  %v6626_v6 = vpack.c.bf16 %v4081_v57, %v4080_v19  ;;  %v4083_v51 = vld [vmem:[%s10349_s4 + $0x118] sm:$0xff]  ;;  %v4088_v57 = vld [vmem:[%s10349_s4 + $0x140] sm:$0xff] }
 0x361   : > { %6581 = vmatprep.subr.bf16.mxu1 %v6580_v26  ;;  %v4220_v26 = vsel %vm4217_vm12, %v6725_v54, %v6750_v22  ;;  %v6630_v54 = vpack.c.bf16 %v4083_v51, %v4082_v50  ;;  %v4092_v50 = vld [vmem:[%s10349_s4 + $0x160] sm:$0xff]  ;;  %v4093_v51 = vld [vmem:[%s10349_s4 + $0x168] sm:$0xff] }
 0x362   : > { %v4221_v12 = vsel %vm4217_vm12, %v6750_v22, %v6754_v46  ;;  %4330 = vmatmul.mubr.f32.gmra.mrb[44].mxu1 %v4230_v41  ;;  %v6760_v22 = vunpack.i.h.bf16 %v10093_v43  ;;  %v4224_v43 = vsel %vm4217_vm12, %v6730_v37, %v6755_v63 }
 0x363   : > { %v10121_v45 = vpop.permute.xlu0 %6772  ;;  %v10123_v18 = vpop.permute.xlu1 %6762  ;;  %6619 = vmatpush3.bf16.msra.mxu0 %v6618_v30  ;;  %4399 = vmatprep.mubr.f32.mxu1 %v4221_v12  ;;  %v6628_v30 = vpack.c.bf16 %v4099_v33, %v4098_v28  ;;  %v4107_v28 = vld [vmem:[%s10349_s4 + $0x1d8] sm:$0xff] }
 0x364   : > { %6621 = vmatprep.subr.bf16.mxu0 %v6620_v61  ;;  %6583 = vmatpush3.bf16.msra.mxu1 %v6582_v48  ;;  %v6764_v42 = vunpack.i.l.bf16 %v10123_v18  ;;  %v4225_v61 = vsel %vm4217_vm12, %v6755_v63, %v6759_v56  ;;  %v6632_v48 = vpack.c.bf16 %v4101_v0, %v4100_v38  ;;  %v6765_v37 = vunpack.i.h.bf16 %v10123_v18  ;;  %v4104_v18 = vld [vmem:[%s10349_s4 + $0x1c0] sm:$0xff]  ;;  %v4094_v0 = vld [vmem:[%s10349_s4 + $0x170] sm:$0xff] }
 0x365   : > { %6585 = vmatprep.subr.bf16.mxu1 %v6584_v53  ;;  %v4085_v53 = vld [vmem:[%s10349_s4 + $0x128] sm:$0xff]  ;;  %v4228_v52 = vsel %vm4217_vm12, %v6739_v49, %v6760_v22 }
 0x367   : > { %v10137_v14 = vpop.permute.xlu0 %6777  ;;  %v10139_v34 = vpop.permute.xlu1 %6767  ;;  %6623 = vmatpush3.bf16.msra.mxu0 %v6622_v16  ;;  %v4084_v16 = vld [vmem:[%s10349_s4 + $0x120] sm:$0xff] }
 0x368   : > { %v6780_v9 = vunpack.i.h.bf16 %v10137_v14  ;;  %v6770_v32 = vunpack.i.h.bf16 %v10139_v34  ;;  %v6769_v17 = vunpack.i.l.bf16 %v10139_v34  ;;  %6587 = vmatpush3.bf16.msra.mxu1 %v6586_v25  ;;  %v6779_v25 = vunpack.i.l.bf16 %v10137_v14  ;;  %v4086_v14 = vld [vmem:[%s10349_s4 + $0x130] sm:$0xff] }
 0x369   : > { %6589 = vmatprep.subr.bf16.mxu1 %v6588_v21  ;;  %v4229_v21 = vsel %vm4217_vm12, %v6760_v22, %v6764_v42  ;;  %v6634_v7 = vpack.c.bf16 %v4085_v53, %v4084_v16  ;;  %v4095_v42 = vld [vmem:[%s10349_s4 + $0x178] sm:$0xff] }
 0x36a   : > { %v4461_v47 = vsel %vm4217_vm12, %v6780_v9, %v6769_v17  ;;  %v4460_v5 = vsel %vm4217_vm12, %v6770_v32, %v6780_v9  ;;  %v6636_v9 = vpack.c.bf16 %v4103_v27, %v4102_v39  ;;  %v4087_v32 = vld [vmem:[%s10349_s4 + $0x138] sm:$0xff] }
 0x36b   : > { %v10160_v15 = vpop.permute.xlu1 %6782  ;;  %v10162_v59 = vpop.permute.xlu0 %6787  ;;  %4556 = vmatprep.mubr.f32.mxu0 %v4461_v47  ;;  %v4105_v47 = vld [vmem:[%s10349_s4 + $0x1c8] sm:$0xff]  ;;  %v6638_v44 = vpack.c.bf16 %v4087_v32, %v4086_v14 }
 0x36c   : > { %v6785_v29 = vunpack.i.h.bf16 %v10160_v15  ;;  %v6784_v10 = vunpack.i.l.bf16 %v10160_v15  ;;  %v6789_v55 = vunpack.i.l.bf16 %v10162_v59  ;;  %4557 = vmatmul.mubr.f32.vlgmr.msra.gmra.mrb[42].mxu0 %v4460_v5  ;;  %6591 = vmatpush3.bf16.msra.mxu1 %v6590_v35  ;;  %v6775_v5 = vunpack.i.h.bf16 %v10121_v45 }
 0x36d   : > { %6625 = vmatprep.subr.bf16.mxu1 %v6624_v23  ;;  %v6774_v35 = vunpack.i.l.bf16 %v10121_v45  ;;  %v4233_v23 = vsel %vm4217_vm12, %v6765_v37, %v6779_v25  ;;  %v6640_v49 = vpack.c.bf16 %v4105_v47, %v4104_v18  ;;  %v4232_v45 = vsel %vm4217_vm12, %v6745_v13, %v6765_v37  ;;  %v4091_v13 = vld [vmem:[%s10349_s4 + $0x158] sm:$0xff] }
 0x36e   : > { %v4465_v3 = vsel %vm4217_vm12, %v6784_v10, %v6785_v29  ;;  %v4464_v24 = vsel %vm4217_vm12, %v6789_v55, %v6784_v10  ;;  %v4089_v10 = vld [vmem:[%s10349_s4 + $0x148] sm:$0xff]  ;;  %v4106_v55 = vld [vmem:[%s10349_s4 + $0x1d0] sm:$0xff] }
 0x36f   : > { %v10185_v20 = vpop.permute.xlu1 %6792  ;;  %v10187_v4 = vpop.permute.xlu0 %6797  ;;  %4561 = vmatprep.mubr.f32.mxu0 %v4465_v3  ;;  %4400 = vmatmul.mubr.f32.vlgmr.msra.gmra.mrb[46].mxu1 %v4220_v26  ;;  %v4463_v33 = vsel %vm4217_vm12, %v6774_v35, %v6775_v5  ;;  %v6642_v56 = vpack.c.bf16 %v4089_v10, %v4088_v57  ;;  %v6644_v63 = vpack.c.bf16 %v4107_v28, %v4106_v55  ;;  %v4108_v3 = vld [vmem:[%s10349_s4 + $0x1e0] sm:$0xff] }
 0x370   : > { %v6795_v58 = vunpack.i.h.bf16 %v10185_v20  ;;  %v6800_v36 = vunpack.i.h.bf16 %v10187_v4  ;;  %v6799_v46 = vunpack.i.l.bf16 %v10187_v4  ;;  %4562 = vmatmul.mubr.f32.gmra.mrb[44].mxu0 %v4464_v24  ;;  %4404 = vmatprep.mubr.f32.mxu1 %v4225_v61  ;;  %v4109_v24 = vld [vmem:[%s10349_s4 + $0x1e8] sm:$0xff]  ;;  %v6650_v26 = vpack.c.bf16 %v4093_v51, %v4092_v50 }
 0x371   : > { %6627 = vmatpush3.bf16.msra.mxu1 %v6626_v6  ;;  %v6646_v6 = vpack.c.bf16 %v4091_v13, %v4090_v31  ;;  %v6654_v61 = vpack.c.bf16 %v4095_v42, %v4094_v0 }
 0x372   : > { %v4469_v60 = vsel %vm4217_vm12, %v6795_v58, %v6799_v46  ;;  %v4468_v8 = vsel %vm4217_vm12, %v6800_v36, %v6795_v58  ;;  %6629 = vmatprep.subr.bf16.mxu1 %v6628_v30  ;;  %v6648_v30 = vpack.c.bf16 %v4109_v24, %v4108_v3  ;;  %v4110_v58 = vld [vmem:[%s10349_s4 + $0x1f0] sm:$0xff]  ;;  %v4111_v36 = vld [vmem:[%s10349_s4 + $0x1f8] sm:$0xff] }
 0x373   : > { %v10216_v41 = vpop.permute.xlu1 %6807  ;;  %v10218_v12 = vpop.permute.xlu0 %6802  ;;  %4566 = vmatprep.mubr.f32.mxu0 %v4469_v60  ;;  %4405 = vmatmul.mubr.f32.gmra.mrb[48].mxu1 %v4224_v43  ;;  %v6652_v38 = vpack.c.bf16 %v4111_v36, %v4110_v58  ;;  %v6794_v60 = vunpack.i.l.bf16 %v10185_v20 }
 0x374   : > { %v6805_v40 = vunpack.i.h.bf16 %v10218_v12  ;;  %v6804_v1 = vunpack.i.l.bf16 %v10218_v12  ;;  %4567 = vmatmul.mubr.f32.gmra.mrb[46].mxu0 %v4468_v8  ;;  %4409 = vmatprep.mubr.f32.mxu1 %v4229_v21  ;;  %v6790_v8 = vunpack.i.h.bf16 %v10162_v59  ;;  %v6810_v22 = vunpack.i.h.bf16 %v10216_v41 }
 0x375   : > { %6631 = vmatpush3.bf16.msra.mxu1 %v6630_v54  ;;  %v4462_v54 = vsel %vm4217_vm12, %v6769_v17, %v6774_v35 }
 0x376   : > { %v4473_v62 = vsel %vm4217_vm12, %v6804_v1, %v6805_v40  ;;  %6633 = vmatprep.subr.bf16.mxu1 %v6632_v48  ;;  %v6809_v48 = vunpack.i.l.bf16 %v10216_v41  ;;  %v4467_v16 = vsel %vm4217_vm12, %v6790_v8, %v6794_v60  ;;  %v4466_v53 = vsel %vm4217_vm12, %v6785_v29, %v6790_v8 }
 0x377   : > { %v10243_v11 = vpop.permute.xlu1 %6812  ;;  %4571 = vmatprep.mubr.f32.mxu0 %v4473_v62  ;;  %4410 = vmatmul.mubr.f32.gmra.mrb[50].mxu1 %v4228_v52  ;;  %v4459_v34 = vpop.permute.xlu0 %4458 }
 0x378   : > { %v6814_v2 = vunpack.i.l.bf16 %v10243_v11  ;;  %4414 = vmatprep.mubr.f32.mxu1 %v4233_v23  ;;  %v6815_v20 = vunpack.i.h.bf16 %v10243_v11  ;;  %v4471_v59 = vsel %vm4217_vm12, %v6809_v48, %v6810_v22  ;;  %v4470_v17 = vsel %vm4217_vm12, %v6799_v46, %v6809_v48 }
 0x379   : > { %6635 = vmatpush3.bf16.msra.mxu1 %v6634_v7 }
 0x37a   : > { %v4472_v19 = vsel %vm4217_vm12, %v6814_v2, %v6804_v1  ;;  %6637 = vmatprep.subr.bf16.mxu1 %v6636_v9  ;;  %v4475_v41 = vsel %vm4217_vm12, %v6815_v20, %v4459_v34  ;;  %v4474_v15 = vsel %vm4217_vm12, %v6805_v40, %v6815_v20 }
 0x37b   : > { %4572 = vmatmul.mubr.f32.gmra.mrb[48].mxu0 %v4472_v19  ;;  %4415 = vmatmul.mubr.f32.gmra.mrb[52].mxu1 %v4232_v45 }
 0x37c   : > { %4641 = vmatprep.mubr.f32.mxu1 %v4463_v33 }
 0x37d   : > { %6639 = vmatpush3.bf16.msra.mxu1 %v6638_v44 }
 0x37e   : > { %6641 = vmatprep.subr.bf16.mxu1 %v6640_v49 }
 0x381   : > { %6643 = vmatpush3.bf16.msra.mxu1 %v6642_v56 }
 0x382   : > { %6645 = vmatprep.subr.bf16.mxu1 %v6644_v63 }
 0x385   : > { %6647 = vmatpush3.bf16.msra.mxu1 %v6646_v6 }
 0x386   : > { %6649 = vmatprep.subr.bf16.mxu1 %v6648_v30 }
 0x389   : > { %6651 = vmatpush3.bf16.msra.mxu1 %v6650_v26 }
 0x38a   : > { %6653 = vmatprep.subr.bf16.mxu1 %v6652_v38 }
 0x38d   : > { %6655 = vmatpush3.bf16.msra.mxu1 %v6654_v61 }
 0x390   : > { %4642 = vmatmul.mubr.f32.vlgmr.msra.gmra.mrb[54].mxu1 %v4462_v54 }
 0x391   : > { %4646 = vmatprep.mubr.f32.mxu1 %v4467_v16 }
 0x394   : > { %4647 = vmatmul.mubr.f32.gmra.mrb[56].mxu1 %v4466_v53 }
 0x395   : > { %4651 = vmatprep.mubr.f32.mxu1 %v4471_v59 }
 0x398   : > { %4652 = vmatmul.mubr.f32.gmra.mrb[58].mxu1 %v4470_v17 }
 0x399   : > { %4656 = vmatprep.mubr.f32.mxu1 %v4475_v41 }
 0x39c   : > { %4657 = vmatmul.mubr.f32.gmra.mrb[60].mxu1 %v4474_v15 }
 0x3a2   : > { %v5370_v29 = vpop.f32.mrb[14].mxu0  ;;  %v5414_v1 = vpop.f32.mrb[14].mxu1 }
 0x3a3   : > { %v5371_v43 = vpop.f32.mrb[15].mxu0  ;;  %v5415_v39 = vpop.f32.mrb[15].mxu1 }
 0x3a4   : > { %v5372_v27 = vadd.f32 %v5371_v43, %v5370_v29  ;;  %v5416_v25 = vadd.f32 %v5415_v39, %v5414_v1 }
 0x3a6   : > { %v3268_v21 = vadd.f32 %v5416_v25, %v5372_v27 }
 0x3ab   : > { %v5373_v62 = vpop.f32.mrb[16].mxu0 }
 0x3ac   : > { %v5374_v7 = vpop.f32.mrb[17].mxu0 }
 0x3ad   : > { %v5417_v4 = vpop.f32.mrb[16].mxu1  ;;  %v5375_v46 = vadd.f32 %v5374_v7, %v5373_v62 }
 0x3ae   : > { %v5418_v37 = vpop.f32.mrb[17].mxu1 }
 0x3af   : > { %v5419_v11 = vadd.f32 %v5418_v37, %v5417_v4 }
 0x3b0   : > { %v5376_v14 = vpop.f32.mrb[18].mxu0 }
 0x3b1   : > { %v3273_v9 = vadd.f32 %v5419_v11, %v5375_v46  ;;  %v5420_v32 = vpop.f32.mrb[18].mxu1  ;;  %v5377_v12 = vpop.f32.mrb[19].mxu0 }
 0x3b2   : > { %v5378_v2 = vadd.f32 %v5377_v12, %v5376_v14  ;;  %v5421_v40 = vpop.f32.mrb[19].mxu1 }
 0x3b3   : > { %v5422_v52 = vadd.f32 %v5421_v40, %v5420_v32 }
 0x3b5   : > { %v3278_v18 = vadd.f32 %v5422_v52, %v5378_v2 }
 0x3b6   : > { %v5379_v47 = vpop.f32.mrb[20].mxu0  ;;  %v5423_v5 = vpop.f32.mrb[20].mxu1 }
 0x3b7   : > { %v5380_v35 = vpop.f32.mrb[21].mxu0  ;;  %v5424_v23 = vpop.f32.mrb[21].mxu1 }
 0x3b8   : > { %v5381_v19 = vadd.f32 %v5380_v35, %v5379_v47  ;;  %v5425_v44 = vadd.f32 %v5424_v23, %v5423_v5 }
 0x3ba   : > { %v3283_v49 = vadd.f32 %v5425_v44, %v5381_v19 }
 0x3cd   : > { %v5466_v57 = vpop.f32.mrb[22].mxu1 }
 0x3ce   : > { %v5467_v10 = vpop.f32.mrb[23].mxu1 }
 0x3cf   : > { %v5468_v45 = vadd.f32 %v5467_v10, %v5466_v57 }
 0x3d1   : > { %v6660_v55 = vadd.f32 %v5468_v45, %v3268_v21  ;;  %v5469_v28 = vpop.f32.mrb[24].mxu1 }
 0x3d2   : > { %v5470_v33 = vpop.f32.mrb[25].mxu1 }
 0x3d3   : > { %v5471_v56 = vadd.f32 %v5470_v33, %v5469_v28 }
 0x3d5   : > { %v6656_v63 = vadd.f32 %v5471_v56, %v3273_v9  ;;  %v5472_v31 = vpop.f32.mrb[26].mxu1 }
 0x3d6   : > { %v5473_v13 = vpop.f32.mrb[27].mxu1 }
 0x3d7   : > { %v5474_v3 = vadd.f32 %v5473_v13, %v5472_v31 }
 0x3d9   : > { %v6668_v24 = vadd.f32 %v5474_v3, %v3278_v18  ;;  %v5475_v6 = vpop.f32.mrb[28].mxu1 }
 0x3da   : > { %v5476_v30 = vpop.f32.mrb[29].mxu1 }
 0x3db   : > { %v5477_v50 = vadd.f32 %v5476_v30, %v5475_v6 }
 0x3dd   : > { %v6664_v51 = vadd.f32 %v5477_v50, %v3283_v49  ;;  %v5510_v58 = vpop.f32.mrb[26].mxu0 }
 0x3de   : > { %v5511_v36 = vpop.f32.mrb[27].mxu0 }
 0x3df   : > { %v5512_v26 = vadd.f32 %v5511_v36, %v5510_v58 }
 0x3e1   : > { %v6661_v38 = vadd.f32 %v6660_v55, %v5512_v26  ;;  %v5513_v0 = vpop.f32.mrb[28].mxu0 }
 0x3e2   : > { %v5514_v42 = vpop.f32.mrb[29].mxu0 }
 0x3e3   : > { %v5515_v61 = vadd.f32 %v5514_v42, %v5513_v0 }
 0x3e5   : > { %v6657_v60 = vadd.f32 %v6656_v63, %v5515_v61  ;;  %v5516_v8 = vpop.f32.mrb[30].mxu0 }
 0x3e6   : > { %v5517_v54 = vpop.f32.mrb[31].mxu0 }
 0x3e7   : > { %v5518_v22 = vadd.f32 %v5517_v54, %v5516_v8 }
 0x3e9   : > { %v6669_v48 = vadd.f32 %v6668_v24, %v5518_v22  ;;  %v5519_v16 = vpop.f32.mrb[32].mxu0 }
 0x3ea   : > { %v5520_v53 = vpop.f32.mrb[33].mxu0 }
 0x3eb   : > { %v5521_v20 = vadd.f32 %v5520_v53, %v5519_v16 }
 0x3ed   : > { %v6665_v59 = vadd.f32 %v6664_v51, %v5521_v20 }
 0x3ee   : > { %v5562_v34 = vpop.f32.mrb[30].mxu1 }
 0x3ef   : > { %v5563_v17 = vpop.f32.mrb[31].mxu1 }
 0x3f0   : > { %v5564_v41 = vadd.f32 %v5563_v17, %v5562_v34 }
 0x3f2   : > { %v5565_v15 = vpop.f32.mrb[32].mxu1 }
 0x3f3   : > { %v5566_v29 = vpop.f32.mrb[33].mxu1 }
 0x3f4   : > { %v5567_v1 = vadd.f32 %v5566_v29, %v5565_v15 }
 0x3f6   : > { %v5568_v43 = vpop.f32.mrb[34].mxu1 }
 0x3f7   : > { %v5569_v39 = vpop.f32.mrb[35].mxu1 }
 0x3f8   : > { %v5570_v27 = vadd.f32 %v5569_v39, %v5568_v43 }
 0x3fa   : > { %v5571_v25 = vpop.f32.mrb[36].mxu1 }
 0x3fb   : > { %v5572_v21 = vpop.f32.mrb[37].mxu1 }
 0x3fc   : > { %v5573_v62 = vadd.f32 %v5572_v21, %v5571_v25 }
 0x40d   : > { %v5606_v4 = vpop.f32.mrb[34].mxu0 }
 0x40e   : > { %v5607_v7 = vpop.f32.mrb[35].mxu0 }
 0x40f   : > { %v5608_v46 = vadd.f32 %v5607_v7, %v5606_v4 }
 0x411   : > { %v3924_v37 = vadd.f32 %v5608_v46, %v5564_v41  ;;  %v5609_v11 = vpop.f32.mrb[36].mxu0 }
 0x412   : > { %v5610_v9 = vpop.f32.mrb[37].mxu0 }
 0x413   : > { %v5611_v14 = vadd.f32 %v5610_v9, %v5609_v11  ;;  %v6662_v32 = vadd.f32 %v6661_v38, %v3924_v37 }
 0x415   : > { %v3929_v12 = vadd.f32 %v5611_v14, %v5567_v1  ;;  %v5612_v2 = vpop.f32.mrb[38].mxu0 }
 0x416   : > { %v5613_v40 = vpop.f32.mrb[39].mxu0 }
 0x417   : > { %v5614_v52 = vadd.f32 %v5613_v40, %v5612_v2  ;;  %v6658_v18 = vadd.f32 %v6657_v60, %v3929_v12 }
 0x419   : > { %v3934_v47 = vadd.f32 %v5614_v52, %v5570_v27  ;;  %v5615_v5 = vpop.f32.mrb[40].mxu0 }
 0x41a   : > { %v5616_v35 = vpop.f32.mrb[41].mxu0 }
 0x41b   : > { %v5617_v23 = vadd.f32 %v5616_v35, %v5615_v5  ;;  %v6670_v19 = vadd.f32 %v6669_v48, %v3934_v47 }
 0x41d   : > { %v3939_v44 = vadd.f32 %v5617_v23, %v5573_v62  ;;  %v5840_v49 = vpop.f32.mrb[22].mxu0 }
 0x41e   : > { %v6659_v57 = vadd.f32 %v6658_v18, %v5840_v49  ;;  %v4008_v10 = vpop.f32.mrb[23].mxu0 }
 0x41f   : > { %v6663_v45 = vadd.f32 %v6662_v32, %v4008_v10  ;;  %v6666_v55 = vadd.f32 %v6665_v59, %v3939_v44 }
 0x420   : > { %v4034_v28 = vsel %vm277_vm9, %v6659_v57, 0.0 }
 0x421   : > { %v5843_v33 = vpop.f32.mrb[24].mxu0  ;;  %4035 = vadd.xlane.f32.xlu0 %v4034_v28  ;;  %v4031_v56 = vsel %vm277_vm9, %v6663_v45, 0.0 }
 0x422   : > { %v6667_v63 = vadd.f32 %v6666_v55, %v5843_v33  ;;  %v4018_v31 = vpop.f32.mrb[25].mxu0  ;;  %4032 = vadd.xlane.f32.xlu1 %v4031_v56  ;;  %v5658_v24 = vpop.f32.mrb[38].mxu1 }
 0x423   : > { %v6671_v13 = vadd.f32 %v6670_v19, %v4018_v31  ;;  %v5659_v30 = vpop.f32.mrb[39].mxu1 }
 0x424   : > { %v4040_v3 = vsel %vm277_vm9, %v6667_v63, 0.0  ;;  %v5660_v50 = vadd.f32 %v5659_v30, %v5658_v24 }
 0x425   : > { %v4037_v6 = vsel %vm277_vm9, %v6671_v13, 0.0 }
 0x426   : > { %4038 = vadd.xlane.f32.xlu0 %v4037_v6  ;;  %4041 = vadd.xlane.f32.xlu1 %v4040_v3 }
 0x42d   : > { %v5661_v51 = vpop.f32.mrb[40].mxu1 }
 0x42e   : > { %v5662_v58 = vpop.f32.mrb[41].mxu1 }
 0x42f   : > { %v5663_v36 = vadd.f32 %v5662_v58, %v5661_v51 }
 0x431   : > { %v5664_v26 = vpop.f32.mrb[42].mxu1 }
 0x432   : > { %v5665_v38 = vpop.f32.mrb[43].mxu1 }
 0x433   : > { %v5666_v0 = vadd.f32 %v5665_v38, %v5664_v26 }
 0x435   : > { %v5667_v42 = vpop.f32.mrb[44].mxu1 }
 0x436   : > { %v5668_v61 = vpop.f32.mrb[45].mxu1 }
 0x437   : > { %v5669_v60 = vadd.f32 %v5668_v61, %v5667_v42 }
 0x43f   : > { %v5746_v8 = vpop.f32.mrb[42].mxu0 }
 0x440   : > { %v5747_v54 = vpop.f32.mrb[43].mxu0 }
 0x441   : > { %v5748_v22 = vadd.f32 %v5747_v54, %v5746_v8 }
 0x442   : > { %v5702_v53 = vpop.f32.mrb[46].mxu1 }
 0x443   : > { %v5749_v48 = vpop.f32.mrb[44].mxu0  ;;  %v5703_v59 = vpop.f32.mrb[47].mxu1 }
 0x444   : > { %v5750_v16 = vpop.f32.mrb[45].mxu0  ;;  %v5704_v34 = vadd.f32 %v5703_v59, %v5702_v53 }
 0x445   : > { %v5751_v20 = vadd.f32 %v5750_v16, %v5749_v48 }
 0x446   : > { %v4402_v41 = vadd.f32 %v5704_v34, %v5660_v50  ;;  %v5705_v29 = vpop.f32.mrb[48].mxu1 }
 0x447   : > { %v5752_v17 = vpop.f32.mrb[46].mxu0  ;;  %v5706_v43 = vpop.f32.mrb[49].mxu1 }
 0x448   : > { %v5753_v15 = vpop.f32.mrb[47].mxu0  ;;  %v5707_v39 = vadd.f32 %v5706_v43, %v5705_v29  ;;  %v4559_v27 = vadd.f32 %v5748_v22, %v4402_v41 }
 0x449   : > { %v5754_v1 = vadd.f32 %v5753_v15, %v5752_v17 }
 0x44a   : > { %v4407_v25 = vadd.f32 %v5707_v39, %v5663_v36  ;;  %v5708_v21 = vpop.f32.mrb[50].mxu1 }
 0x44b   : > { %v5709_v62 = vpop.f32.mrb[51].mxu1 }
 0x44c   : > { %v5710_v7 = vadd.f32 %v5709_v62, %v5708_v21  ;;  %v4564_v46 = vadd.f32 %v5751_v20, %v4407_v25 }
 0x44e   : > { %v5755_v4 = vpop.f32.mrb[48].mxu0  ;;  %v4412_v9 = vadd.f32 %v5710_v7, %v5666_v0  ;;  %v5711_v14 = vpop.f32.mrb[52].mxu1 }
 0x44f   : > { %v5756_v37 = vpop.f32.mrb[49].mxu0  ;;  %v5712_v32 = vpop.f32.mrb[53].mxu1 }
 0x450   : > { %v5757_v11 = vadd.f32 %v5756_v37, %v5755_v4  ;;  %v5713_v12 = vadd.f32 %v5712_v32, %v5711_v14  ;;  %v4569_v2 = vadd.f32 %v5754_v1, %v4412_v9 }
 0x452   : > { %v4417_v40 = vadd.f32 %v5713_v12, %v5669_v60 }
 0x454   : > { %v4574_v52 = vadd.f32 %v5757_v11, %v4417_v40 }
 0x463   : > { %v5790_v18 = vpop.f32.mrb[54].mxu1 }
 0x464   : > { %v5791_v47 = vpop.f32.mrb[55].mxu1 }
 0x465   : > { %v5792_v5 = vadd.f32 %v5791_v47, %v5790_v18 }
 0x467   : > { %v4644_v35 = vadd.f32 %v5792_v5, %v4559_v27  ;;  %v5793_v23 = vpop.f32.mrb[56].mxu1 }
 0x468   : > { %v5794_v19 = vpop.f32.mrb[57].mxu1 }
 0x469   : > { %v5795_v44 = vadd.f32 %v5794_v19, %v5793_v23  ;;  %4663 = vst.msk [vmem:[%s259_s7] sm:$0xff] %vm4662_vm13, %v4644_v35 }
 0x46b   : > { %v4649_v49 = vadd.f32 %v5795_v44, %v4564_v46  ;;  %v5796_v57 = vpop.f32.mrb[58].mxu1 }
 0x46c   : > { %v5797_v10 = vpop.f32.mrb[59].mxu1 }
 0x46d   : > { %v5798_v45 = vadd.f32 %v5797_v10, %v5796_v57  ;;  %4664 = vst.msk [vmem:[%s259_s7 + $0x8] sm:$0xff] %vm4662_vm13, %v4649_v49 }
 0x46f   : > { %v4654_v55 = vadd.f32 %v5798_v45, %v4569_v2  ;;  %v5799_v28 = vpop.f32.mrb[60].mxu1 }
 0x470   : > { %v5800_v33 = vpop.f32.mrb[61].mxu1 }
 0x471   : > { %v5801_v56 = vadd.f32 %v5800_v33, %v5799_v28  ;;  %4665 = vst.msk [vmem:[%s259_s7 + $0x10] sm:$0xff] %vm4662_vm13, %v4654_v55 }
 0x473   : > { %v4659_v63 = vadd.f32 %v5801_v56, %v4574_v52 }
 0x475   : > { %4667 = vst.msk [vmem:[%s259_s7 + $0x18] sm:$0x7f] %vm4666_vm14, %v4659_v63 }
 0x4ae   : > { %v4036_v31 = vpop.xlane.xlu0 %4035 }
 0x4af   : > { %4045 = vst.msk [vmem:[%s264_s8 + $0x8] sm:$0xff] %vm4043_vm15, %v4036_v31  ;;  %v4033_v13 = vpop.xlane.xlu1 %4032 }
 0x4b0   : > { %4044 = vst.msk [vmem:[%s264_s8] sm:$0xff] %vm4043_vm15, %v4033_v13 }
 0x4b3   : > { %v4039_v3 = vpop.xlane.xlu0 %4038  ;;  %v4042_v24 = vpop.xlane.xlu1 %4041 }
 0x4b4   : > { %4046 = vst.msk [vmem:[%s264_s8 + $0x10] sm:$0xff] %vm4043_vm15, %v4039_v3  ;;  %4047 = vst.msk [vmem:[%s264_s8 + $0x18] sm:$0xff] %vm4043_vm15, %v4042_v24 }
 0x4b5 PF: > { %s17_s21 = sadd.s32 1, %s6823_s21  }
 0x4b6   : > { %p14_p4 = scmp.ge.s32.totalorder %s17_s21, 4  }
 0x4b8   :  { %16 = sbr.rel (!%p14_p4) target bundleno = 1 (0x1), region = 139 }

</bundles_post_ra>
